<compile_context>
chip_gen: v7x
topology: tpu7x:2x2x1
jax: 0.10.0
libtpu: 0.0.40
codegen_flags: <defaults>
</compile_context>

<pallas_src>
import functools

import jax
import jax.numpy as jnp
from jax.experimental import pallas as pl
from jax.experimental.pallas import tpu as pltpu


# ---------------------------------------------------------------------------
# Kernel A: degree pass + GCN message passing -> x1 [N, H]
#   grid = (2, n_tiles); pass 0 = degree(col), pass 1 = message scatter.
# ---------------------------------------------------------------------------
def _gcn_kernel(row_g_ref, col_s_ref, x_ref, wmpT_ref, bmp_ref,
                x1_ref, xw_s, dis_s):
    # row_g_ref: (TE, 1) int32 gather layout   (pad sentinel == N)
    # col_s_ref: (1, TE) int32 scatter layout  (pad sentinel == N)
    # x_ref: (N, Cin); wmpT_ref: (Cin, H); bmp_ref: (1, H)
    # x1_ref: (N, H) output (VMEM-resident accumulator across the whole grid)
    # xw_s:  (N, H) scratch: dis[j] * (x @ Wmp^T)[j]
    # dis_s: (N, 1) scratch: degree during pass 0, then deg^-1/2
    p = pl.program_id(0)
    i = pl.program_id(1)
    te = row_g_ref.shape[0]
    n = x1_ref.shape[0]

    col = col_s_ref[...]                                          # (1, TE)
    ids_s = jax.lax.broadcasted_iota(jnp.int32, (n, te), 0)
    oh_colT = (ids_s == col).astype(jnp.float32)                  # (N, TE), exact 0/1

    @pl.when(jnp.logical_and(p == 0, i == 0))
    def _():
        dis_s[...] = jnp.zeros_like(dis_s)

    @pl.when(p == 0)
    def _():
        # degree of col (self-loops included); padded entries (==N) contribute 0
        dis_s[...] += jnp.sum(oh_colT, axis=1, keepdims=True)

    @pl.when(jnp.logical_and(p == 1, i == 0))
    def _():
        deg = dis_s[...]
        dis_s[...] = jnp.where(deg > 0.0, jax.lax.rsqrt(deg), 0.0)
        xw_s[...] = dis_s[...] * jnp.dot(x_ref[...], wmpT_ref[...],
                                         preferred_element_type=jnp.float32)
        x1_ref[...] = jnp.zeros_like(x1_ref)

    @pl.when(p == 1)
    def _():
        row = row_g_ref[...]                                      # (TE, 1)
        ids_g = jax.lax.broadcasted_iota(jnp.int32, (te, n), 1)
        oh_row = (ids_g == row).astype(jnp.float32)               # (TE, N)
        # msg[e] = dis[row_e] * xw_raw[row_e]   (dis[row] baked into xw_s)
        msg = jnp.dot(oh_row, xw_s[...], preferred_element_type=jnp.float32)
        # raw scatter-add at col; dis[col] factor + bias deferred to the epilogue
        x1_ref[...] += jnp.dot(oh_colT, msg, preferred_element_type=jnp.float32)

    @pl.when(jnp.logical_and(p == 1, i == pl.num_programs(1) - 1))
    def _():
        x1_ref[...] = dis_s[...] * x1_ref[...] + bmp_ref[...]


# ---------------------------------------------------------------------------
# Kernel B: fused edge stages + recon
#   y = x1 @ W1^T @ W2^T (step 0, VMEM);  ef[e] = y[row_e] (per tile);
#   rowdeg accumulation (per tile);  x_recon = (rowdeg * (y @ W3^T)) @ W4^T (epilogue)
# ---------------------------------------------------------------------------
def _edge_kernel(row_g_ref, row_s_ref, x1_ref, w1T_ref, w2T_ref, w3T_ref, w4T_ref,
                 ef_ref, xrec_ref, y_s, t_s, rdeg_s):
    # row_g_ref: (TE, 1) int32 gather layout; row_s_ref: (1, TE) int32 scatter layout
    # x1_ref: (N, H); w1T: (H, Ce); w2T: (Ce, Cout); w3T: (Cout, H); w4T: (H, Cin)
    # ef_ref: (TE, Cout) per-tile output; xrec_ref: (N, Cin) output (written last step)
    # y_s: (N, Cout); t_s: (N, H); rdeg_s: (N, 1)
    i = pl.program_id(0)
    te = row_g_ref.shape[0]
    n = x1_ref.shape[0]

    @pl.when(i == 0)
    def _():
        y = jnp.dot(jnp.dot(x1_ref[...], w1T_ref[...],
                            preferred_element_type=jnp.float32),
                    w2T_ref[...], preferred_element_type=jnp.float32)
        y_s[...] = y                                              # (N, Cout)
        t_s[...] = jnp.dot(y, w3T_ref[...],
                           preferred_element_type=jnp.float32)    # (N, H)
        rdeg_s[...] = jnp.zeros_like(rdeg_s)

    # ef[e] = y[row_e]  via one-hot gather matmul (padded rows -> zero, sliced off)
    row_g = row_g_ref[...]                                        # (TE, 1)
    ids_g = jax.lax.broadcasted_iota(jnp.int32, (te, n), 1)
    oh_row = (ids_g == row_g).astype(jnp.float32)                 # (TE, N)
    ef_ref[...] = jnp.dot(oh_row, y_s[...],
                          preferred_element_type=jnp.float32).astype(ef_ref.dtype)

    # row out-degree accumulation (padded entries == N contribute 0)
    row_s = row_s_ref[...]                                        # (1, TE)
    ids_s = jax.lax.broadcasted_iota(jnp.int32, (n, te), 0)
    oh_rowT = (ids_s == row_s).astype(jnp.float32)                # (N, TE)
    rdeg_s[...] += jnp.sum(oh_rowT, axis=1, keepdims=True)

    @pl.when(i == pl.num_programs(0) - 1)
    def _():
        # xn[i] = sum_{e: row_e==i} (ef @ W3^T)[e] = rowdeg(i) * (y @ W3^T)[i]
        xn = rdeg_s[...] * t_s[...]                               # (N, H)
        xrec_ref[...] = jnp.dot(xn, w4T_ref[...],
                                preferred_element_type=jnp.float32
                                ).astype(xrec_ref.dtype)


# ---------------------------------------------------------------------------
# Wrapper
# ---------------------------------------------------------------------------
def _pad_indices(idx, num_valid, pad_value, te):
    """Pad 1-D int indices to a multiple of te with an out-of-range sentinel."""
    e_pad = ((num_valid + te - 1) // te) * te
    flat = jnp.full((e_pad,), pad_value, jnp.int32).at[:num_valid].set(
        idx.astype(jnp.int32))
    return flat, e_pad


@functools.partial(jax.jit, static_argnames=("te",))
def gnn_autoencoder_forward(x, edge_index, params, *, te=1024):
    """x: [N, Cin] f32; edge_index: [2, E] int32; params: PyTorch-layout weights.
       Returns (x_recon [N, Cin], edge_features [E, Cout])."""
    n, cin = x.shape
    x = x.astype(jnp.float32)
    w_mp = params["w_mp"].astype(jnp.float32)            # [H, Cin]
    b_mp = params["b_mp"].astype(jnp.float32)            # [H]
    w1 = params["w_node_to_edge"].astype(jnp.float32)    # [Ce, H]
    w2 = params["w_edge"].astype(jnp.float32)            # [Cout, Ce]
    w3 = params["w_edge_to_node"].astype(jnp.float32)    # [H, Cout]
    w4 = params["w_node_recon"].astype(jnp.float32)      # [Cin, H]
    h = w_mp.shape[0]
    ce = w1.shape[0]
    cout = w2.shape[0]

    row = edge_index[0].astype(jnp.int32)
    col = edge_index[1].astype(jnp.int32)
    e = row.shape[0]

    # add_self_loops (appended, like torch_geometric)
    loops = jnp.arange(n, dtype=jnp.int32)
    row_sl = jnp.concatenate([row, loops])
    col_sl = jnp.concatenate([col, loops])
    e_sl = e + n

    row_sl_flat, e_sl_pad = _pad_indices(row_sl, e_sl, n, te)
    col_sl_flat, _ = _pad_indices(col_sl, e_sl, n, te)
    row_flat, e_pad = _pad_indices(row, e, n, te)

    row_sl_g = row_sl_flat.reshape(e_sl_pad, 1)   # gather layout
    col_sl_s = col_sl_flat.reshape(1, e_sl_pad)   # scatter layout
    row_g = row_flat.reshape(e_pad, 1)
    row_s = row_flat.reshape(1, e_pad)

    w_mp_t = w_mp.T                    # (Cin, H)
    b_mp2 = b_mp.reshape(1, h)

    arb1 = pltpu.CompilerParams(dimension_semantics=("arbitrary",),
                                vmem_limit_bytes=32 * 1024 * 1024)
    arb2 = pltpu.CompilerParams(dimension_semantics=("arbitrary", "arbitrary"),
                                vmem_limit_bytes=32 * 1024 * 1024)

    # --- Kernel A: degree + GCN message passing -> x1 [N, H] -----------------
    n_tiles_sl = e_sl_pad // te
    x1 = pl.pallas_call(
        _gcn_kernel,
        out_shape=jax.ShapeDtypeStruct((n, h), jnp.float32),
        grid_spec=pltpu.PrefetchScalarGridSpec(
            num_scalar_prefetch=0,
            grid=(2, n_tiles_sl),
            in_specs=[
                pl.BlockSpec((te, 1), lambda p, i: (i, 0)),    # row (gather layout)
                pl.BlockSpec((1, te), lambda p, i: (0, i)),    # col (scatter layout)
                pl.BlockSpec((n, cin), lambda p, i: (0, 0)),   # x
                pl.BlockSpec((cin, h), lambda p, i: (0, 0)),   # Wmp^T
                pl.BlockSpec((1, h), lambda p, i: (0, 0)),     # bias
            ],
            out_specs=pl.BlockSpec((n, h), lambda p, i: (0, 0)),
            scratch_shapes=[pltpu.VMEM((n, h), jnp.float32),   # xw_s
                            pltpu.VMEM((n, 1), jnp.float32)],  # deg / dis
        ),
        compiler_params=arb2,
    )(row_sl_g, col_sl_s, x, w_mp_t, b_mp2)

    # --- Kernel B: fused edge-gather + edge->node + recon ---------------------
    n_tiles = e_pad // te
    ef_pad, x_recon = pl.pallas_call(
        _edge_kernel,
        out_shape=(jax.ShapeDtypeStruct((e_pad, cout), jnp.float32),
                   jax.ShapeDtypeStruct((n, cin), jnp.float32)),
        grid_spec=pltpu.PrefetchScalarGridSpec(
            num_scalar_prefetch=0,
            grid=(n_tiles,),
            in_specs=[
                pl.BlockSpec((te, 1), lambda i: (i, 0)),       # row (gather layout)
                pl.BlockSpec((1, te), lambda i: (0, i)),       # row (scatter layout)
                pl.BlockSpec((n, h), lambda i: (0, 0)),        # x1
                pl.BlockSpec((h, ce), lambda i: (0, 0)),       # W1^T
                pl.BlockSpec((ce, cout), lambda i: (0, 0)),    # W2^T
                pl.BlockSpec((cout, h), lambda i: (0, 0)),     # W3^T
                pl.BlockSpec((h, cin), lambda i: (0, 0)),      # W4^T
            ],
            out_specs=[pl.BlockSpec((te, cout), lambda i: (i, 0)),
                       pl.BlockSpec((n, cin), lambda i: (0, 0))],
            scratch_shapes=[pltpu.VMEM((n, cout), jnp.float32),   # y
                            pltpu.VMEM((n, h), jnp.float32),      # t = y @ W3^T
                            pltpu.VMEM((n, 1), jnp.float32)],     # rowdeg
        ),
        compiler_params=arb1,
    )(row_g, row_s, x1, w1.T, w2.T, w3.T, w4.T)

    return x_recon, ef_pad[:e]


if __name__ == "__main__":
    key = jax.random.PRNGKey(0)
    k_x, k_e, k0, k1, k2, k3, k4 = jax.random.split(key, 7)

    num_nodes = 16
    in_channels = 8
    hidden_channels = 32
    edge_in_channels = 32
    out_channels = 16
    num_edges = 2000          # TE=1024 -> 2 edge tiles per grid

    x = jax.random.normal(k_x, (num_nodes, in_channels), dtype=jnp.float32)
    edge_index = jax.random.randint(k_e, (2, num_edges), 0, num_nodes,
                                    dtype=jnp.int32)

    def linear_init(k, out_f, in_f):
        bound = 1.0 / jnp.sqrt(jnp.float32(in_f))
        return jax.random.uniform(k, (out_f, in_f), jnp.float32, -bound, bound)

    params = {
        "w_mp": linear_init(k0, hidden_channels, in_channels),
        "b_mp": jnp.zeros((hidden_channels,), jnp.float32),  # bias.data.zero_()
        "w_node_to_edge": linear_init(k1, edge_in_channels, hidden_channels),
        "w_edge": linear_init(k2, out_channels, edge_in_channels),
        "w_edge_to_node": linear_init(k3, hidden_channels, out_channels),
        "w_node_recon": linear_init(k4, in_channels, hidden_channels),
    }

    x_recon, edge_features = gnn_autoencoder_forward(x, edge_index, params, te=1024)
    x_recon, edge_features = jax.block_until_ready((x_recon, edge_features))

    # ---- pure-JAX reference of the PyTorch forward ----
    mm = functools.partial(jnp.matmul, precision="highest")
    row, col = edge_index[0], edge_index[1]
    loops = jnp.arange(num_nodes, dtype=jnp.int32)
    row_sl = jnp.concatenate([row, loops])
    col_sl = jnp.concatenate([col, loops])
    xw = mm(x, params["w_mp"].T)
    deg = jnp.zeros((num_nodes,), jnp.float32).at[col_sl].add(1.0)
    dis = jnp.where(deg > 0, 1.0 / jnp.sqrt(deg), 0.0)
    norm = dis[row_sl] * dis[col_sl]
    x1_ref = jnp.zeros((num_nodes, hidden_channels), jnp.float32).at[col_sl].add(
        norm[:, None] * xw[row_sl]) + params["b_mp"]
    ef_ref = mm(mm(x1_ref[row], params["w_node_to_edge"].T), params["w_edge"].T)
    z_ref = mm(ef_ref, params["w_edge_to_node"].T)
    xn_ref = jnp.zeros((num_nodes, hidden_channels), jnp.float32).at[row].add(z_ref)
    x_recon_ref = mm(xn_ref, params["w_node_recon"].T)

    assert edge_features.shape == (num_edges, out_channels)
    assert x_recon.shape == (num_nodes, in_channels)
    assert jnp.allclose(edge_features, ef_ref, atol=1e-4, rtol=1e-4), \
        float(jnp.max(jnp.abs(edge_features - ef_ref)))
    assert jnp.allclose(x_recon, x_recon_ref, atol=1e-4, rtol=1e-4), \
        float(jnp.max(jnp.abs(x_recon - x_recon_ref)))

    print("KERNEL_OK")
</pallas_src>

<mosaic_0001>
module attributes {stable_mosaic.version = 11 : i64} {
  func.func @_gcn_kernel(%arg0: i32, %arg1: i32, %arg2: memref<1024x1xi32, #tpu.memory_space<vmem>>, %arg3: memref<1x1024xi32, #tpu.memory_space<vmem>>, %arg4: memref<16x8xf32, #tpu.memory_space<vmem>>, %arg5: memref<8x32xf32, #tpu.memory_space<vmem>>, %arg6: memref<1x32xf32, #tpu.memory_space<vmem>>, %arg7: memref<16x32xf32, #tpu.memory_space<vmem>>, %arg8: memref<16x32xf32, #tpu.memory_space<vmem>>, %arg9: memref<16x1xf32, #tpu.memory_space<vmem>>) attributes {dimension_semantics = [#tpu.dimension_semantics<arbitrary>, #tpu.dimension_semantics<arbitrary>], iteration_bounds = array<i64: 2, 2>, scalar_prefetch = 0 : i64, scratch_operands = 2 : i64, tpu.core_type = #tpu.core_type<tc>, window_params = [{transform_indices = @transform_0, window_bounds = array<i64: 1024, 1>}, {transform_indices = @transform_1, window_bounds = array<i64: 1, 1024>}, {pipeline_mode = #tpu.pipeline_mode<synchronous>, transform_indices = @transform_2, window_bounds = array<i64: 16, 8>}, {pipeline_mode = #tpu.pipeline_mode<synchronous>, transform_indices = @transform_3, window_bounds = array<i64: 8, 32>}, {pipeline_mode = #tpu.pipeline_mode<synchronous>, transform_indices = @transform_4, window_bounds = array<i64: 1, 32>}, {pipeline_mode = #tpu.pipeline_mode<synchronous>, transform_indices = @transform_5, window_bounds = array<i64: 16, 32>}]} {
    %c0 = arith.constant 0 : index
    %c0_0 = arith.constant 0 : index
    %0 = vector.load %arg3[%c0, %c0_0] : memref<1x1024xi32, #tpu.memory_space<vmem>>, vector<1x1024xi32>
    %1 = tpu.iota {dimensions = array<i32: 0>} : vector<16x1024xi32>
    %2 = vector.broadcast %0 : vector<1x1024xi32> to vector<16x1024xi32>
    %3 = arith.cmpi eq, %1, %2 : vector<16x1024xi32>
    %4 = arith.extui %3 : vector<16x1024xi1> to vector<16x1024xi32>
    %5 = arith.sitofp %4 : vector<16x1024xi32> to vector<16x1024xf32>
    %c0_i32 = arith.constant 0 : i32
    %6 = arith.cmpi eq, %arg0, %c0_i32 : i32
    %c0_i32_1 = arith.constant 0 : i32
    %7 = arith.cmpi eq, %arg1, %c0_i32_1 : i32
    %8 = arith.andi %6, %7 : i1
    %9 = arith.extui %8 : i1 to i32
    %c0_i32_2 = arith.constant 0 : i32
    %10 = arith.cmpi ne, %9, %c0_i32_2 : i32
    scf.if %10 {
      %cst = arith.constant 0.000000e+00 : f32
      %27 = vector.broadcast %cst : f32 to vector<16x1xf32>
      %c0_12 = arith.constant 0 : index
      %c0_13 = arith.constant 0 : index
      %28 = vector.load %arg9[%c0_12, %c0_13] : memref<16x1xf32, #tpu.memory_space<vmem>>, vector<16x1xf32>
      tpu.vector_store %arg9[%c0_12, %c0_13], %27 {strides = array<i32>} : memref<16x1xf32, #tpu.memory_space<vmem>>, vector<16x1xf32>,
    } else {
    }
    %c0_i32_3 = arith.constant 0 : i32
    %11 = arith.cmpi eq, %arg0, %c0_i32_3 : i32
    %12 = arith.extui %11 : i1 to i32
    %c0_i32_4 = arith.constant 0 : i32
    %13 = arith.cmpi ne, %12, %c0_i32_4 : i32
    scf.if %13 {
      %c0_12 = arith.constant 0 : index
      %c0_13 = arith.constant 0 : index
      %27 = vector.load %arg9[%c0_12, %c0_13] : memref<16x1xf32, #tpu.memory_space<vmem>>, vector<16x1xf32>
      %cst = arith.constant dense<0.000000e+00> : vector<16xf32>
      %28 = vector.multi_reduction <add>, %5, %cst [1] : vector<16x1024xf32> to vector<16xf32>
      %29 = vector.shape_cast %28 : vector<16xf32> to vector<16x1xf32>
      %30 = arith.addf %27, %29 : vector<16x1xf32>
      %c0_14 = arith.constant 0 : index
      %c0_15 = arith.constant 0 : index
      %31 = vector.load %arg9[%c0_14, %c0_15] : memref<16x1xf32, #tpu.memory_space<vmem>>, vector<16x1xf32>
      tpu.vector_store %arg9[%c0_14, %c0_15], %30 {strides = array<i32>} : memref<16x1xf32, #tpu.memory_space<vmem>>, vector<16x1xf32>,
    } else {
    }
    %c1_i32 = arith.constant 1 : i32
    %14 = arith.cmpi eq, %arg0, %c1_i32 : i32
    %c0_i32_5 = arith.constant 0 : i32
    %15 = arith.cmpi eq, %arg1, %c0_i32_5 : i32
    %16 = arith.andi %14, %15 : i1
    %17 = arith.extui %16 : i1 to i32
    %c0_i32_6 = arith.constant 0 : i32
    %18 = arith.cmpi ne, %17, %c0_i32_6 : i32
    scf.if %18 {
      %c0_12 = arith.constant 0 : index
      %c0_13 = arith.constant 0 : index
      %27 = vector.load %arg9[%c0_12, %c0_13] : memref<16x1xf32, #tpu.memory_space<vmem>>, vector<16x1xf32>
      %cst = arith.constant 0.000000e+00 : f32
      %28 = vector.broadcast %cst : f32 to vector<16x1xf32>
      %29 = arith.cmpf ogt, %27, %28 : vector<16x1xf32>
      %30 = math.rsqrt %27 : vector<16x1xf32>
      %cst_14 = arith.constant 0.000000e+00 : f32
      %31 = vector.broadcast %cst_14 : f32 to vector<16x1xf32>
      %32 = arith.select %29, %30, %31 : vector<16x1xi1>, vector<16x1xf32>
      %c0_15 = arith.constant 0 : index
      %c0_16 = arith.constant 0 : index
      %33 = vector.load %arg9[%c0_15, %c0_16] : memref<16x1xf32, #tpu.memory_space<vmem>>, vector<16x1xf32>
      tpu.vector_store %arg9[%c0_15, %c0_16], %32 {strides = array<i32>} : memref<16x1xf32, #tpu.memory_space<vmem>>, vector<16x1xf32>,
      %c0_17 = arith.constant 0 : index
      %c0_18 = arith.constant 0 : index
      %34 = vector.load %arg9[%c0_17, %c0_18] : memref<16x1xf32, #tpu.memory_space<vmem>>, vector<16x1xf32>
      %c0_19 = arith.constant 0 : index
      %c0_20 = arith.constant 0 : index
      %35 = vector.load %arg4[%c0_19, %c0_20] : memref<16x8xf32, #tpu.memory_space<vmem>>, vector<16x8xf32>
      %c0_21 = arith.constant 0 : index
      %c0_22 = arith.constant 0 : index
      %36 = vector.load %arg5[%c0_21, %c0_22] : memref<8x32xf32, #tpu.memory_space<vmem>>, vector<8x32xf32>
      %cst_23 = arith.constant dense<0.000000e+00> : vector<16x32xf32>
      %37 = tpu.matmul %35, %36, %cst_23 {dimension_numbers = #tpu.dot_dimension_numbers<[1], [0], [0], [1], [0, 0, 1, 1], [], []>} : vector<16x8xf32>, vector<8x32xf32>, vector<16x32xf32> -> vector<16x32xf32>
      %38 = vector.broadcast %34 : vector<16x1xf32> to vector<16x32xf32>
      %39 = arith.mulf %38, %37 : vector<16x32xf32>
      %c0_24 = arith.constant 0 : index
      %c0_25 = arith.constant 0 : index
      %40 = vector.load %arg8[%c0_24, %c0_25] : memref<16x32xf32, #tpu.memory_space<vmem>>, vector<16x32xf32>
      tpu.vector_store %arg8[%c0_24, %c0_25], %39 {strides = array<i32>} : memref<16x32xf32, #tpu.memory_space<vmem>>, vector<16x32xf32>,
      %cst_26 = arith.constant 0.000000e+00 : f32
      %41 = vector.broadcast %cst_26 : f32 to vector<16x32xf32>
      %c0_27 = arith.constant 0 : index
      %c0_28 = arith.constant 0 : index
      %42 = vector.load %arg7[%c0_27, %c0_28] : memref<16x32xf32, #tpu.memory_space<vmem>>, vector<16x32xf32>
      tpu.vector_store %arg7[%c0_27, %c0_28], %41 {strides = array<i32>} : memref<16x32xf32, #tpu.memory_space<vmem>>, vector<16x32xf32>,
    } else {
    }
    %c1_i32_7 = arith.constant 1 : i32
    %19 = arith.cmpi eq, %arg0, %c1_i32_7 : i32
    %20 = arith.extui %19 : i1 to i32
    %c0_i32_8 = arith.constant 0 : i32
    %21 = arith.cmpi ne, %20, %c0_i32_8 : i32
    scf.if %21 {
      %c0_12 = arith.constant 0 : index
      %c0_13 = arith.constant 0 : index
      %27 = vector.load %arg2[%c0_12, %c0_13] : memref<1024x1xi32, #tpu.memory_space<vmem>>, vector<1024x1xi32>
      %28 = tpu.iota {dimensions = array<i32: 1>} : vector<1024x16xi32>
      %29 = vector.broadcast %27 : vector<1024x1xi32> to vector<1024x16xi32>
      %30 = arith.cmpi eq, %28, %29 : vector<1024x16xi32>
      %31 = arith.extui %30 : vector<1024x16xi1> to vector<1024x16xi32>
      %32 = arith.sitofp %31 : vector<1024x16xi32> to vector<1024x16xf32>
      %c0_14 = arith.constant 0 : index
      %c0_15 = arith.constant 0 : index
      %33 = vector.load %arg8[%c0_14, %c0_15] : memref<16x32xf32, #tpu.memory_space<vmem>>, vector<16x32xf32>
      %cst = arith.constant dense<0.000000e+00> : vector<1024x32xf32>
      %34 = tpu.matmul %32, %33, %cst {dimension_numbers = #tpu.dot_dimension_numbers<[1], [0], [0], [1], [0, 0, 1, 1], [], []>} : vector<1024x16xf32>, vector<16x32xf32>, vector<1024x32xf32> -> vector<1024x32xf32>
      %c0_16 = arith.constant 0 : index
      %c0_17 = arith.constant 0 : index
      %35 = vector.load %arg7[%c0_16, %c0_17] : memref<16x32xf32, #tpu.memory_space<vmem>>, vector<16x32xf32>
      %cst_18 = arith.constant dense<0.000000e+00> : vector<16x32xf32>
      %36 = tpu.matmul %5, %34, %cst_18 {dimension_numbers = #tpu.dot_dimension_numbers<[1], [0], [0], [1], [0, 0, 1, 1], [], []>} : vector<16x1024xf32>, vector<1024x32xf32>, vector<16x32xf32> -> vector<16x32xf32>
      %37 = arith.addf %35, %36 : vector<16x32xf32>
      %c0_19 = arith.constant 0 : index
      %c0_20 = arith.constant 0 : index
      %38 = vector.load %arg7[%c0_19, %c0_20] : memref<16x32xf32, #tpu.memory_space<vmem>>, vector<16x32xf32>
      tpu.vector_store %arg7[%c0_19, %c0_20], %37 {strides = array<i32>} : memref<16x32xf32, #tpu.memory_space<vmem>>, vector<16x32xf32>,
    } else {
    }
    %c1_i32_9 = arith.constant 1 : i32
    %22 = arith.cmpi eq, %arg0, %c1_i32_9 : i32
    %c1_i32_10 = arith.constant 1 : i32
    %23 = arith.cmpi eq, %arg1, %c1_i32_10 : i32
    %24 = arith.andi %22, %23 : i1
    %25 = arith.extui %24 : i1 to i32
    %c0_i32_11 = arith.constant 0 : i32
    %26 = arith.cmpi ne, %25, %c0_i32_11 : i32
    scf.if %26 {
      %c0_12 = arith.constant 0 : index
      %c0_13 = arith.constant 0 : index
      %27 = vector.load %arg9[%c0_12, %c0_13] : memref<16x1xf32, #tpu.memory_space<vmem>>, vector<16x1xf32>
      %c0_14 = arith.constant 0 : index
      %c0_15 = arith.constant 0 : index
      %28 = vector.load %arg7[%c0_14, %c0_15] : memref<16x32xf32, #tpu.memory_space<vmem>>, vector<16x32xf32>
      %29 = vector.broadcast %27 : vector<16x1xf32> to vector<16x32xf32>
      %30 = arith.mulf %29, %28 : vector<16x32xf32>
      %c0_16 = arith.constant 0 : index
      %c0_17 = arith.constant 0 : index
      %31 = vector.load %arg6[%c0_16, %c0_17] : memref<1x32xf32, #tpu.memory_space<vmem>>, vector<1x32xf32>
      %32 = vector.broadcast %31 : vector<1x32xf32> to vector<16x32xf32>
      %33 = arith.addf %30, %32 : vector<16x32xf32>
      %c0_18 = arith.constant 0 : index
      %c0_19 = arith.constant 0 : index
      %34 = vector.load %arg7[%c0_18, %c0_19] : memref<16x32xf32, #tpu.memory_space<vmem>>, vector<16x32xf32>
      tpu.vector_store %arg7[%c0_18, %c0_19], %33 {strides = array<i32>} : memref<16x32xf32, #tpu.memory_space<vmem>>, vector<16x32xf32>,
    } else {
    }
    return
  }
  func.func @transform_0(%arg0: i32, %arg1: i32) -> (i32, i32) {
    %c0_i32 = arith.constant 0 : i32
    %c0_i32_0 = arith.constant 0 : i32
    return %arg1, %c0_i32 : i32, i32
  }
  func.func @transform_1(%arg0: i32, %arg1: i32) -> (i32, i32) {
    %c0_i32 = arith.constant 0 : i32
    %c0_i32_0 = arith.constant 0 : i32
    return %c0_i32, %arg1 : i32, i32
  }
  func.func @transform_2(%arg0: i32, %arg1: i32) -> (i32, i32) {
    %c0_i32 = arith.constant 0 : i32
    %c0_i32_0 = arith.constant 0 : i32
    %c0_i32_1 = arith.constant 0 : i32
    return %c0_i32, %c0_i32_0 : i32, i32
  }
  func.func @transform_3(%arg0: i32, %arg1: i32) -> (i32, i32) {
    %c0_i32 = arith.constant 0 : i32
    %c0_i32_0 = arith.constant 0 : i32
    %c0_i32_1 = arith.constant 0 : i32
    return %c0_i32, %c0_i32_0 : i32, i32
  }
  func.func @transform_4(%arg0: i32, %arg1: i32) -> (i32, i32) {
    %c0_i32 = arith.constant 0 : i32
    %c0_i32_0 = arith.constant 0 : i32
    %c0_i32_1 = arith.constant 0 : i32
    return %c0_i32, %c0_i32_0 : i32, i32
  }
  func.func @transform_5(%arg0: i32, %arg1: i32) -> (i32, i32) {
    %c0_i32 = arith.constant 0 : i32
    %c0_i32_0 = arith.constant 0 : i32
    %c0_i32_1 = arith.constant 0 : i32
    return %c0_i32, %c0_i32_0 : i32, i32
  }
}

module attributes {stable_mosaic.version = 11 : i64} {
  func.func @_edge_kernel(%arg0: i32, %arg1: memref<1024x1xi32, #tpu.memory_space<vmem>>, %arg2: memref<1x1024xi32, #tpu.memory_space<vmem>>, %arg3: memref<16x32xf32, #tpu.memory_space<vmem>>, %arg4: memref<32x32xf32, #tpu.memory_space<vmem>>, %arg5: memref<32x16xf32, #tpu.memory_space<vmem>>, %arg6: memref<16x32xf32, #tpu.memory_space<vmem>>, %arg7: memref<32x8xf32, #tpu.memory_space<vmem>>, %arg8: memref<1024x16xf32, #tpu.memory_space<vmem>>, %arg9: memref<16x8xf32, #tpu.memory_space<vmem>>, %arg10: memref<16x16xf32, #tpu.memory_space<vmem>>, %arg11: memref<16x32xf32, #tpu.memory_space<vmem>>, %arg12: memref<16x1xf32, #tpu.memory_space<vmem>>) attributes {dimension_semantics = [#tpu.dimension_semantics<arbitrary>], iteration_bounds = array<i64: 2>, scalar_prefetch = 0 : i64, scratch_operands = 3 : i64, tpu.core_type = #tpu.core_type<tc>, window_params = [{transform_indices = @transform_0, window_bounds = array<i64: 1024, 1>}, {transform_indices = @transform_1, window_bounds = array<i64: 1, 1024>}, {pipeline_mode = #tpu.pipeline_mode<synchronous>, transform_indices = @transform_2, window_bounds = array<i64: 16, 32>}, {pipeline_mode = #tpu.pipeline_mode<synchronous>, transform_indices = @transform_3, window_bounds = array<i64: 32, 32>}, {pipeline_mode = #tpu.pipeline_mode<synchronous>, transform_indices = @transform_4, window_bounds = array<i64: 32, 16>}, {pipeline_mode = #tpu.pipeline_mode<synchronous>, transform_indices = @transform_5, window_bounds = array<i64: 16, 32>}, {pipeline_mode = #tpu.pipeline_mode<synchronous>, transform_indices = @transform_6, window_bounds = array<i64: 32, 8>}, {transform_indices = @transform_7, window_bounds = array<i64: 1024, 16>}, {pipeline_mode = #tpu.pipeline_mode<synchronous>, transform_indices = @transform_8, window_bounds = array<i64: 16, 8>}]} {
    %c0_i32 = arith.constant 0 : i32
    %0 = arith.cmpi eq, %arg0, %c0_i32 : i32
    %1 = arith.extui %0 : i1 to i32
    %c0_i32_0 = arith.constant 0 : i32
    %2 = arith.cmpi ne, %1, %c0_i32_0 : i32
    scf.if %2 {
      %c0_14 = arith.constant 0 : index
      %c0_15 = arith.constant 0 : index
      %26 = vector.load %arg3[%c0_14, %c0_15] : memref<16x32xf32, #tpu.memory_space<vmem>>, vector<16x32xf32>
      %c0_16 = arith.constant 0 : index
      %c0_17 = arith.constant 0 : index
      %27 = vector.load %arg4[%c0_16, %c0_17] : memref<32x32xf32, #tpu.memory_space<vmem>>, vector<32x32xf32>
      %cst_18 = arith.constant dense<0.000000e+00> : vector<16x32xf32>
      %28 = tpu.matmul %26, %27, %cst_18 {dimension_numbers = #tpu.dot_dimension_numbers<[1], [0], [0], [1], [0, 0, 1, 1], [], []>} : vector<16x32xf32>, vector<32x32xf32>, vector<16x32xf32> -> vector<16x32xf32>
      %c0_19 = arith.constant 0 : index
      %c0_20 = arith.constant 0 : index
      %29 = vector.load %arg5[%c0_19, %c0_20] : memref<32x16xf32, #tpu.memory_space<vmem>>, vector<32x16xf32>
      %cst_21 = arith.constant dense<0.000000e+00> : vector<16x16xf32>
      %30 = tpu.matmul %28, %29, %cst_21 {dimension_numbers = #tpu.dot_dimension_numbers<[1], [0], [0], [1], [0, 0, 1, 1], [], []>} : vector<16x32xf32>, vector<32x16xf32>, vector<16x16xf32> -> vector<16x16xf32>
      %c0_22 = arith.constant 0 : index
      %c0_23 = arith.constant 0 : index
      %31 = vector.load %arg10[%c0_22, %c0_23] : memref<16x16xf32, #tpu.memory_space<vmem>>, vector<16x16xf32>
      tpu.vector_store %arg10[%c0_22, %c0_23], %30 {strides = array<i32>} : memref<16x16xf32, #tpu.memory_space<vmem>>, vector<16x16xf32>,
      %c0_24 = arith.constant 0 : index
      %c0_25 = arith.constant 0 : index
      %32 = vector.load %arg6[%c0_24, %c0_25] : memref<16x32xf32, #tpu.memory_space<vmem>>, vector<16x32xf32>
      %cst_26 = arith.constant dense<0.000000e+00> : vector<16x32xf32>
      %33 = tpu.matmul %30, %32, %cst_26 {dimension_numbers = #tpu.dot_dimension_numbers<[1], [0], [0], [1], [0, 0, 1, 1], [], []>} : vector<16x16xf32>, vector<16x32xf32>, vector<16x32xf32> -> vector<16x32xf32>
      %c0_27 = arith.constant 0 : index
      %c0_28 = arith.constant 0 : index
      %34 = vector.load %arg11[%c0_27, %c0_28] : memref<16x32xf32, #tpu.memory_space<vmem>>, vector<16x32xf32>
      tpu.vector_store %arg11[%c0_27, %c0_28], %33 {strides = array<i32>} : memref<16x32xf32, #tpu.memory_space<vmem>>, vector<16x32xf32>,
      %cst_29 = arith.constant 0.000000e+00 : f32
      %35 = vector.broadcast %cst_29 : f32 to vector<16x1xf32>
      %c0_30 = arith.constant 0 : index
      %c0_31 = arith.constant 0 : index
      %36 = vector.load %arg12[%c0_30, %c0_31] : memref<16x1xf32, #tpu.memory_space<vmem>>, vector<16x1xf32>
      tpu.vector_store %arg12[%c0_30, %c0_31], %35 {strides = array<i32>} : memref<16x1xf32, #tpu.memory_space<vmem>>, vector<16x1xf32>,
    } else {
    }
    %c0 = arith.constant 0 : index
    %c0_1 = arith.constant 0 : index
    %3 = vector.load %arg1[%c0, %c0_1] : memref<1024x1xi32, #tpu.memory_space<vmem>>, vector<1024x1xi32>
    %4 = tpu.iota {dimensions = array<i32: 1>} : vector<1024x16xi32>
    %5 = vector.broadcast %3 : vector<1024x1xi32> to vector<1024x16xi32>
    %6 = arith.cmpi eq, %4, %5 : vector<1024x16xi32>
    %7 = arith.extui %6 : vector<1024x16xi1> to vector<1024x16xi32>
    %8 = arith.sitofp %7 : vector<1024x16xi32> to vector<1024x16xf32>
    %c0_2 = arith.constant 0 : index
    %c0_3 = arith.constant 0 : index
    %9 = vector.load %arg10[%c0_2, %c0_3] : memref<16x16xf32, #tpu.memory_space<vmem>>, vector<16x16xf32>
    %cst = arith.constant dense<0.000000e+00> : vector<1024x16xf32>
    %10 = tpu.matmul %8, %9, %cst {dimension_numbers = #tpu.dot_dimension_numbers<[1], [0], [0], [1], [0, 0, 1, 1], [], []>} : vector<1024x16xf32>, vector<16x16xf32>, vector<1024x16xf32> -> vector<1024x16xf32>
    %c0_4 = arith.constant 0 : index
    %c0_5 = arith.constant 0 : index
    %11 = vector.load %arg8[%c0_4, %c0_5] : memref<1024x16xf32, #tpu.memory_space<vmem>>, vector<1024x16xf32>
    tpu.vector_store %arg8[%c0_4, %c0_5], %10 {strides = array<i32>} : memref<1024x16xf32, #tpu.memory_space<vmem>>, vector<1024x16xf32>,
    %c0_6 = arith.constant 0 : index
    %c0_7 = arith.constant 0 : index
    %12 = vector.load %arg2[%c0_6, %c0_7] : memref<1x1024xi32, #tpu.memory_space<vmem>>, vector<1x1024xi32>
    %13 = tpu.iota {dimensions = array<i32: 0>} : vector<16x1024xi32>
    %14 = vector.broadcast %12 : vector<1x1024xi32> to vector<16x1024xi32>
    %15 = arith.cmpi eq, %13, %14 : vector<16x1024xi32>
    %16 = arith.extui %15 : vector<16x1024xi1> to vector<16x1024xi32>
    %17 = arith.sitofp %16 : vector<16x1024xi32> to vector<16x1024xf32>
    %c0_8 = arith.constant 0 : index
    %c0_9 = arith.constant 0 : index
    %18 = vector.load %arg12[%c0_8, %c0_9] : memref<16x1xf32, #tpu.memory_space<vmem>>, vector<16x1xf32>
    %cst_10 = arith.constant dense<0.000000e+00> : vector<16xf32>
    %19 = vector.multi_reduction <add>, %17, %cst_10 [1] : vector<16x1024xf32> to vector<16xf32>
    %20 = vector.shape_cast %19 : vector<16xf32> to vector<16x1xf32>
    %21 = arith.addf %18, %20 : vector<16x1xf32>
    %c0_11 = arith.constant 0 : index
    %c0_12 = arith.constant 0 : index
    %22 = vector.load %arg12[%c0_11, %c0_12] : memref<16x1xf32, #tpu.memory_space<vmem>>, vector<16x1xf32>
    tpu.vector_store %arg12[%c0_11, %c0_12], %21 {strides = array<i32>} : memref<16x1xf32, #tpu.memory_space<vmem>>, vector<16x1xf32>,
    %c1_i32 = arith.constant 1 : i32
    %23 = arith.cmpi eq, %arg0, %c1_i32 : i32
    %24 = arith.extui %23 : i1 to i32
    %c0_i32_13 = arith.constant 0 : i32
    %25 = arith.cmpi ne, %24, %c0_i32_13 : i32
    scf.if %25 {
      %c0_14 = arith.constant 0 : index
      %c0_15 = arith.constant 0 : index
      %26 = vector.load %arg12[%c0_14, %c0_15] : memref<16x1xf32, #tpu.memory_space<vmem>>, vector<16x1xf32>
      %c0_16 = arith.constant 0 : index
      %c0_17 = arith.constant 0 : index
      %27 = vector.load %arg11[%c0_16, %c0_17] : memref<16x32xf32, #tpu.memory_space<vmem>>, vector<16x32xf32>
      %28 = vector.broadcast %26 : vector<16x1xf32> to vector<16x32xf32>
      %29 = arith.mulf %28, %27 : vector<16x32xf32>
      %c0_18 = arith.constant 0 : index
      %c0_19 = arith.constant 0 : index
      %30 = vector.load %arg7[%c0_18, %c0_19] : memref<32x8xf32, #tpu.memory_space<vmem>>, vector<32x8xf32>
      %cst_20 = arith.constant dense<0.000000e+00> : vector<16x8xf32>
      %31 = tpu.matmul %29, %30, %cst_20 {dimension_numbers = #tpu.dot_dimension_numbers<[1], [0], [0], [1], [0, 0, 1, 1], [], []>} : vector<16x32xf32>, vector<32x8xf32>, vector<16x8xf32> -> vector<16x8xf32>
      %c0_21 = arith.constant 0 : index
      %c0_22 = arith.constant 0 : index
      %32 = vector.load %arg9[%c0_21, %c0_22] : memref<16x8xf32, #tpu.memory_space<vmem>>, vector<16x8xf32>
      tpu.vector_store %arg9[%c0_21, %c0_22], %31 {strides = array<i32>} : memref<16x8xf32, #tpu.memory_space<vmem>>, vector<16x8xf32>,
    } else {
    }
    return
  }
  func.func @transform_0(%arg0: i32) -> (i32, i32) {
    %c0_i32 = arith.constant 0 : i32
    %c0_i32_0 = arith.constant 0 : i32
    return %arg0, %c0_i32 : i32, i32
  }
  func.func @transform_1(%arg0: i32) -> (i32, i32) {
    %c0_i32 = arith.constant 0 : i32
    %c0_i32_0 = arith.constant 0 : i32
    return %c0_i32, %arg0 : i32, i32
  }
  func.func @transform_2(%arg0: i32) -> (i32, i32) {
    %c0_i32 = arith.constant 0 : i32
    %c0_i32_0 = arith.constant 0 : i32
    %c0_i32_1 = arith.constant 0 : i32
    return %c0_i32, %c0_i32_0 : i32, i32
  }
  func.func @transform_3(%arg0: i32) -> (i32, i32) {
    %c0_i32 = arith.constant 0 : i32
    %c0_i32_0 = arith.constant 0 : i32
    %c0_i32_1 = arith.constant 0 : i32
    return %c0_i32, %c0_i32_0 : i32, i32
  }
  func.func @transform_4(%arg0: i32) -> (i32, i32) {
    %c0_i32 = arith.constant 0 : i32
    %c0_i32_0 = arith.constant 0 : i32
    %c0_i32_1 = arith.constant 0 : i32
    return %c0_i32, %c0_i32_0 : i32, i32
  }
  func.func @transform_5(%arg0: i32) -> (i32, i32) {
    %c0_i32 = arith.constant 0 : i32
    %c0_i32_0 = arith.constant 0 : i32
    %c0_i32_1 = arith.constant 0 : i32
    return %c0_i32, %c0_i32_0 : i32, i32
  }
  func.func @transform_6(%arg0: i32) -> (i32, i32) {
    %c0_i32 = arith.constant 0 : i32
    %c0_i32_0 = arith.constant 0 : i32
    %c0_i32_1 = arith.constant 0 : i32
    return %c0_i32, %c0_i32_0 : i32, i32
  }
  func.func @transform_7(%arg0: i32) -> (i32, i32) {
    %c0_i32 = arith.constant 0 : i32
    %c0_i32_0 = arith.constant 0 : i32
    return %arg0, %c0_i32 : i32, i32
  }
  func.func @transform_8(%arg0: i32) -> (i32, i32) {
    %c0_i32 = arith.constant 0 : i32
    %c0_i32_0 = arith.constant 0 : i32
    %c0_i32_1 = arith.constant 0 : i32
    return %c0_i32, %c0_i32_0 : i32, i32
  }
}

</mosaic_0001>

<bundles_post_ra>
// kernel: gnn_autoencoder_forward.2
= control target key start
LH: loop header
LB: loop body
LE: loop exit
PB: predicated region body
PF: predicated region fallthrough
CT: control target
= control target key end

     0   :  { %s3921_s18 = smov 0   ;;  %s3923_s19 = smov 0   ;;  %s4803_s0 = inlined_call_operand.vmem [shape: s32[2048,1], index: 0, kind: input, shape index: {}]   ;;  %s4804_s1 = inlined_call_operand.vmem [shape: s32[1,2048], index: 1, kind: input, shape index: {}]   ;;  %s4805_s2 = inlined_call_operand.vmem [shape: f32[16,8], index: 2, kind: input, shape index: {}]   ;;  %s4806_s3 = inlined_call_operand.vmem [shape: f32[8,32], index: 3, kind: input, shape index: {}]   ;;  %s4807_s4 = inlined_call_operand.vmem [shape: f32[1,32], index: 4, kind: input, shape index: {}]   ;;  %s4808_s5 = inlined_call_operand.vmem [shape: f32[16,32], index: 5, kind: output, shape index: {}]  }
   0x1   :  { %s3925_s20 = smov 0   ;;  %s3927_s21 = smov 0  }
   0x2   :  { %s3929_s22 = smov 0  }
   0x3 LB: > { %s24_s23 = sadd.s32 1, %s3873_s20  ;;  %s27_s24 = sadd.s32 1, %s3877_s21  ;;  %s3881_s22 = sphi %s3929_s22, %s15_s22   ;;  %s3877_s21 = sphi %s3927_s21, %s4825_s21   ;;  %s3873_s20 = sphi %s3925_s20, %s4824_s20   ;;  %s3869_s19 = sphi %s3923_s19, %s4823_s19   ;;  %s3865_s18 = sphi %s3921_s18, %s4822_s18  }
   0x4   : > { %p25_p0 = scmp.ge.s32.totalorder %s24_s23, 2  ;;  %p2868_p1 = scmp.ge.s32.totalorder %s3881_s22, 1 }
   0x5   : > { %p205_p2 = scmp.lt.s32.totalorder %s3881_s22, 5 }
   0x6   : > { %s4827_s23 = smov (%p25_p0, %s24_s23), 0  ;;  %s4829_s24 = smov (!%p25_p0, %s27_s24), %s3877_s21 }
   0x7   : > { %p206_p3 = pnand %p2868_p1, %p205_p2  ;;  %p29_p4 = scmp.ge.s32.totalorder %s4829_s24, 2 }
   0x8   : > { %s2869_s25 = sshll.u32 (!%p206_p3), %s3865_s18, 7  ;;  %s2871_s26 = sshll.u32 (!%p206_p3), %s3865_s18, 3  ;;  %v244_v0 = vlaneseq (!%p206_p3)  ;;  %v3883_v20 = vmov (!%p206_p3), 0.0  }
   0x9   : > { %s4831_s24 = smov (%p29_p4, %s4829_s24), 0  ;;  %209 = sbr.rel (%p206_p3) target bundleno = 1388 (0x56c), region = 40 }
   0xa   : > { %p233_p5 = scmp.lt.s32.totalorder (!%p206_p3), %s2869_s25, 255  ;;  %p239_p6 = scmp.lt.s32.totalorder (!%p206_p3), %s2871_s26, 15  ;;  %v3958_v1 = vshrl.u32 (!%p206_p3), %v244_v0, 7 }
   0xb   : > { %p327_p7 = scmp.eq.s32.totalorder (!%p206_p3), %s3869_s19, 0  ;;  %p328_p8 = scmp.eq.s32.totalorder (!%p206_p3), %s3865_s18, 0 }
   0xc   : > { %v249_v2 = vsub.s32 (!%p206_p3), 0, %v3958_v1  ;;  %v253_v3 = vsub.s32 (!%p206_p3), 1, %v3958_v1  ;;  %v257_v4 = vsub.s32 (!%p206_p3), 2, %v3958_v1  ;;  %v261_v5 = vsub.s32 (!%p206_p3), 3, %v3958_v1 }
   0xd   : > { %v265_v6 = vsub.s32 (!%p206_p3), 4, %v3958_v1  ;;  %v269_v7 = vsub.s32 (!%p206_p3), 5, %v3958_v1  ;;  %v273_v8 = vsub.s32 (!%p206_p3), 6, %v3958_v1  ;;  %p3971_p9 = pnand (!%p206_p3), %p328_p8, %p327_p7  ;;  %v277_v9 = vsub.s32 (!%p206_p3), 7, %v3958_v1 }
   0xe   : > { %v3985_v11 = vadd.s32 (!%p206_p3), 8, %v3958_v1 }
  0x10   : > { %s4833_s25 = smov (!%p233_p5, %s2869_s25), 255  ;;  %s4835_s26 = smov (!%p239_p6, %s2871_s26), 15 }
  0x11   : > { %s2870_s27 = sshll.u32 %s4833_s25, 3  ;;  %s241_s9 = scalar_lea.vmem %s4804_s1, %s4835_s26  ;;  %v3884_v37 = vmov (!%p3971_p9), 0.0  }
  0x12   : > { %s3978_s6 = scalar_lea.vmem %s4803_s0, %s2870_s27  ;;  %v243_v10 = vld [vmem:[%s241_s9] sm:$0xff] }
  0x13   : > { %v3987_v12 = vrot.slane %v243_v10, %v249_v2  ;;  %v3989_v13 = vrot.slane %v243_v10, %v253_v3  ;;  %v3991_v14 = vrot.slane %v243_v10, %v257_v4  ;;  %v3993_v15 = vrot.slane %v243_v10, %v261_v5 }
  0x14   : > { %v3995_v16 = vrot.slane %v243_v10, %v265_v6  ;;  %v3997_v17 = vrot.slane %v243_v10, %v269_v7  ;;  %v3999_v18 = vrot.slane %v243_v10, %v273_v8  ;;  %v4001_v19 = vrot.slane %v243_v10, %v277_v9 }
  0x15   : > { %vm279_vm0 = vcmp.eq.s32.totalorder %v3958_v1, %v3987_v12  ;;  %vm280_vm1 = vcmp.eq.s32.totalorder %v3958_v1, %v3989_v13  ;;  %vm281_vm2 = vcmp.eq.s32.totalorder %v3958_v1, %v3991_v14  ;;  %vm282_vm3 = vcmp.eq.s32.totalorder %v3958_v1, %v3993_v15 }
  0x16   : > { %vm283_vm4 = vcmp.eq.s32.totalorder %v3958_v1, %v3995_v16  ;;  %vm284_vm5 = vcmp.eq.s32.totalorder %v3958_v1, %v3997_v17  ;;  %vm4809_vm6 = vcmp.eq.s32.totalorder %v3958_v1, %v3999_v18  ;;  %vm4812_vm7 = vcmp.eq.s32.totalorder %v3958_v1, %v4001_v19  ;;  %332 = sbr.rel (%p3971_p9) target bundleno = 31 (0x1f), region = 44 }
  0x17   : > { %vm287_vm8 = vcmp.eq.s32.totalorder %v3985_v11, %v3987_v12  ;;  %vm288_vm9 = vcmp.eq.s32.totalorder %v3985_v11, %v3989_v13  ;;  %vm289_vm10 = vcmp.eq.s32.totalorder %v3985_v11, %v3991_v14  ;;  %vm290_vm11 = vcmp.eq.s32.totalorder %v3985_v11, %v3993_v15 }
  0x18   : > { %vm4813_vm12 = vcmp.eq.s32.totalorder %v3985_v11, %v3995_v16  ;;  %vm4814_vm13 = vcmp.eq.s32.totalorder %v3985_v11, %v3997_v17  ;;  %vm4810_vm14 = vcmp.eq.s32.totalorder %v3985_v11, %v3999_v18  ;;  %vm4811_vm15 = vcmp.eq.s32.totalorder %v3985_v11, %v4001_v19 }
  0x19   : > { %v2872_v21 = vsel %vm279_vm0, 1.0, %v3883_v20  ;;  %v2873_v22 = vsel %vm280_vm1, 1.0, %v3883_v20  ;;  %v2874_v23 = vsel %vm281_vm2, 1.0, %v3883_v20  ;;  %v2875_v24 = vsel %vm282_vm3, 1.0, %v3883_v20 }
  0x1a   : > { %v2876_v25 = vsel %vm283_vm4, 1.0, %v3883_v20  ;;  %v2877_v26 = vsel %vm284_vm5, 1.0, %v3883_v20  ;;  %v2878_v27 = vsel %vm4809_vm6, 1.0, %v3883_v20  ;;  %v2879_v28 = vsel %vm4812_vm7, 1.0, %v3883_v20 }
  0x1b   : > { %v2880_v29 = vsel %vm287_vm8, 1.0, %v3883_v20  ;;  %v2881_v30 = vsel %vm288_vm9, 1.0, %v3883_v20  ;;  %v2882_v31 = vsel %vm289_vm10, 1.0, %v3883_v20  ;;  %v2883_v32 = vsel %vm290_vm11, 1.0, %v3883_v20 }
  0x1c   : > { %v2884_v33 = vsel %vm4813_vm12, 1.0, %v3883_v20  ;;  %v2885_v34 = vsel %vm4814_vm13, 1.0, %v3883_v20  ;;  %v2886_v35 = vsel %vm4810_vm14, 1.0, %v3883_v20  ;;  %v2887_v36 = vsel %vm4811_vm15, 1.0, %v3883_v20 }
  0x1d   : > { %vm333_vm6 = vcmask 7168  }
  0x1e   : > { %334 = vst.msk [vmem:[#allocation3] sm:$0xff] %vm333_vm6, %v3884_v37  ;;  %335 = vst.msk [vmem:[#allocation3 + $0x8] sm:$0xff] %vm333_vm6, %v3884_v37 }
  0x1f PF: > { %p2888_p10 = scmp.ne.s32.totalorder %s3869_s19, 0 }
  0x20   : > { %v341_v38 = vadd.f32 (!%p2888_p10), %v2873_v22, %v2872_v21  ;;  %v350_v39 = vadd.f32 (!%p2888_p10), %v2881_v30, %v2880_v29  ;;  %vm361_vm6 = vcmask (!%p2888_p10), 7168  }
  0x21   : > { %338 = sbr.rel (%p2888_p10) target bundleno = 195 (0xc3), region = 48 }
  0x22   : > { %v342_v40 = vadd.f32 (!%p2888_p10), %v2874_v23, %v341_v38  ;;  %v351_v41 = vadd.f32 (!%p2888_p10), %v2882_v31, %v350_v39 }
  0x24   : > { %v343_v42 = vadd.f32 (!%p2888_p10), %v2875_v24, %v342_v40  ;;  %v352_v43 = vadd.f32 (!%p2888_p10), %v2883_v32, %v351_v41 }
  0x25   : > { %v339_v52 = vld [vmem:[#allocation3] sm:$0xff] (!%p2888_p10)  ;;  %v340_v55 = vld [vmem:[#allocation3 + $0x8] sm:$0xff] (!%p2888_p10) }
  0x26   : > { %v344_v44 = vadd.f32 (!%p2888_p10), %v2876_v25, %v343_v42  ;;  %v353_v45 = vadd.f32 (!%p2888_p10), %v2884_v33, %v352_v43 }
  0x28   : > { %v345_v46 = vadd.f32 %v2877_v26, %v344_v44  ;;  %v354_v47 = vadd.f32 %v2885_v34, %v353_v45 }
  0x2a   : > { %v346_v48 = vadd.f32 %v2878_v27, %v345_v46  ;;  %v355_v49 = vadd.f32 %v2886_v35, %v354_v47 }
  0x2c   : > { %v347_v50 = vadd.f32 %v2879_v28, %v346_v48  ;;  %v356_v51 = vadd.f32 %v2887_v36, %v355_v49 }
  0x2e   : > { %348 = vadd.xlane.f32.xlu0 %v347_v50 }
  0x32   : > { %357 = vadd.xlane.f32.xlu0 %v356_v51 }
  0xbb   : > { %v349_v53 = vpop.xlane.xlu0 %348 }
  0xbc   : > { %v359_v54 = vadd.f32 %v349_v53, %v339_v52 }
  0xbe   : > { %362 = vst.msk [vmem:[#allocation3] sm:$0xff] %vm361_vm6, %v359_v54 }
  0xbf   : > { %v358_v56 = vpop.xlane.xlu0 %357 }
  0xc0   : > { %v360_v57 = vadd.f32 %v358_v56, %v340_v55 }
  0xc2   : > { %363 = vst.msk [vmem:[#allocation3 + $0x8] sm:$0xff] %vm361_vm6, %v360_v57 }
  0xc3 PF: > { %p364_p11 = scmp.eq.s32.totalorder %s3869_s19, 1 }
  0xc5   : > { %p365_p12 = pnand %p364_p11, %p328_p8 }
  0xc6   : > { %v384_v58 = vld [vmem:[%s4806_s3] sm:$0xff] (!%p365_p12)  ;;  %vm385_vm14 = vcmask (!%p365_p12), 64512   ;;  %v383_v60 = vld [vmem:[%s4805_s2 + $0x8] sm:$0xff] (!%p365_p12)  ;;  %v369_v61 = vld [vmem:[#allocation3] sm:$0xff] (!%p365_p12)  ;;  %v3885_v63 = vmov (!%p365_p12), 0   ;;  %vm377_vm15 = vcmask (!%p365_p12), 7168  }
  0xc7   : > { %368 = sbr.rel (%p365_p12) target bundleno = 417 (0x1a1), region = 52  ;;  %v382_v59 = vld [vmem:[%s4805_s2] sm:$0xff] (!%p365_p12)  ;;  %3452 = vmatprep.subr.mxu0 (!%p365_p12), %v384_v58  ;;  %3835 = vset.pattern.permute.xlu0 (!%p365_p12), %v3885_v63  ;;  %3836 = vrsqrt.f32 (!%p365_p12), %v369_v61  ;;  %vm371_vm6 = vcmp.gt.f32.partialorder (!%p365_p12), %v369_v61, 0.0  ;;  %vm479_vm12 = vcmask (!%p365_p12), 261120   ;;  %v3886_v8 = vmov (!%p365_p12), 0.0  }
  0xc8   : > { %3454 = vmatprep.mubr.msk.f32.mxu0 (!%p365_p12), %vm385_vm14, %v382_v59  ;;  %3453 = vmatpush3.msra.mxu0 (!%p365_p12), %v384_v58  ;;  %482 = vst.msk [vmem:[%s4808_s5] sm:$0xff] (!%p365_p12), %vm479_vm12, %v3886_v8  ;;  %483 = vst.msk [vmem:[%s4808_s5 + $0x8] sm:$0xff] (!%p365_p12), %vm479_vm12, %v3886_v8 }
  0xc9   : > { %v370_v62 = vld [vmem:[#allocation3 + $0x8] sm:$0xff] (!%p365_p12)  ;;  %3455 = vmatmul.mubr.msk.f32.vlgmr.msra.gmra.mrb[0].mxu0 (!%p365_p12), %vm385_vm14, %v383_v60 }
  0xca   : > { %3838 = vrsqrt.f32 (!%p365_p12), %v370_v62  ;;  %vm372_vm7 = vcmp.gt.f32.partialorder (!%p365_p12), %v370_v62, 0.0 }
  0xd1   : > { %v3837_v2 = vpop.eup %3836 }
  0xd2   : > { %v375_v4 = vsel %vm371_vm6, %v3837_v2, 0.0 }
  0xd3   : > { %378 = vst.msk [vmem:[#allocation3] sm:$0xff] %vm377_vm15, %v375_v4 }
  0xd4   : > { %v3839_v3 = vpop.eup %3838 }
  0xd5   : > { %v376_v5 = vsel %vm372_vm7, %v3839_v3, 0.0 }
  0xd6   : > { %379 = vst.msk [vmem:[#allocation3 + $0x8] sm:$0xff] %vm377_vm15, %v376_v5 }
  0xda   : > { %v380_v6 = vld [vmem:[#allocation3] sm:$0xff] }
  0xdb   : > { %469 = vperm.xlu0 %3835, %v380_v6  }
  0xdd   : > { %v381_v7 = vld [vmem:[#allocation3 + $0x8] sm:$0xff] }
  0xdf   : > { %474 = vperm.xlu0 %3835, %v381_v7  }
 0x15a   : > { %v470_v9 = vpop.permute.xlu0 %469 }
 0x15e   : > { %v475_v10 = vpop.permute.xlu0 %474 }
 0x19c   : > { %v3456_v20 = vpop.f32.mrb[0].mxu0 }
 0x19d   : > { %v478_v21 = vmul.f32 %v3456_v20, %v475_v10  ;;  %v458_v22 = vpop.f32.mrb[1].mxu0 }
 0x19e   : > { %v477_v23 = vmul.f32 %v470_v9, %v458_v22 }
 0x19f   : > { %481 = vst.msk [vmem:[#allocation2 + $0x8] sm:$0xff] %vm479_vm12, %v478_v21 }
 0x1a0   : > { %480 = vst.msk [vmem:[#allocation2] sm:$0xff] %vm479_vm12, %v477_v23 }
 0x1a1 PF: > { %p2891_p13 = scmp.ne.s32.totalorder %s3869_s19, 1 }
 0x1a2   : > { %v489_v24 = vld [vmem:[%s3978_s6 + $0x10] sm:$0xff] (!%p2891_p13)  ;;  %v487_v25 = vld [vmem:[%s3978_s6] sm:$0xff] (!%p2891_p13)  ;;  %v3887_v26 = vmov (!%p2891_p13), 0   ;;  %v490_v27 = vld [vmem:[%s3978_s6 + $0x18] sm:$0xff] (!%p2891_p13)  ;;  %vm1387_vm7 = vcmask (!%p2891_p13), 130048  }
 0x1a3   : > { %486 = sbr.rel (%p2891_p13) target bundleno = 1246 (0x4de), region = 56  ;;  %3841 = vset.pattern.permute.xlu1 (!%p2891_p13), %v3887_v26  ;;  %3840 = vset.pattern.permute.xlu0 (!%p2891_p13), %v3887_v26  ;;  %v488_v28 = vld [vmem:[%s3978_s6 + $0x8] sm:$0xff] (!%p2891_p13)  ;;  %v491_v30 = vld [vmem:[%s3978_s6 + $0x20] sm:$0xff] (!%p2891_p13)  ;;  %v494_v31 = vld [vmem:[%s3978_s6 + $0x38] sm:$0xff] (!%p2891_p13) }
 0x1a4   : > { %624 = vperm.xlu1 (!%p2891_p13), %3841, %v489_v24   ;;  %618 = vperm.xlu0 (!%p2891_p13), %3840, %v487_v25   ;;  %v492_v29 = vld [vmem:[%s3978_s6 + $0x28] sm:$0xff] (!%p2891_p13)  ;;  %v493_v32 = vld [vmem:[%s3978_s6 + $0x30] sm:$0xff] (!%p2891_p13)  ;;  %v495_v34 = vld [vmem:[%s3978_s6 + $0x40] sm:$0xff] (!%p2891_p13) }
 0x1a5   : > { %v496_v33 = vld [vmem:[%s3978_s6 + $0x48] sm:$0xff] (!%p2891_p13)  ;;  %v498_v35 = vld [vmem:[%s3978_s6 + $0x58] sm:$0xff] (!%p2891_p13)  ;;  %v497_v36 = vld [vmem:[%s3978_s6 + $0x50] sm:$0xff] (!%p2891_p13) }
 0x1a6   : > { %v1386_v38 = vld [vmem:[#allocation2 + $0x8] sm:$0xff] (!%p2891_p13)  ;;  %v499_v40 = vld [vmem:[%s3978_s6 + $0x60] sm:$0xff] (!%p2891_p13)  ;;  %v502_v42 = vld [vmem:[%s3978_s6 + $0x78] sm:$0xff] (!%p2891_p13) }
 0x1a7   : > { %v1385_v37 = vld [vmem:[#allocation2] sm:$0xff] (!%p2891_p13)  ;;  %v500_v39 = vld [vmem:[%s3978_s6 + $0x68] sm:$0xff] (!%p2891_p13)  ;;  %v501_v43 = vld [vmem:[%s3978_s6 + $0x70] sm:$0xff] (!%p2891_p13) }
 0x1a8   : > { %627 = vperm.xlu1 (!%p2891_p13), %3841, %v490_v27   ;;  %621 = vperm.xlu0 (!%p2891_p13), %3840, %v488_v28   ;;  %v3653_v41 = vpack.c.bf16 (!%p2891_p13), %v1386_v38, %v1385_v37  ;;  %v504_v44 = vld [vmem:[%s3978_s6 + $0x88] sm:$0xff] (!%p2891_p13)  ;;  %v503_v45 = vld [vmem:[%s3978_s6 + $0x80] sm:$0xff] (!%p2891_p13)  ;;  %v506_v46 = vld [vmem:[%s3978_s6 + $0x98] sm:$0xff] (!%p2891_p13) }
 0x1a9   : > { %v505_v47 = vld [vmem:[%s3978_s6 + $0x90] sm:$0xff] (!%p2891_p13)  ;;  %v508_v48 = vld [vmem:[%s3978_s6 + $0xa8] sm:$0xff] (!%p2891_p13)  ;;  %v507_v49 = vld [vmem:[%s3978_s6 + $0xa0] sm:$0xff] (!%p2891_p13) }
 0x1aa   : > { %3654 = vmatprep.subr.bf16.mxu0 %v3653_v41  ;;  %3785 = vmatprep.subr.bf16.mxu1 %v3653_v41  ;;  %v510_v50 = vld [vmem:[%s3978_s6 + $0xb8] sm:$0xff]  ;;  %v509_v51 = vld [vmem:[%s3978_s6 + $0xb0] sm:$0xff]  ;;  %v512_v52 = vld [vmem:[%s3978_s6 + $0xc8] sm:$0xff] }
 0x1ab   : > { %3656 = vmatpush3.bf16.msra.mxu0 %v3653_v41  ;;  %3786 = vmatpush3.bf16.msra.mxu1 %v3653_v41  ;;  %v511_v53 = vld [vmem:[%s3978_s6 + $0xc0] sm:$0xff]  ;;  %v514_v54 = vld [vmem:[%s3978_s6 + $0xd8] sm:$0xff]  ;;  %v513_v55 = vld [vmem:[%s3978_s6 + $0xd0] sm:$0xff] }
 0x1ac   : > { %633 = vperm.xlu1 %3841, %v492_v29   ;;  %630 = vperm.xlu0 %3840, %v491_v30   ;;  %v516_v56 = vld [vmem:[%s3978_s6 + $0xe8] sm:$0xff]  ;;  %v515_v57 = vld [vmem:[%s3978_s6 + $0xe0] sm:$0xff]  ;;  %v518_v58 = vld [vmem:[%s3978_s6 + $0xf8] sm:$0xff] }
 0x1ad   : > { %v517_v59 = vld [vmem:[%s3978_s6 + $0xf0] sm:$0xff]  ;;  %v520_v60 = vld [vmem:[%s3978_s6 + $0x108] sm:$0xff]  ;;  %v519_v61 = vld [vmem:[%s3978_s6 + $0x100] sm:$0xff] }
 0x1ae   : > { %v522_v62 = vld [vmem:[%s3978_s6 + $0x118] sm:$0xff]  ;;  %v521_v63 = vld [vmem:[%s3978_s6 + $0x110] sm:$0xff]  ;;  %v524_v2 = vld [vmem:[%s3978_s6 + $0x128] sm:$0xff] }
 0x1af   : > { %v523_v3 = vld [vmem:[%s3978_s6 + $0x120] sm:$0xff]  ;;  %v526_v4 = vld [vmem:[%s3978_s6 + $0x138] sm:$0xff]  ;;  %v525_v5 = vld [vmem:[%s3978_s6 + $0x130] sm:$0xff] }
 0x1b0   : > { %639 = vperm.xlu1 %3841, %v494_v31   ;;  %636 = vperm.xlu0 %3840, %v493_v32   ;;  %v528_v6 = vld [vmem:[%s3978_s6 + $0x148] sm:$0xff]  ;;  %v527_v7 = vld [vmem:[%s3978_s6 + $0x140] sm:$0xff]  ;;  %v530_v8 = vld [vmem:[%s3978_s6 + $0x158] sm:$0xff] }
 0x1b1   : > { %v529_v9 = vld [vmem:[%s3978_s6 + $0x150] sm:$0xff]  ;;  %v532_v10 = vld [vmem:[%s3978_s6 + $0x168] sm:$0xff]  ;;  %v531_v20 = vld [vmem:[%s3978_s6 + $0x160] sm:$0xff] }
 0x1b2   : > { %v534_v21 = vld [vmem:[%s3978_s6 + $0x178] sm:$0xff]  ;;  %v533_v22 = vld [vmem:[%s3978_s6 + $0x170] sm:$0xff]  ;;  %v536_v23 = vld [vmem:[%s3978_s6 + $0x188] sm:$0xff] }
 0x1b3   : > { %v535_v24 = vld [vmem:[%s3978_s6 + $0x180] sm:$0xff]  ;;  %v538_v25 = vld [vmem:[%s3978_s6 + $0x198] sm:$0xff]  ;;  %v537_v26 = vld [vmem:[%s3978_s6 + $0x190] sm:$0xff] }
 0x1b4   : > { %645 = vperm.xlu1 %3841, %v496_v33   ;;  %642 = vperm.xlu0 %3840, %v495_v34   ;;  %v540_v27 = vld [vmem:[%s3978_s6 + $0x1a8] sm:$0xff]  ;;  %v539_v28 = vld [vmem:[%s3978_s6 + $0x1a0] sm:$0xff]  ;;  %v542_v29 = vld [vmem:[%s3978_s6 + $0x1b8] sm:$0xff] }
 0x1b5   : > { %v541_v30 = vld [vmem:[%s3978_s6 + $0x1b0] sm:$0xff]  ;;  %v544_v31 = vld [vmem:[%s3978_s6 + $0x1c8] sm:$0xff]  ;;  %v543_v32 = vld [vmem:[%s3978_s6 + $0x1c0] sm:$0xff] }
 0x1b6   : > { %v546_v33 = vld [vmem:[%s3978_s6 + $0x1d8] sm:$0xff]  ;;  %v545_v34 = vld [vmem:[%s3978_s6 + $0x1d0] sm:$0xff]  ;;  %v551_v41 = vld [vmem:[%s3978_s6 + $0x200] sm:$0xff] }
 0x1b7   : > { %v550_v37 = vld [vmem:[%s3978_s6 + $0x1f8] sm:$0xff]  ;;  %v549_v38 = vld [vmem:[%s3978_s6 + $0x1f0] sm:$0xff] }
 0x1b8   : > { %651 = vperm.xlu1 %3841, %v498_v35   ;;  %648 = vperm.xlu0 %3840, %v497_v36   ;;  %v548_v35 = vld [vmem:[%s3978_s6 + $0x1e8] sm:$0xff]  ;;  %v547_v36 = vld [vmem:[%s3978_s6 + $0x1e0] sm:$0xff] }
 0x1bc   : > { %657 = vperm.xlu1 %3841, %v500_v39   ;;  %654 = vperm.xlu0 %3840, %v499_v40   ;;  %v4172_v39 = vand.u32 127, %v244_v0  ;;  %v552_v40 = vld [vmem:[%s3978_s6 + $0x208] sm:$0xff] }
 0x1c0   : > { %663 = vperm.xlu1 %3841, %v502_v42   ;;  %660 = vperm.xlu0 %3840, %v501_v43  }
 0x1c4   : > { %669 = vperm.xlu1 %3841, %v504_v44   ;;  %666 = vperm.xlu0 %3840, %v503_v45   ;;  %v3888_v44 = vmov 0.0  }
 0x1c8   : > { %675 = vperm.xlu1 %3841, %v506_v46   ;;  %672 = vperm.xlu0 %3840, %v505_v47   ;;  %v554_v46 = vld [vmem:[%s3978_s6 + $0x218] sm:$0xff]  ;;  %v553_v47 = vld [vmem:[%s3978_s6 + $0x210] sm:$0xff] }
 0x1cc   : > { %681 = vperm.xlu1 %3841, %v508_v48   ;;  %678 = vperm.xlu0 %3840, %v507_v49  }
 0x1d0   : > { %687 = vperm.xlu1 %3841, %v510_v50   ;;  %684 = vperm.xlu0 %3840, %v509_v51   ;;  %v556_v50 = vld [vmem:[%s3978_s6 + $0x228] sm:$0xff]  ;;  %v555_v51 = vld [vmem:[%s3978_s6 + $0x220] sm:$0xff] }
 0x1d4   : > { %693 = vperm.xlu1 %3841, %v512_v52   ;;  %690 = vperm.xlu0 %3840, %v511_v53  }
 0x1d8   : > { %699 = vperm.xlu1 %3841, %v514_v54   ;;  %696 = vperm.xlu0 %3840, %v513_v55  }
 0x1dc   : > { %705 = vperm.xlu1 %3841, %v516_v56   ;;  %702 = vperm.xlu0 %3840, %v515_v57   ;;  %v558_v57 = vld [vmem:[%s3978_s6 + $0x238] sm:$0xff] }
 0x1e0   : > { %711 = vperm.xlu1 %3841, %v518_v58   ;;  %708 = vperm.xlu0 %3840, %v517_v59   ;;  %v557_v58 = vld [vmem:[%s3978_s6 + $0x230] sm:$0xff] }
 0x1e4   : > { %717 = vperm.xlu1 %3841, %v520_v60   ;;  %714 = vperm.xlu0 %3840, %v519_v61  }
 0x1e8   : > { %723 = vperm.xlu1 %3841, %v522_v62   ;;  %720 = vperm.xlu0 %3840, %v521_v63   ;;  %v560_v63 = vld [vmem:[%s3978_s6 + $0x248] sm:$0xff] }
 0x1ec   : > { %729 = vperm.xlu1 %3841, %v524_v2   ;;  %726 = vperm.xlu0 %3840, %v523_v3   ;;  %v559_v2 = vld [vmem:[%s3978_s6 + $0x240] sm:$0xff] }
 0x1f0   : > { %735 = vperm.xlu1 %3841, %v526_v4   ;;  %732 = vperm.xlu0 %3840, %v525_v5  }
 0x1f4   : > { %741 = vperm.xlu1 %3841, %v528_v6   ;;  %738 = vperm.xlu0 %3840, %v527_v7   ;;  %v577_v7 = vld [vmem:[%s3978_s6 + $0x2d0] sm:$0xff] }
 0x1f8   : > { %747 = vperm.xlu1 %3841, %v530_v8   ;;  %744 = vperm.xlu0 %3840, %v529_v9   ;;  %v561_v8 = vld [vmem:[%s3978_s6 + $0x250] sm:$0xff] }
 0x1fc   : > { %753 = vperm.xlu1 %3841, %v532_v10   ;;  %750 = vperm.xlu0 %3840, %v531_v20  }
 0x200   : > { %759 = vperm.xlu1 %3841, %v534_v21   ;;  %756 = vperm.xlu0 %3840, %v533_v22   ;;  %v578_v22 = vld [vmem:[%s3978_s6 + $0x2d8] sm:$0xff] }
 0x204   : > { %765 = vperm.xlu1 %3841, %v536_v23   ;;  %762 = vperm.xlu0 %3840, %v535_v24   ;;  %v562_v23 = vld [vmem:[%s3978_s6 + $0x258] sm:$0xff] }
 0x208   : > { %771 = vperm.xlu1 %3841, %v538_v25   ;;  %768 = vperm.xlu0 %3840, %v537_v26  }
 0x20c   : > { %777 = vperm.xlu1 %3841, %v540_v27   ;;  %774 = vperm.xlu0 %3840, %v539_v28   ;;  %v579_v28 = vld [vmem:[%s3978_s6 + $0x2e0] sm:$0xff] }
 0x210   : > { %783 = vperm.xlu1 %3841, %v542_v29   ;;  %780 = vperm.xlu0 %3840, %v541_v30   ;;  %v563_v29 = vld [vmem:[%s3978_s6 + $0x260] sm:$0xff] }
 0x214   : > { %789 = vperm.xlu1 %3841, %v544_v31   ;;  %786 = vperm.xlu0 %3840, %v543_v32  }
 0x218   : > { %795 = vperm.xlu1 %3841, %v546_v33   ;;  %792 = vperm.xlu0 %3840, %v545_v34   ;;  %v580_v34 = vld [vmem:[%s3978_s6 + $0x2e8] sm:$0xff] }
 0x21c   : > { %801 = vperm.xlu1 %3841, %v548_v35   ;;  %798 = vperm.xlu0 %3840, %v547_v36   ;;  %v564_v35 = vld [vmem:[%s3978_s6 + $0x268] sm:$0xff] }
 0x220   : > { %807 = vperm.xlu1 %3841, %v550_v37   ;;  %804 = vperm.xlu0 %3840, %v549_v38  }
 0x223   : > { %v625_v42 = vpop.permute.xlu1 %624  ;;  %v619_v43 = vpop.permute.xlu0 %618 }
 0x224   : > { %813 = vperm.xlu1 %3841, %v552_v40   ;;  %810 = vperm.xlu0 %3840, %v551_v41   ;;  %vm1001_vm12 = vcmp.eq.s32.totalorder %v4172_v39, %v619_v43  ;;  %vm1003_vm14 = vcmp.eq.s32.totalorder %v4172_v39, %v625_v42  ;;  %v581_v41 = vld [vmem:[%s3978_s6 + $0x2f0] sm:$0xff] }
 0x225   : > { %v2892_v45 = vsel %vm1001_vm12, 1.0, %v3888_v44  ;;  %v2894_v52 = vsel %vm1003_vm14, 1.0, %v3888_v44  ;;  %v565_v42 = vld [vmem:[%s3978_s6 + $0x270] sm:$0xff] }
 0x226   : > { %3461 = vmatprep.mubr.msk.f32.mxu0 %vm1387_vm7, %v2892_v45 }
 0x227   : > { %v628_v0 = vpop.permute.xlu1 %627  ;;  %v622_v48 = vpop.permute.xlu0 %621 }
 0x228   : > { %vm1002_vm15 = vcmp.eq.s32.totalorder %v4172_v39, %v622_v48  ;;  %819 = vperm.xlu1 %3841, %v554_v46   ;;  %816 = vperm.xlu0 %3840, %v553_v47   ;;  %vm1004_vm6 = vcmp.eq.s32.totalorder %v4172_v39, %v628_v0  ;;  %v582_v0 = vld [vmem:[%s3978_s6 + $0x2f8] sm:$0xff] }
 0x229   : > { %v2893_v49 = vsel %vm1002_vm15, 1.0, %v3888_v44  ;;  %v2895_v55 = vsel %vm1004_vm6, 1.0, %v3888_v44  ;;  %v566_v48 = vld [vmem:[%s3978_s6 + $0x278] sm:$0xff] }
 0x22a   : > { %3462 = vmatmul.mubr.msk.f32.vlgmr.msra.gmra.mrb[0].mxu0 %vm1387_vm7, %v2893_v49 }
 0x22b   : > { %v634_v53 = vpop.permute.xlu1 %633  ;;  %3464 = vmatprep.mubr.msk.f32.mxu0 %vm1387_vm7, %v2894_v52  ;;  %v631_v54 = vpop.permute.xlu0 %630 }
 0x22c   : > { %vm1005_vm12 = vcmp.eq.s32.totalorder %v4172_v39, %v631_v54  ;;  %825 = vperm.xlu1 %3841, %v556_v50   ;;  %822 = vperm.xlu0 %3840, %v555_v51   ;;  %vm1006_vm14 = vcmp.eq.s32.totalorder %v4172_v39, %v634_v53  ;;  %v583_v53 = vld [vmem:[%s3978_s6 + $0x300] sm:$0xff] }
 0x22d   : > { %v2896_v56 = vsel %vm1005_vm12, 1.0, %v3888_v44  ;;  %v2897_v61 = vsel %vm1006_vm14, 1.0, %v3888_v44  ;;  %v567_v54 = vld [vmem:[%s3978_s6 + $0x280] sm:$0xff] }
 0x22e   : > { %3465 = vmatmul.mubr.msk.f32.gmra.mrb[2].mxu0 %vm1387_vm7, %v2895_v55 }
 0x22f   : > { %v640_v59 = vpop.permute.xlu1 %639  ;;  %3467 = vmatprep.mubr.msk.f32.mxu0 %vm1387_vm7, %v2896_v56  ;;  %v637_v60 = vpop.permute.xlu0 %636 }
 0x230   : > { %vm1007_vm15 = vcmp.eq.s32.totalorder %v4172_v39, %v637_v60  ;;  %831 = vperm.xlu1 %3841, %v558_v57   ;;  %828 = vperm.xlu0 %3840, %v557_v58   ;;  %vm1008_vm6 = vcmp.eq.s32.totalorder %v4172_v39, %v640_v59  ;;  %v584_v59 = vld [vmem:[%s3978_s6 + $0x308] sm:$0xff] }
 0x231   : > { %v2898_v62 = vsel %vm1007_vm15, 1.0, %v3888_v44  ;;  %v2899_v5 = vsel %vm1008_vm6, 1.0, %v3888_v44  ;;  %v568_v60 = vld [vmem:[%s3978_s6 + $0x288] sm:$0xff] }
 0x232   : > { %3468 = vmatmul.mubr.msk.f32.gmra.mrb[4].mxu0 %vm1387_vm7, %v2897_v61 }
 0x233   : > { %v646_v3 = vpop.permute.xlu1 %645  ;;  %3470 = vmatprep.mubr.msk.f32.mxu0 %vm1387_vm7, %v2898_v62  ;;  %v643_v4 = vpop.permute.xlu0 %642 }
 0x234   : > { %vm1009_vm12 = vcmp.eq.s32.totalorder %v4172_v39, %v643_v4  ;;  %837 = vperm.xlu1 %3841, %v560_v63   ;;  %834 = vperm.xlu0 %3840, %v559_v2   ;;  %vm1010_vm14 = vcmp.eq.s32.totalorder %v4172_v39, %v646_v3  ;;  %v585_v3 = vld [vmem:[%s3978_s6 + $0x310] sm:$0xff] }
 0x235   : > { %v2900_v6 = vsel %vm1009_vm12, 1.0, %v3888_v44  ;;  %v2901_v20 = vsel %vm1010_vm14, 1.0, %v3888_v44  ;;  %v569_v4 = vld [vmem:[%s3978_s6 + $0x290] sm:$0xff] }
 0x236   : > { %3471 = vmatmul.mubr.msk.f32.gmra.mrb[6].mxu0 %vm1387_vm7, %v2899_v5 }
 0x237   : > { %v652_v9 = vpop.permute.xlu1 %651  ;;  %3473 = vmatprep.mubr.msk.f32.mxu0 %vm1387_vm7, %v2900_v6  ;;  %v649_v10 = vpop.permute.xlu0 %648 }
 0x238   : > { %vm1011_vm15 = vcmp.eq.s32.totalorder %v4172_v39, %v649_v10  ;;  %888 = vperm.xlu1 %3841, %v577_v7   ;;  %840 = vperm.xlu0 %3840, %v561_v8   ;;  %vm1012_vm6 = vcmp.eq.s32.totalorder %v4172_v39, %v652_v9  ;;  %v586_v9 = vld [vmem:[%s3978_s6 + $0x318] sm:$0xff] }
 0x239   : > { %v2902_v21 = vsel %vm1011_vm15, 1.0, %v3888_v44  ;;  %v2903_v26 = vsel %vm1012_vm6, 1.0, %v3888_v44  ;;  %v570_v10 = vld [vmem:[%s3978_s6 + $0x298] sm:$0xff] }
 0x23a   : > { %3474 = vmatmul.mubr.msk.f32.gmra.mrb[8].mxu0 %vm1387_vm7, %v2901_v20 }
 0x23b   : > { %v658_v24 = vpop.permute.xlu1 %657  ;;  %3476 = vmatprep.mubr.msk.f32.mxu0 %vm1387_vm7, %v2902_v21  ;;  %v655_v25 = vpop.permute.xlu0 %654 }
 0x23c   : > { %vm1013_vm12 = vcmp.eq.s32.totalorder %v4172_v39, %v655_v25  ;;  %891 = vperm.xlu1 %3841, %v578_v22   ;;  %843 = vperm.xlu0 %3840, %v562_v23   ;;  %vm1014_vm14 = vcmp.eq.s32.totalorder %v4172_v39, %v658_v24  ;;  %v587_v24 = vld [vmem:[%s3978_s6 + $0x320] sm:$0xff] }
 0x23d   : > { %v2904_v27 = vsel %vm1013_vm12, 1.0, %v3888_v44  ;;  %v2905_v32 = vsel %vm1014_vm14, 1.0, %v3888_v44  ;;  %v571_v25 = vld [vmem:[%s3978_s6 + $0x2a0] sm:$0xff] }
 0x23e   : > { %3477 = vmatmul.mubr.msk.f32.gmra.mrb[10].mxu0 %vm1387_vm7, %v2903_v26 }
 0x23f   : > { %v664_v30 = vpop.permute.xlu1 %663  ;;  %3479 = vmatprep.mubr.msk.f32.mxu0 %vm1387_vm7, %v2904_v27  ;;  %v661_v31 = vpop.permute.xlu0 %660 }
 0x240   : > { %vm1015_vm15 = vcmp.eq.s32.totalorder %v4172_v39, %v661_v31  ;;  %894 = vperm.xlu1 %3841, %v579_v28   ;;  %846 = vperm.xlu0 %3840, %v563_v29   ;;  %vm1016_vm6 = vcmp.eq.s32.totalorder %v4172_v39, %v664_v30  ;;  %v588_v30 = vld [vmem:[%s3978_s6 + $0x328] sm:$0xff] }
 0x241   : > { %v2906_v33 = vsel %vm1015_vm15, 1.0, %v3888_v44  ;;  %v2907_v38 = vsel %vm1016_vm6, 1.0, %v3888_v44  ;;  %v572_v31 = vld [vmem:[%s3978_s6 + $0x2a8] sm:$0xff] }
 0x242   : > { %3480 = vmatmul.mubr.msk.f32.gmra.mrb[12].mxu0 %vm1387_vm7, %v2905_v32 }
 0x243   : > { %v670_v36 = vpop.permute.xlu1 %669  ;;  %3482 = vmatprep.mubr.msk.f32.mxu0 %vm1387_vm7, %v2906_v33  ;;  %v667_v37 = vpop.permute.xlu0 %666 }
 0x244   : > { %vm1017_vm12 = vcmp.eq.s32.totalorder %v4172_v39, %v667_v37  ;;  %897 = vperm.xlu1 %3841, %v580_v34   ;;  %849 = vperm.xlu0 %3840, %v564_v35   ;;  %vm1018_vm14 = vcmp.eq.s32.totalorder %v4172_v39, %v670_v36  ;;  %v589_v36 = vld [vmem:[%s3978_s6 + $0x330] sm:$0xff] }
 0x245   : > { %v2908_v40 = vsel %vm1017_vm12, 1.0, %v3888_v44  ;;  %v2909_v46 = vsel %vm1018_vm14, 1.0, %v3888_v44  ;;  %v573_v37 = vld [vmem:[%s3978_s6 + $0x2b0] sm:$0xff] }
 0x246   : > { %3483 = vmatmul.mubr.msk.f32.gmra.mrb[14].mxu0 %vm1387_vm7, %v2907_v38 }
 0x247   : > { %v676_v43 = vpop.permute.xlu1 %675  ;;  %3485 = vmatprep.mubr.msk.f32.mxu0 %vm1387_vm7, %v2908_v40  ;;  %v673_v45 = vpop.permute.xlu0 %672 }
 0x248   : > { %vm1019_vm15 = vcmp.eq.s32.totalorder %v4172_v39, %v673_v45  ;;  %900 = vperm.xlu1 %3841, %v581_v41   ;;  %852 = vperm.xlu0 %3840, %v565_v42   ;;  %vm1020_vm6 = vcmp.eq.s32.totalorder %v4172_v39, %v676_v43  ;;  %v590_v43 = vld [vmem:[%s3978_s6 + $0x338] sm:$0xff] }
 0x249   : > { %v2910_v47 = vsel %vm1019_vm15, 1.0, %v3888_v44  ;;  %v2911_v51 = vsel %vm1020_vm6, 1.0, %v3888_v44  ;;  %v574_v45 = vld [vmem:[%s3978_s6 + $0x2b8] sm:$0xff] }
 0x24a   : > { %3486 = vmatmul.mubr.msk.f32.gmra.mrb[16].mxu0 %vm1387_vm7, %v2909_v46 }
 0x24b   : > { %v682_v49 = vpop.permute.xlu1 %681  ;;  %3488 = vmatprep.mubr.msk.f32.mxu0 %vm1387_vm7, %v2910_v47  ;;  %v679_v50 = vpop.permute.xlu0 %678 }
 0x24c   : > { %vm1021_vm12 = vcmp.eq.s32.totalorder %v4172_v39, %v679_v50  ;;  %903 = vperm.xlu1 %3841, %v582_v0   ;;  %855 = vperm.xlu0 %3840, %v566_v48   ;;  %vm1022_vm14 = vcmp.eq.s32.totalorder %v4172_v39, %v682_v49  ;;  %v591_v49 = vld [vmem:[%s3978_s6 + $0x340] sm:$0xff] }
 0x24d   : > { %v2912_v52 = vsel %vm1021_vm12, 1.0, %v3888_v44  ;;  %v2913_v57 = vsel %vm1022_vm14, 1.0, %v3888_v44  ;;  %v575_v50 = vld [vmem:[%s3978_s6 + $0x2c0] sm:$0xff] }
 0x24e   : > { %3489 = vmatmul.mubr.msk.f32.gmra.mrb[18].mxu0 %vm1387_vm7, %v2911_v51 }
 0x24f   : > { %v688_v55 = vpop.permute.xlu1 %687  ;;  %3491 = vmatprep.mubr.msk.f32.mxu0 %vm1387_vm7, %v2912_v52  ;;  %v685_v56 = vpop.permute.xlu0 %684 }
 0x250   : > { %vm1023_vm15 = vcmp.eq.s32.totalorder %v4172_v39, %v685_v56  ;;  %906 = vperm.xlu1 %3841, %v583_v53   ;;  %858 = vperm.xlu0 %3840, %v567_v54   ;;  %vm1024_vm6 = vcmp.eq.s32.totalorder %v4172_v39, %v688_v55  ;;  %v592_v55 = vld [vmem:[%s3978_s6 + $0x348] sm:$0xff] }
 0x251   : > { %v2914_v58 = vsel %vm1023_vm15, 1.0, %v3888_v44  ;;  %v2915_v63 = vsel %vm1024_vm6, 1.0, %v3888_v44  ;;  %v576_v56 = vld [vmem:[%s3978_s6 + $0x2c8] sm:$0xff] }
 0x252   : > { %3492 = vmatmul.mubr.msk.f32.gmra.mrb[20].mxu0 %vm1387_vm7, %v2913_v57 }
 0x253   : > { %v694_v61 = vpop.permute.xlu1 %693  ;;  %3494 = vmatprep.mubr.msk.f32.mxu0 %vm1387_vm7, %v2914_v58  ;;  %v691_v62 = vpop.permute.xlu0 %690 }
 0x254   : > { %vm1025_vm12 = vcmp.eq.s32.totalorder %v4172_v39, %v691_v62  ;;  %909 = vperm.xlu1 %3841, %v584_v59   ;;  %861 = vperm.xlu0 %3840, %v568_v60   ;;  %vm1026_vm14 = vcmp.eq.s32.totalorder %v4172_v39, %v694_v61  ;;  %v594_v61 = vld [vmem:[%s3978_s6 + $0x358] sm:$0xff]  ;;  %v593_v62 = vld [vmem:[%s3978_s6 + $0x350] sm:$0xff] }
 0x255   : > { %v2916_v2 = vsel %vm1025_vm12, 1.0, %v3888_v44  ;;  %v2917_v7 = vsel %vm1026_vm14, 1.0, %v3888_v44 }
 0x256   : > { %3495 = vmatmul.mubr.msk.f32.gmra.mrb[22].mxu0 %vm1387_vm7, %v2915_v63 }
 0x257   : > { %v700_v5 = vpop.permute.xlu1 %699  ;;  %3497 = vmatprep.mubr.msk.f32.mxu0 %vm1387_vm7, %v2916_v2  ;;  %v697_v6 = vpop.permute.xlu0 %696 }
 0x258   : > { %vm1027_vm15 = vcmp.eq.s32.totalorder %v4172_v39, %v697_v6  ;;  %912 = vperm.xlu1 %3841, %v585_v3   ;;  %864 = vperm.xlu0 %3840, %v569_v4   ;;  %vm1028_vm6 = vcmp.eq.s32.totalorder %v4172_v39, %v700_v5  ;;  %v596_v5 = vld [vmem:[%s3978_s6 + $0x368] sm:$0xff]  ;;  %v595_v6 = vld [vmem:[%s3978_s6 + $0x360] sm:$0xff] }
 0x259   : > { %v2918_v8 = vsel %vm1027_vm15, 1.0, %v3888_v44  ;;  %v2919_v22 = vsel %vm1028_vm6, 1.0, %v3888_v44 }
 0x25a   : > { %3498 = vmatmul.mubr.msk.f32.gmra.mrb[24].mxu0 %vm1387_vm7, %v2917_v7 }
 0x25b   : > { %v706_v20 = vpop.permute.xlu1 %705  ;;  %3500 = vmatprep.mubr.msk.f32.mxu0 %vm1387_vm7, %v2918_v8  ;;  %v703_v21 = vpop.permute.xlu0 %702 }
 0x25c   : > { %vm1029_vm12 = vcmp.eq.s32.totalorder %v4172_v39, %v703_v21  ;;  %915 = vperm.xlu1 %3841, %v586_v9   ;;  %867 = vperm.xlu0 %3840, %v570_v10   ;;  %vm1030_vm14 = vcmp.eq.s32.totalorder %v4172_v39, %v706_v20  ;;  %v598_v20 = vld [vmem:[%s3978_s6 + $0x378] sm:$0xff]  ;;  %v597_v21 = vld [vmem:[%s3978_s6 + $0x370] sm:$0xff] }
 0x25d   : > { %v2920_v23 = vsel %vm1029_vm12, 1.0, %v3888_v44  ;;  %v2921_v28 = vsel %vm1030_vm14, 1.0, %v3888_v44 }
 0x25e   : > { %3501 = vmatmul.mubr.msk.f32.gmra.mrb[26].mxu0 %vm1387_vm7, %v2919_v22 }
 0x25f   : > { %v712_v26 = vpop.permute.xlu1 %711  ;;  %3503 = vmatprep.mubr.msk.f32.mxu0 %vm1387_vm7, %v2920_v23  ;;  %v709_v27 = vpop.permute.xlu0 %708 }
 0x260   : > { %vm1031_vm15 = vcmp.eq.s32.totalorder %v4172_v39, %v709_v27  ;;  %918 = vperm.xlu1 %3841, %v587_v24   ;;  %870 = vperm.xlu0 %3840, %v571_v25   ;;  %vm1032_vm6 = vcmp.eq.s32.totalorder %v4172_v39, %v712_v26  ;;  %v600_v26 = vld [vmem:[%s3978_s6 + $0x388] sm:$0xff]  ;;  %v599_v27 = vld [vmem:[%s3978_s6 + $0x380] sm:$0xff] }
 0x261   : > { %v2922_v29 = vsel %vm1031_vm15, 1.0, %v3888_v44  ;;  %v2923_v34 = vsel %vm1032_vm6, 1.0, %v3888_v44 }
 0x262   : > { %3504 = vmatmul.mubr.msk.f32.gmra.mrb[28].mxu0 %vm1387_vm7, %v2921_v28 }
 0x263   : > { %v718_v32 = vpop.permute.xlu1 %717  ;;  %3506 = vmatprep.mubr.msk.f32.mxu0 %vm1387_vm7, %v2922_v29  ;;  %v715_v33 = vpop.permute.xlu0 %714 }
 0x264   : > { %vm1033_vm12 = vcmp.eq.s32.totalorder %v4172_v39, %v715_v33  ;;  %921 = vperm.xlu1 %3841, %v588_v30   ;;  %873 = vperm.xlu0 %3840, %v572_v31   ;;  %vm1034_vm14 = vcmp.eq.s32.totalorder %v4172_v39, %v718_v32  ;;  %v602_v32 = vld [vmem:[%s3978_s6 + $0x398] sm:$0xff]  ;;  %v601_v33 = vld [vmem:[%s3978_s6 + $0x390] sm:$0xff] }
 0x265   : > { %v2924_v35 = vsel %vm1033_vm12, 1.0, %v3888_v44  ;;  %v2925_v41 = vsel %vm1034_vm14, 1.0, %v3888_v44 }
 0x266   : > { %3507 = vmatmul.mubr.msk.f32.gmra.mrb[30].mxu0 %vm1387_vm7, %v2923_v34 }
 0x267   : > { %v724_v38 = vpop.permute.xlu1 %723  ;;  %3509 = vmatprep.mubr.msk.f32.mxu0 %vm1387_vm7, %v2924_v35  ;;  %v721_v40 = vpop.permute.xlu0 %720 }
 0x268   : > { %vm1035_vm15 = vcmp.eq.s32.totalorder %v4172_v39, %v721_v40  ;;  %924 = vperm.xlu1 %3841, %v589_v36   ;;  %876 = vperm.xlu0 %3840, %v573_v37   ;;  %vm1036_vm6 = vcmp.eq.s32.totalorder %v4172_v39, %v724_v38  ;;  %v604_v38 = vld [vmem:[%s3978_s6 + $0x3a8] sm:$0xff]  ;;  %v603_v40 = vld [vmem:[%s3978_s6 + $0x3a0] sm:$0xff] }
 0x269   : > { %v2926_v42 = vsel %vm1035_vm15, 1.0, %v3888_v44  ;;  %v2927_v0 = vsel %vm1036_vm6, 1.0, %v3888_v44 }
 0x26a   : > { %3510 = vmatmul.mubr.msk.f32.gmra.mrb[32].mxu0 %vm1387_vm7, %v2925_v41 }
 0x26b   : > { %v730_v46 = vpop.permute.xlu1 %729  ;;  %3512 = vmatprep.mubr.msk.f32.mxu0 %vm1387_vm7, %v2926_v42  ;;  %v727_v47 = vpop.permute.xlu0 %726 }
 0x26c   : > { %vm1037_vm12 = vcmp.eq.s32.totalorder %v4172_v39, %v727_v47  ;;  %927 = vperm.xlu1 %3841, %v590_v43   ;;  %879 = vperm.xlu0 %3840, %v574_v45   ;;  %vm1038_vm14 = vcmp.eq.s32.totalorder %v4172_v39, %v730_v46  ;;  %v606_v46 = vld [vmem:[%s3978_s6 + $0x3b8] sm:$0xff]  ;;  %v605_v47 = vld [vmem:[%s3978_s6 + $0x3b0] sm:$0xff] }
 0x26d   : > { %v2928_v48 = vsel %vm1037_vm12, 1.0, %v3888_v44  ;;  %v2929_v53 = vsel %vm1038_vm14, 1.0, %v3888_v44 }
 0x26e   : > { %3513 = vmatmul.mubr.msk.f32.gmra.mrb[34].mxu0 %vm1387_vm7, %v2927_v0 }
 0x26f   : > { %v736_v51 = vpop.permute.xlu1 %735  ;;  %3515 = vmatprep.mubr.msk.f32.mxu0 %vm1387_vm7, %v2928_v48  ;;  %v733_v52 = vpop.permute.xlu0 %732 }
 0x270   : > { %vm1039_vm15 = vcmp.eq.s32.totalorder %v4172_v39, %v733_v52  ;;  %930 = vperm.xlu1 %3841, %v591_v49   ;;  %882 = vperm.xlu0 %3840, %v575_v50   ;;  %vm1040_vm6 = vcmp.eq.s32.totalorder %v4172_v39, %v736_v51  ;;  %v608_v51 = vld [vmem:[%s3978_s6 + $0x3c8] sm:$0xff]  ;;  %v607_v52 = vld [vmem:[%s3978_s6 + $0x3c0] sm:$0xff] }
 0x271   : > { %v2930_v54 = vsel %vm1039_vm15, 1.0, %v3888_v44  ;;  %v2931_v59 = vsel %vm1040_vm6, 1.0, %v3888_v44 }
 0x272   : > { %3516 = vmatmul.mubr.msk.f32.gmra.mrb[36].mxu0 %vm1387_vm7, %v2929_v53 }
 0x273   : > { %v742_v57 = vpop.permute.xlu1 %741  ;;  %3518 = vmatprep.mubr.msk.f32.mxu0 %vm1387_vm7, %v2930_v54  ;;  %v739_v58 = vpop.permute.xlu0 %738 }
 0x274   : > { %vm1041_vm12 = vcmp.eq.s32.totalorder %v4172_v39, %v739_v58  ;;  %933 = vperm.xlu1 %3841, %v592_v55   ;;  %885 = vperm.xlu0 %3840, %v576_v56   ;;  %vm1042_vm14 = vcmp.eq.s32.totalorder %v4172_v39, %v742_v57  ;;  %v610_v57 = vld [vmem:[%s3978_s6 + $0x3d8] sm:$0xff]  ;;  %v609_v58 = vld [vmem:[%s3978_s6 + $0x3d0] sm:$0xff] }
 0x275   : > { %v2932_v60 = vsel %vm1041_vm12, 1.0, %v3888_v44  ;;  %v2933_v3 = vsel %vm1042_vm14, 1.0, %v3888_v44 }
 0x276   : > { %3519 = vmatmul.mubr.msk.f32.gmra.mrb[38].mxu0 %vm1387_vm7, %v2931_v59 }
 0x277   : > { %v748_v63 = vpop.permute.xlu1 %747  ;;  %3521 = vmatprep.mubr.msk.f32.mxu0 %vm1387_vm7, %v2932_v60  ;;  %v745_v2 = vpop.permute.xlu0 %744 }
 0x278   : > { %vm1043_vm15 = vcmp.eq.s32.totalorder %v4172_v39, %v745_v2  ;;  %939 = vperm.xlu1 %3841, %v594_v61   ;;  %936 = vperm.xlu0 %3840, %v593_v62   ;;  %vm1044_vm6 = vcmp.eq.s32.totalorder %v4172_v39, %v748_v63  ;;  %v612_v63 = vld [vmem:[%s3978_s6 + $0x3e8] sm:$0xff]  ;;  %v611_v2 = vld [vmem:[%s3978_s6 + $0x3e0] sm:$0xff] }
 0x279   : > { %v2934_v4 = vsel %vm1043_vm15, 1.0, %v3888_v44  ;;  %v2935_v9 = vsel %vm1044_vm6, 1.0, %v3888_v44 }
 0x27a   : > { %3522 = vmatmul.mubr.msk.f32.gmra.mrb[40].mxu0 %vm1387_vm7, %v2933_v3 }
 0x27b   : > { %v754_v7 = vpop.permute.xlu1 %753  ;;  %3524 = vmatprep.mubr.msk.f32.mxu0 %vm1387_vm7, %v2934_v4  ;;  %v751_v8 = vpop.permute.xlu0 %750 }
 0x27c   : > { %vm1045_vm12 = vcmp.eq.s32.totalorder %v4172_v39, %v751_v8  ;;  %945 = vperm.xlu1 %3841, %v596_v5   ;;  %942 = vperm.xlu0 %3840, %v595_v6   ;;  %vm1046_vm14 = vcmp.eq.s32.totalorder %v4172_v39, %v754_v7  ;;  %v614_v7 = vld [vmem:[%s3978_s6 + $0x3f8] sm:$0xff]  ;;  %v613_v8 = vld [vmem:[%s3978_s6 + $0x3f0] sm:$0xff] }
 0x27d   : > { %v2936_v10 = vsel %vm1045_vm12, 1.0, %v3888_v44  ;;  %v2937_v24 = vsel %vm1046_vm14, 1.0, %v3888_v44 }
 0x27e   : > { %3525 = vmatmul.mubr.msk.f32.gmra.mrb[42].mxu0 %vm1387_vm7, %v2935_v9 }
 0x27f   : > { %v760_v22 = vpop.permute.xlu1 %759  ;;  %3527 = vmatprep.mubr.msk.f32.mxu0 %vm1387_vm7, %v2936_v10  ;;  %v757_v23 = vpop.permute.xlu0 %756 }
 0x280   : > { %vm1047_vm15 = vcmp.eq.s32.totalorder %v4172_v39, %v757_v23  ;;  %951 = vperm.xlu1 %3841, %v598_v20   ;;  %948 = vperm.xlu0 %3840, %v597_v21   ;;  %vm1048_vm6 = vcmp.eq.s32.totalorder %v4172_v39, %v760_v22 }
 0x281   : > { %v2938_v25 = vsel %vm1047_vm15, 1.0, %v3888_v44  ;;  %v2939_v30 = vsel %vm1048_vm6, 1.0, %v3888_v44 }
 0x282   : > { %3528 = vmatmul.mubr.msk.f32.gmra.mrb[44].mxu0 %vm1387_vm7, %v2937_v24 }
 0x283   : > { %v766_v28 = vpop.permute.xlu1 %765  ;;  %3530 = vmatprep.mubr.msk.f32.mxu0 %vm1387_vm7, %v2938_v25  ;;  %v763_v29 = vpop.permute.xlu0 %762 }
 0x284   : > { %vm1049_vm12 = vcmp.eq.s32.totalorder %v4172_v39, %v763_v29  ;;  %957 = vperm.xlu1 %3841, %v600_v26   ;;  %954 = vperm.xlu0 %3840, %v599_v27   ;;  %vm1050_vm14 = vcmp.eq.s32.totalorder %v4172_v39, %v766_v28 }
 0x285   : > { %v2940_v31 = vsel %vm1049_vm12, 1.0, %v3888_v44  ;;  %v2941_v36 = vsel %vm1050_vm14, 1.0, %v3888_v44 }
 0x286   : > { %3531 = vmatmul.mubr.msk.f32.gmra.mrb[46].mxu0 %vm1387_vm7, %v2939_v30 }
 0x287   : > { %v772_v34 = vpop.permute.xlu1 %771  ;;  %3533 = vmatprep.mubr.msk.f32.mxu0 %vm1387_vm7, %v2940_v31  ;;  %v769_v35 = vpop.permute.xlu0 %768 }
 0x288   : > { %vm1051_vm15 = vcmp.eq.s32.totalorder %v4172_v39, %v769_v35  ;;  %963 = vperm.xlu1 %3841, %v602_v32   ;;  %960 = vperm.xlu0 %3840, %v601_v33   ;;  %vm1052_vm6 = vcmp.eq.s32.totalorder %v4172_v39, %v772_v34 }
 0x289   : > { %v2942_v37 = vsel %vm1051_vm15, 1.0, %v3888_v44  ;;  %v2943_v43 = vsel %vm1052_vm6, 1.0, %v3888_v44 }
 0x28a   : > { %3534 = vmatmul.mubr.msk.f32.gmra.mrb[48].mxu0 %vm1387_vm7, %v2941_v36 }
 0x28b   : > { %v778_v41 = vpop.permute.xlu1 %777  ;;  %3536 = vmatprep.mubr.msk.f32.mxu0 %vm1387_vm7, %v2942_v37  ;;  %v775_v42 = vpop.permute.xlu0 %774 }
 0x28c   : > { %vm1053_vm12 = vcmp.eq.s32.totalorder %v4172_v39, %v775_v42  ;;  %969 = vperm.xlu1 %3841, %v604_v38   ;;  %966 = vperm.xlu0 %3840, %v603_v40   ;;  %vm1054_vm14 = vcmp.eq.s32.totalorder %v4172_v39, %v778_v41 }
 0x28d   : > { %v2944_v45 = vsel %vm1053_vm12, 1.0, %v3888_v44  ;;  %v2945_v49 = vsel %vm1054_vm14, 1.0, %v3888_v44 }
 0x28e   : > { %3537 = vmatmul.mubr.msk.f32.gmra.mrb[50].mxu0 %vm1387_vm7, %v2943_v43 }
 0x28f   : > { %v784_v0 = vpop.permute.xlu1 %783  ;;  %3539 = vmatprep.mubr.msk.f32.mxu0 %vm1387_vm7, %v2944_v45  ;;  %v781_v48 = vpop.permute.xlu0 %780 }
 0x290   : > { %vm1055_vm15 = vcmp.eq.s32.totalorder %v4172_v39, %v781_v48  ;;  %975 = vperm.xlu1 %3841, %v606_v46   ;;  %972 = vperm.xlu0 %3840, %v605_v47   ;;  %vm1056_vm6 = vcmp.eq.s32.totalorder %v4172_v39, %v784_v0 }
 0x291   : > { %v2946_v50 = vsel %vm1055_vm15, 1.0, %v3888_v44  ;;  %v2947_v55 = vsel %vm1056_vm6, 1.0, %v3888_v44 }
 0x292   : > { %3540 = vmatmul.mubr.msk.f32.gmra.mrb[52].mxu0 %vm1387_vm7, %v2945_v49 }
 0x293   : > { %v790_v53 = vpop.permute.xlu1 %789  ;;  %3542 = vmatprep.mubr.msk.f32.mxu0 %vm1387_vm7, %v2946_v50  ;;  %v787_v54 = vpop.permute.xlu0 %786 }
 0x294   : > { %vm1057_vm12 = vcmp.eq.s32.totalorder %v4172_v39, %v787_v54  ;;  %981 = vperm.xlu1 %3841, %v608_v51   ;;  %978 = vperm.xlu0 %3840, %v607_v52   ;;  %vm1058_vm14 = vcmp.eq.s32.totalorder %v4172_v39, %v790_v53 }
 0x295   : > { %v2948_v56 = vsel %vm1057_vm12, 1.0, %v3888_v44  ;;  %v2949_v61 = vsel %vm1058_vm14, 1.0, %v3888_v44 }
 0x296   : > { %3543 = vmatmul.mubr.msk.f32.gmra.mrb[54].mxu0 %vm1387_vm7, %v2947_v55 }
 0x297   : > { %v796_v59 = vpop.permute.xlu1 %795  ;;  %3545 = vmatprep.mubr.msk.f32.mxu0 %vm1387_vm7, %v2948_v56  ;;  %v793_v60 = vpop.permute.xlu0 %792 }
 0x298   : > { %vm1059_vm15 = vcmp.eq.s32.totalorder %v4172_v39, %v793_v60  ;;  %987 = vperm.xlu1 %3841, %v610_v57   ;;  %984 = vperm.xlu0 %3840, %v609_v58   ;;  %vm1060_vm6 = vcmp.eq.s32.totalorder %v4172_v39, %v796_v59 }
 0x299   : > { %v2950_v62 = vsel %vm1059_vm15, 1.0, %v3888_v44  ;;  %v2951_v5 = vsel %vm1060_vm6, 1.0, %v3888_v44 }
 0x29a   : > { %3546 = vmatmul.mubr.msk.f32.gmra.mrb[56].mxu0 %vm1387_vm7, %v2949_v61 }
 0x29b   : > { %v802_v3 = vpop.permute.xlu1 %801  ;;  %3548 = vmatprep.mubr.msk.f32.mxu0 %vm1387_vm7, %v2950_v62  ;;  %v799_v4 = vpop.permute.xlu0 %798 }
 0x29c   : > { %vm1061_vm12 = vcmp.eq.s32.totalorder %v4172_v39, %v799_v4  ;;  %993 = vperm.xlu1 %3841, %v612_v63   ;;  %990 = vperm.xlu0 %3840, %v611_v2   ;;  %vm1062_vm14 = vcmp.eq.s32.totalorder %v4172_v39, %v802_v3 }
 0x29d   : > { %v2952_v6 = vsel %vm1061_vm12, 1.0, %v3888_v44  ;;  %v2953_v20 = vsel %vm1062_vm14, 1.0, %v3888_v44 }
 0x29e   : > { %3549 = vmatmul.mubr.msk.f32.gmra.mrb[58].mxu0 %vm1387_vm7, %v2951_v5 }
 0x29f   : > { %v808_v9 = vpop.permute.xlu1 %807  ;;  %3551 = vmatprep.mubr.msk.f32.mxu0 %vm1387_vm7, %v2952_v6  ;;  %v805_v10 = vpop.permute.xlu0 %804 }
 0x2a0   : > { %vm1063_vm15 = vcmp.eq.s32.totalorder %v4172_v39, %v805_v10  ;;  %999 = vperm.xlu1 %3841, %v614_v7   ;;  %996 = vperm.xlu0 %3840, %v613_v8   ;;  %vm1064_vm6 = vcmp.eq.s32.totalorder %v4172_v39, %v808_v9 }
 0x2a1   : > { %v2954_v21 = vsel %vm1063_vm15, 1.0, %v3888_v44  ;;  %v2955_v24 = vsel %vm1064_vm6, 1.0, %v3888_v44 }
 0x2a2   : > { %3552 = vmatmul.mubr.msk.f32.gmra.mrb[60].mxu0 %vm1387_vm7, %v2953_v20 }
 0x2a3   : > { %v814_v22 = vpop.permute.xlu1 %813  ;;  %3554 = vmatprep.mubr.msk.f32.mxu0 %vm1387_vm7, %v2954_v21  ;;  %v811_v23 = vpop.permute.xlu0 %810 }
 0x2a4   : > { %vm1065_vm12 = vcmp.eq.s32.totalorder %v4172_v39, %v811_v23  ;;  %vm1066_vm13 = vcmp.eq.s32.totalorder %v4172_v39, %v814_v22 }
 0x2a5   : > { %v2956_v25 = vsel %vm1065_vm12, 1.0, %v3888_v44  ;;  %v2957_v28 = vsel %vm1066_vm13, 1.0, %v3888_v44 }
 0x2a6   : > { %3555 = vmatmul.mubr.msk.f32.gmra.mrb[62].mxu0 %vm1387_vm7, %v2955_v24 }
 0x2a7   : > { %v820_v26 = vpop.permute.xlu1 %819  ;;  %3557 = vmatprep.mubr.msk.f32.mxu0 %vm1387_vm7, %v2956_v25  ;;  %v817_v27 = vpop.permute.xlu0 %816 }
 0x2a8   : > { %vm1067_vm14 = vcmp.eq.s32.totalorder %v4172_v39, %v817_v27  ;;  %vm1068_vm15 = vcmp.eq.s32.totalorder %v4172_v39, %v820_v26 }
 0x2a9   : > { %v2958_v29 = vsel %vm1067_vm14, 1.0, %v3888_v44  ;;  %v2959_v32 = vsel %vm1068_vm15, 1.0, %v3888_v44 }
 0x2aa   : > { %3558 = vmatmul.mubr.msk.f32.gmra.mrb[64].mxu0 %vm1387_vm7, %v2957_v28 }
 0x2ab   : > { %v826_v30 = vpop.permute.xlu1 %825  ;;  %3560 = vmatprep.mubr.msk.f32.mxu0 %vm1387_vm7, %v2958_v29  ;;  %v823_v31 = vpop.permute.xlu0 %822 }
 0x2ac   : > { %vm1069_vm6 = vcmp.eq.s32.totalorder %v4172_v39, %v823_v31  ;;  %vm1070_vm12 = vcmp.eq.s32.totalorder %v4172_v39, %v826_v30 }
 0x2ad   : > { %v2960_v33 = vsel %vm1069_vm6, 1.0, %v3888_v44  ;;  %v2961_v36 = vsel %vm1070_vm12, 1.0, %v3888_v44 }
 0x2ae   : > { %3561 = vmatmul.mubr.msk.f32.gmra.mrb[66].mxu0 %vm1387_vm7, %v2959_v32 }
 0x2af   : > { %v832_v34 = vpop.permute.xlu1 %831  ;;  %3563 = vmatprep.mubr.msk.f32.mxu0 %vm1387_vm7, %v2960_v33  ;;  %v829_v35 = vpop.permute.xlu0 %828 }
 0x2b0   : > { %vm1071_vm13 = vcmp.eq.s32.totalorder %v4172_v39, %v829_v35  ;;  %vm1072_vm14 = vcmp.eq.s32.totalorder %v4172_v39, %v832_v34 }
 0x2b1   : > { %v2962_v37 = vsel %vm1071_vm13, 1.0, %v3888_v44  ;;  %v2963_v41 = vsel %vm1072_vm14, 1.0, %v3888_v44 }
 0x2b2   : > { %3564 = vmatmul.mubr.msk.f32.gmra.mrb[68].mxu0 %vm1387_vm7, %v2961_v36 }
 0x2b3   : > { %v838_v38 = vpop.permute.xlu1 %837  ;;  %3566 = vmatprep.mubr.msk.f32.mxu0 %vm1387_vm7, %v2962_v37  ;;  %v835_v40 = vpop.permute.xlu0 %834 }
 0x2b4   : > { %vm1073_vm15 = vcmp.eq.s32.totalorder %v4172_v39, %v835_v40  ;;  %vm1074_vm6 = vcmp.eq.s32.totalorder %v4172_v39, %v838_v38 }
 0x2b5   : > { %v2964_v42 = vsel %vm1073_vm15, 1.0, %v3888_v44  ;;  %v2965_v46 = vsel %vm1074_vm6, 1.0, %v3888_v44 }
 0x2b6   : > { %3567 = vmatmul.mubr.msk.f32.gmra.mrb[70].mxu0 %vm1387_vm7, %v2963_v41 }
 0x2b7   : > { %v889_v43 = vpop.permute.xlu1 %888  ;;  %3569 = vmatprep.mubr.msk.f32.mxu0 %vm1387_vm7, %v2964_v42  ;;  %v841_v45 = vpop.permute.xlu0 %840 }
 0x2b8   : > { %vm1091_vm12 = vcmp.eq.s32.totalorder %v4172_v39, %v889_v43  ;;  %vm1075_vm13 = vcmp.eq.s32.totalorder %v4172_v39, %v841_v45 }
 0x2b9   : > { %v2966_v47 = vsel %vm1075_vm13, 1.0, %v3888_v44  ;;  %v2982_v0 = vsel %vm1091_vm12, 1.0, %v3888_v44 }
 0x2ba   : > { %3570 = vmatmul.mubr.msk.f32.gmra.mrb[72].mxu0 %vm1387_vm7, %v2965_v46  ;;  %3596 = vmatprep.mubr.msk.f32.mxu1 %vm1387_vm7, %v2982_v0 }
 0x2bb   : > { %v892_v48 = vpop.permute.xlu1 %891  ;;  %3572 = vmatprep.mubr.msk.f32.mxu0 %vm1387_vm7, %v2966_v47  ;;  %v844_v49 = vpop.permute.xlu0 %843 }
 0x2bc   : > { %vm1092_vm14 = vcmp.eq.s32.totalorder %v4172_v39, %v892_v48  ;;  %vm1076_vm15 = vcmp.eq.s32.totalorder %v4172_v39, %v844_v49 }
 0x2bd   : > { %v2983_v50 = vsel %vm1092_vm14, 1.0, %v3888_v44  ;;  %v2967_v51 = vsel %vm1076_vm15, 1.0, %v3888_v44 }
 0x2be   : > { %3573 = vmatmul.mubr.msk.f32.gmra.mrb[74].mxu0 %vm1387_vm7, %v2967_v51  ;;  %3597 = vmatmul.mubr.msk.f32.vlgmr.msra.gmra.mrb[0].mxu1 %vm1387_vm7, %v2983_v50 }
 0x2bf   : > { %v895_v52 = vpop.permute.xlu1 %894  ;;  %v847_v53 = vpop.permute.xlu0 %846 }
 0x2c0   : > { %vm1093_vm6 = vcmp.eq.s32.totalorder %v4172_v39, %v895_v52  ;;  %vm1077_vm12 = vcmp.eq.s32.totalorder %v4172_v39, %v847_v53 }
 0x2c1   : > { %v2984_v54 = vsel %vm1093_vm6, 1.0, %v3888_v44  ;;  %v2968_v55 = vsel %vm1077_vm12, 1.0, %v3888_v44 }
 0x2c2   : > { %3575 = vmatprep.mubr.msk.f32.mxu0 %vm1387_vm7, %v2968_v55  ;;  %3599 = vmatprep.mubr.msk.f32.mxu1 %vm1387_vm7, %v2984_v54 }
 0x2c3   : > { %v898_v56 = vpop.permute.xlu1 %897  ;;  %v850_v57 = vpop.permute.xlu0 %849 }
 0x2c4   : > { %vm1094_vm13 = vcmp.eq.s32.totalorder %v4172_v39, %v898_v56  ;;  %vm1078_vm14 = vcmp.eq.s32.totalorder %v4172_v39, %v850_v57 }
 0x2c5   : > { %v2985_v58 = vsel %vm1094_vm13, 1.0, %v3888_v44  ;;  %v2969_v59 = vsel %vm1078_vm14, 1.0, %v3888_v44 }
 0x2c6   : > { %3576 = vmatmul.mubr.msk.f32.gmra.mrb[76].mxu0 %vm1387_vm7, %v2969_v59  ;;  %3600 = vmatmul.mubr.msk.f32.gmra.mrb[2].mxu1 %vm1387_vm7, %v2985_v58 }
 0x2c7   : > { %v901_v60 = vpop.permute.xlu1 %900  ;;  %v853_v61 = vpop.permute.xlu0 %852 }
 0x2c8   : > { %vm1095_vm15 = vcmp.eq.s32.totalorder %v4172_v39, %v901_v60  ;;  %vm1079_vm6 = vcmp.eq.s32.totalorder %v4172_v39, %v853_v61 }
 0x2c9   : > { %v2986_v62 = vsel %vm1095_vm15, 1.0, %v3888_v44  ;;  %v2970_v63 = vsel %vm1079_vm6, 1.0, %v3888_v44 }
 0x2ca   : > { %3578 = vmatprep.mubr.msk.f32.mxu0 %vm1387_vm7, %v2970_v63  ;;  %3602 = vmatprep.mubr.msk.f32.mxu1 %vm1387_vm7, %v2986_v62 }
 0x2cb   : > { %v904_v2 = vpop.permute.xlu1 %903  ;;  %v856_v3 = vpop.permute.xlu0 %855 }
 0x2cc   : > { %vm1096_vm12 = vcmp.eq.s32.totalorder %v4172_v39, %v904_v2  ;;  %vm1080_vm13 = vcmp.eq.s32.totalorder %v4172_v39, %v856_v3 }
 0x2cd   : > { %v2987_v4 = vsel %vm1096_vm12, 1.0, %v3888_v44  ;;  %v2971_v5 = vsel %vm1080_vm13, 1.0, %v3888_v44 }
 0x2ce   : > { %3579 = vmatmul.mubr.msk.f32.gmra.mrb[78].mxu0 %vm1387_vm7, %v2971_v5  ;;  %3603 = vmatmul.mubr.msk.f32.gmra.mrb[4].mxu1 %vm1387_vm7, %v2987_v4 }
 0x2cf   : > { %v907_v6 = vpop.permute.xlu1 %906  ;;  %v859_v7 = vpop.permute.xlu0 %858 }
 0x2d0   : > { %vm1097_vm14 = vcmp.eq.s32.totalorder %v4172_v39, %v907_v6  ;;  %vm1081_vm15 = vcmp.eq.s32.totalorder %v4172_v39, %v859_v7 }
 0x2d1   : > { %v2988_v8 = vsel %vm1097_vm14, 1.0, %v3888_v44  ;;  %v2972_v9 = vsel %vm1081_vm15, 1.0, %v3888_v44 }
 0x2d2   : > { %3581 = vmatprep.mubr.msk.f32.mxu0 %vm1387_vm7, %v2972_v9  ;;  %3605 = vmatprep.mubr.msk.f32.mxu1 %vm1387_vm7, %v2988_v8 }
 0x2d3   : > { %v910_v10 = vpop.permute.xlu1 %909  ;;  %v862_v20 = vpop.permute.xlu0 %861 }
 0x2d4   : > { %vm1098_vm6 = vcmp.eq.s32.totalorder %v4172_v39, %v910_v10  ;;  %vm1082_vm12 = vcmp.eq.s32.totalorder %v4172_v39, %v862_v20 }
 0x2d5   : > { %v2989_v21 = vsel %vm1098_vm6, 1.0, %v3888_v44  ;;  %v2973_v22 = vsel %vm1082_vm12, 1.0, %v3888_v44 }
 0x2d6   : > { %3582 = vmatmul.mubr.msk.f32.gmra.mrb[80].mxu0 %vm1387_vm7, %v2973_v22  ;;  %3606 = vmatmul.mubr.msk.f32.gmra.mrb[6].mxu1 %vm1387_vm7, %v2989_v21 }
 0x2d7   : > { %v913_v23 = vpop.permute.xlu1 %912  ;;  %v865_v24 = vpop.permute.xlu0 %864 }
 0x2d8   : > { %vm1099_vm13 = vcmp.eq.s32.totalorder %v4172_v39, %v913_v23  ;;  %vm1083_vm14 = vcmp.eq.s32.totalorder %v4172_v39, %v865_v24 }
 0x2d9   : > { %v2990_v25 = vsel %vm1099_vm13, 1.0, %v3888_v44  ;;  %v2974_v26 = vsel %vm1083_vm14, 1.0, %v3888_v44 }
 0x2da   : > { %3584 = vmatprep.mubr.msk.f32.mxu0 %vm1387_vm7, %v2974_v26  ;;  %3608 = vmatprep.mubr.msk.f32.mxu1 %vm1387_vm7, %v2990_v25 }
 0x2db   : > { %v916_v27 = vpop.permute.xlu1 %915  ;;  %v868_v28 = vpop.permute.xlu0 %867 }
 0x2dc   : > { %vm1100_vm15 = vcmp.eq.s32.totalorder %v4172_v39, %v916_v27  ;;  %vm1084_vm6 = vcmp.eq.s32.totalorder %v4172_v39, %v868_v28 }
 0x2dd   : > { %v2991_v29 = vsel %vm1100_vm15, 1.0, %v3888_v44  ;;  %v2975_v30 = vsel %vm1084_vm6, 1.0, %v3888_v44 }
 0x2de   : > { %3585 = vmatmul.mubr.msk.f32.gmra.mrb[82].mxu0 %vm1387_vm7, %v2975_v30  ;;  %3609 = vmatmul.mubr.msk.f32.gmra.mrb[8].mxu1 %vm1387_vm7, %v2991_v29 }
 0x2df   : > { %v919_v31 = vpop.permute.xlu1 %918  ;;  %v871_v32 = vpop.permute.xlu0 %870 }
 0x2e0   : > { %vm1101_vm12 = vcmp.eq.s32.totalorder %v4172_v39, %v919_v31  ;;  %vm1085_vm13 = vcmp.eq.s32.totalorder %v4172_v39, %v871_v32 }
 0x2e1   : > { %v2992_v33 = vsel %vm1101_vm12, 1.0, %v3888_v44  ;;  %v2976_v34 = vsel %vm1085_vm13, 1.0, %v3888_v44 }
 0x2e2   : > { %3587 = vmatprep.mubr.msk.f32.mxu0 %vm1387_vm7, %v2976_v34  ;;  %3611 = vmatprep.mubr.msk.f32.mxu1 %vm1387_vm7, %v2992_v33 }
 0x2e3   : > { %v922_v35 = vpop.permute.xlu1 %921  ;;  %v874_v36 = vpop.permute.xlu0 %873 }
 0x2e4   : > { %vm1102_vm14 = vcmp.eq.s32.totalorder %v4172_v39, %v922_v35  ;;  %vm1086_vm15 = vcmp.eq.s32.totalorder %v4172_v39, %v874_v36 }
 0x2e5   : > { %v2993_v37 = vsel %vm1102_vm14, 1.0, %v3888_v44  ;;  %v2977_v38 = vsel %vm1086_vm15, 1.0, %v3888_v44 }
 0x2e6   : > { %3588 = vmatmul.mubr.msk.f32.gmra.mrb[84].mxu0 %vm1387_vm7, %v2977_v38  ;;  %3612 = vmatmul.mubr.msk.f32.gmra.mrb[10].mxu1 %vm1387_vm7, %v2993_v37 }
 0x2e7   : > { %v925_v40 = vpop.permute.xlu1 %924  ;;  %v877_v41 = vpop.permute.xlu0 %876 }
 0x2e8   : > { %vm1103_vm6 = vcmp.eq.s32.totalorder %v4172_v39, %v925_v40  ;;  %vm1087_vm12 = vcmp.eq.s32.totalorder %v4172_v39, %v877_v41 }
 0x2e9   : > { %v2994_v42 = vsel %vm1103_vm6, 1.0, %v3888_v44  ;;  %v2978_v43 = vsel %vm1087_vm12, 1.0, %v3888_v44 }
 0x2ea   : > { %3590 = vmatprep.mubr.msk.f32.mxu0 %vm1387_vm7, %v2978_v43  ;;  %3614 = vmatprep.mubr.msk.f32.mxu1 %vm1387_vm7, %v2994_v42 }
 0x2eb   : > { %v928_v45 = vpop.permute.xlu1 %927  ;;  %v880_v46 = vpop.permute.xlu0 %879 }
 0x2ec   : > { %vm1104_vm13 = vcmp.eq.s32.totalorder %v4172_v39, %v928_v45  ;;  %vm1088_vm14 = vcmp.eq.s32.totalorder %v4172_v39, %v880_v46 }
 0x2ed   : > { %v2995_v47 = vsel %vm1104_vm13, 1.0, %v3888_v44  ;;  %v2979_v0 = vsel %vm1088_vm14, 1.0, %v3888_v44 }
 0x2ee   : > { %3591 = vmatmul.mubr.msk.f32.gmra.mrb[86].mxu0 %vm1387_vm7, %v2979_v0  ;;  %3615 = vmatmul.mubr.msk.f32.gmra.mrb[12].mxu1 %vm1387_vm7, %v2995_v47 }
 0x2ef   : > { %v931_v48 = vpop.permute.xlu1 %930  ;;  %v883_v49 = vpop.permute.xlu0 %882 }
 0x2f0   : > { %vm1105_vm15 = vcmp.eq.s32.totalorder %v4172_v39, %v931_v48  ;;  %vm1089_vm6 = vcmp.eq.s32.totalorder %v4172_v39, %v883_v49 }
 0x2f1   : > { %v2996_v50 = vsel %vm1105_vm15, 1.0, %v3888_v44  ;;  %v2980_v51 = vsel %vm1089_vm6, 1.0, %v3888_v44 }
 0x2f2   : > { %3593 = vmatprep.mubr.msk.f32.mxu0 %vm1387_vm7, %v2980_v51  ;;  %3617 = vmatprep.mubr.msk.f32.mxu1 %vm1387_vm7, %v2996_v50 }
 0x2f3   : > { %v934_v52 = vpop.permute.xlu1 %933  ;;  %v886_v53 = vpop.permute.xlu0 %885 }
 0x2f4   : > { %vm1106_vm12 = vcmp.eq.s32.totalorder %v4172_v39, %v934_v52  ;;  %vm1090_vm13 = vcmp.eq.s32.totalorder %v4172_v39, %v886_v53 }
 0x2f5   : > { %v2997_v54 = vsel %vm1106_vm12, 1.0, %v3888_v44  ;;  %v2981_v55 = vsel %vm1090_vm13, 1.0, %v3888_v44 }
 0x2f6   : > { %3594 = vmatmul.mubr.msk.f32.gmra.mrb[88].mxu0 %vm1387_vm7, %v2981_v55  ;;  %3618 = vmatmul.mubr.msk.f32.gmra.mrb[14].mxu1 %vm1387_vm7, %v2997_v54 }
 0x2f7   : > { %v940_v56 = vpop.permute.xlu1 %939  ;;  %v937_v57 = vpop.permute.xlu0 %936 }
 0x2f8   : > { %vm1108_vm14 = vcmp.eq.s32.totalorder %v4172_v39, %v940_v56  ;;  %vm1107_vm15 = vcmp.eq.s32.totalorder %v4172_v39, %v937_v57 }
 0x2f9   : > { %v2999_v58 = vsel %vm1108_vm14, 1.0, %v3888_v44  ;;  %v2998_v59 = vsel %vm1107_vm15, 1.0, %v3888_v44 }
 0x2fa   : > { %3620 = vmatprep.mubr.msk.f32.mxu1 %vm1387_vm7, %v2998_v59 }
 0x2fb   : > { %v946_v60 = vpop.permute.xlu1 %945  ;;  %3621 = vmatmul.mubr.msk.f32.gmra.mrb[16].mxu1 %vm1387_vm7, %v2999_v58  ;;  %v943_v61 = vpop.permute.xlu0 %942 }
 0x2fc   : > { %vm1110_vm6 = vcmp.eq.s32.totalorder %v4172_v39, %v946_v60  ;;  %vm1109_vm12 = vcmp.eq.s32.totalorder %v4172_v39, %v943_v61 }
 0x2fd   : > { %v3001_v62 = vsel %vm1110_vm6, 1.0, %v3888_v44  ;;  %v3000_v63 = vsel %vm1109_vm12, 1.0, %v3888_v44  ;;  %v4566_v2 = vpop.f32.mrb[0].mxu0 }
 0x2fe   : > { %v4568_v3 = vpop.f32.mrb[1].mxu0  ;;  %3623 = vmatprep.mubr.msk.f32.mxu1 %vm1387_vm7, %v3000_v63 }
 0x2ff   : > { %v3659_v4 = vpack.c.bf16 %v4566_v2, %v4568_v3  ;;  %v952_v5 = vpop.permute.xlu1 %951  ;;  %3624 = vmatmul.mubr.msk.f32.gmra.mrb[18].mxu1 %vm1387_vm7, %v3001_v62  ;;  %v949_v6 = vpop.permute.xlu0 %948 }
 0x300   : > { %vm1112_vm13 = vcmp.eq.s32.totalorder %v4172_v39, %v952_v5  ;;  %vm1111_vm14 = vcmp.eq.s32.totalorder %v4172_v39, %v949_v6 }
 0x301   : > { %v3003_v7 = vsel %vm1112_vm13, 1.0, %v3888_v44  ;;  %v3002_v8 = vsel %vm1111_vm14, 1.0, %v3888_v44  ;;  %v4578_v9 = vpop.f32.mrb[2].mxu0 }
 0x302   : > { %v4580_v10 = vpop.f32.mrb[3].mxu0  ;;  %3626 = vmatprep.mubr.msk.f32.mxu1 %vm1387_vm7, %v3002_v8 }
 0x303   : > { %v3663_v20 = vpack.c.bf16 %v4578_v9, %v4580_v10  ;;  %v958_v21 = vpop.permute.xlu1 %957  ;;  %3627 = vmatmul.mubr.msk.f32.gmra.mrb[20].mxu1 %vm1387_vm7, %v3003_v7  ;;  %v955_v22 = vpop.permute.xlu0 %954 }
 0x304   : > { %vm1114_vm15 = vcmp.eq.s32.totalorder %v4172_v39, %v958_v21  ;;  %vm1113_vm6 = vcmp.eq.s32.totalorder %v4172_v39, %v955_v22 }
 0x305   : > { %v3005_v23 = vsel %vm1114_vm15, 1.0, %v3888_v44  ;;  %v3004_v24 = vsel %vm1113_vm6, 1.0, %v3888_v44  ;;  %v4590_v25 = vpop.f32.mrb[4].mxu0 }
 0x306   : > { %v4592_v26 = vpop.f32.mrb[5].mxu0  ;;  %3629 = vmatprep.mubr.msk.f32.mxu1 %vm1387_vm7, %v3004_v24 }
 0x307   : > { %v3667_v27 = vpack.c.bf16 %v4590_v25, %v4592_v26  ;;  %v964_v28 = vpop.permute.xlu1 %963  ;;  %3630 = vmatmul.mubr.msk.f32.gmra.mrb[22].mxu1 %vm1387_vm7, %v3005_v23  ;;  %v961_v29 = vpop.permute.xlu0 %960 }
 0x308   : > { %vm1116_vm12 = vcmp.eq.s32.totalorder %v4172_v39, %v964_v28  ;;  %vm1115_vm13 = vcmp.eq.s32.totalorder %v4172_v39, %v961_v29 }
 0x309   : > { %v3007_v30 = vsel %vm1116_vm12, 1.0, %v3888_v44  ;;  %v3006_v31 = vsel %vm1115_vm13, 1.0, %v3888_v44  ;;  %v4602_v32 = vpop.f32.mrb[6].mxu0 }
 0x30a   : > { %v4604_v33 = vpop.f32.mrb[7].mxu0  ;;  %3632 = vmatprep.mubr.msk.f32.mxu1 %vm1387_vm7, %v3006_v31 }
 0x30b   : > { %v3671_v34 = vpack.c.bf16 %v4602_v32, %v4604_v33  ;;  %v970_v35 = vpop.permute.xlu1 %969  ;;  %3633 = vmatmul.mubr.msk.f32.gmra.mrb[24].mxu1 %vm1387_vm7, %v3007_v30  ;;  %v967_v36 = vpop.permute.xlu0 %966 }
 0x30c   : > { %vm1118_vm14 = vcmp.eq.s32.totalorder %v4172_v39, %v970_v35  ;;  %vm1117_vm15 = vcmp.eq.s32.totalorder %v4172_v39, %v967_v36 }
 0x30d   : > { %v3009_v37 = vsel %vm1118_vm14, 1.0, %v3888_v44  ;;  %v3008_v38 = vsel %vm1117_vm15, 1.0, %v3888_v44  ;;  %v4614_v40 = vpop.f32.mrb[8].mxu0 }
 0x30e   : > { %v4616_v41 = vpop.f32.mrb[9].mxu0  ;;  %3635 = vmatprep.mubr.msk.f32.mxu1 %vm1387_vm7, %v3008_v38 }
 0x30f   : > { %v3675_v42 = vpack.c.bf16 %v4614_v40, %v4616_v41  ;;  %v976_v43 = vpop.permute.xlu1 %975  ;;  %3636 = vmatmul.mubr.msk.f32.gmra.mrb[26].mxu1 %vm1387_vm7, %v3009_v37  ;;  %v973_v45 = vpop.permute.xlu0 %972  ;;  %v3889_v37 = vmov 1.0  }
 0x310   : > { %vm1120_vm6 = vcmp.eq.s32.totalorder %v4172_v39, %v976_v43  ;;  %vm1119_vm12 = vcmp.eq.s32.totalorder %v4172_v39, %v973_v45 }
 0x311   : > { %v3011_v46 = vsel %vm1120_vm6, 1.0, %v3888_v44  ;;  %v3010_v47 = vsel %vm1119_vm12, 1.0, %v3888_v44  ;;  %v4626_v0 = vpop.f32.mrb[10].mxu0 }
 0x312   : > { %v4628_v48 = vpop.f32.mrb[11].mxu0  ;;  %3638 = vmatprep.mubr.msk.f32.mxu1 %vm1387_vm7, %v3010_v47 }
 0x313   : > { %v3679_v49 = vpack.c.bf16 %v4626_v0, %v4628_v48  ;;  %v982_v50 = vpop.permute.xlu1 %981  ;;  %3639 = vmatmul.mubr.msk.f32.gmra.mrb[28].mxu1 %vm1387_vm7, %v3011_v46  ;;  %v979_v51 = vpop.permute.xlu0 %978 }
 0x314   : > { %vm1122_vm13 = vcmp.eq.s32.totalorder %v4172_v39, %v982_v50  ;;  %vm1121_vm14 = vcmp.eq.s32.totalorder %v4172_v39, %v979_v51 }
 0x315   : > { %v3013_v52 = vsel %vm1122_vm13, 1.0, %v3888_v44  ;;  %v3012_v53 = vsel %vm1121_vm14, 1.0, %v3888_v44  ;;  %v4638_v54 = vpop.f32.mrb[12].mxu0 }
 0x316   : > { %v4640_v55 = vpop.f32.mrb[13].mxu0  ;;  %3641 = vmatprep.mubr.msk.f32.mxu1 %vm1387_vm7, %v3012_v53 }
 0x317   : > { %v3683_v56 = vpack.c.bf16 %v4638_v54, %v4640_v55  ;;  %v988_v57 = vpop.permute.xlu1 %987  ;;  %3642 = vmatmul.mubr.msk.f32.gmra.mrb[30].mxu1 %vm1387_vm7, %v3013_v52  ;;  %v985_v58 = vpop.permute.xlu0 %984 }
 0x318   : > { %vm1124_vm15 = vcmp.eq.s32.totalorder %v4172_v39, %v988_v57  ;;  %vm1123_vm6 = vcmp.eq.s32.totalorder %v4172_v39, %v985_v58 }
 0x319   : > { %v3015_v59 = vsel %vm1124_vm15, 1.0, %v3888_v44  ;;  %v3014_v60 = vsel %vm1123_vm6, 1.0, %v3888_v44  ;;  %v4650_v61 = vpop.f32.mrb[14].mxu0 }
 0x31a   : > { %v4652_v62 = vpop.f32.mrb[15].mxu0  ;;  %3644 = vmatprep.mubr.msk.f32.mxu1 %vm1387_vm7, %v3014_v60 }
 0x31b   : > { %v3687_v63 = vpack.c.bf16 %v4650_v61, %v4652_v62  ;;  %v994_v5 = vpop.permute.xlu1 %993  ;;  %3645 = vmatmul.mubr.msk.f32.gmra.mrb[32].mxu1 %vm1387_vm7, %v3015_v59  ;;  %v991_v6 = vpop.permute.xlu0 %990 }
 0x31c   : > { %vm1126_vm12 = vcmp.eq.s32.totalorder %v4172_v39, %v994_v5  ;;  %vm1125_vm13 = vcmp.eq.s32.totalorder %v4172_v39, %v991_v6 }
 0x31d   : > { %v3017_v7 = vsel %vm1126_vm12, 1.0, %v3888_v44  ;;  %v3016_v8 = vsel %vm1125_vm13, 1.0, %v3888_v44  ;;  %v3487_v21 = vpop.f32.mrb[16].mxu0 }
 0x31e   : > { %v1918_v22 = vpop.f32.mrb[17].mxu0  ;;  %3647 = vmatprep.mubr.msk.f32.mxu1 %vm1387_vm7, %v3016_v8 }
 0x31f   : > { %v3657_v23 = vpack.c.bf16 %v3487_v21, %v1918_v22  ;;  %v1000_v24 = vpop.permute.xlu1 %999  ;;  %3648 = vmatmul.mubr.msk.f32.gmra.mrb[34].mxu1 %vm1387_vm7, %v3017_v7  ;;  %v997_v28 = vpop.permute.xlu0 %996 }
 0x320   : > { %vm1128_vm14 = vcmp.eq.s32.totalorder %v4172_v39, %v1000_v24  ;;  %vm1127_vm15 = vcmp.eq.s32.totalorder %v4172_v39, %v997_v28 }
 0x321   : > { %v3019_v29 = vsel %vm1128_vm14, 1.0, %v3888_v44  ;;  %v3018_v30 = vsel %vm1127_vm15, 1.0, %v3888_v44  ;;  %v3490_v31 = vpop.f32.mrb[18].mxu0  ;;  %3658 = vmatprep.subr.bf16.mxu1 %v3657_v23 }
 0x322   : > { %v1928_v35 = vpop.f32.mrb[19].mxu0  ;;  %3650 = vmatprep.mubr.msk.f32.mxu1 %vm1387_vm7, %v3018_v30  ;;  %3660 = vmatpush3.bf16.msra.mxu1 %v3659_v4 }
 0x323   : > { %v3661_v36 = vpack.c.bf16 %v3490_v31, %v1928_v35  ;;  %3651 = vmatmul.mubr.msk.f32.gmra.mrb[36].mxu1 %vm1387_vm7, %v3019_v29 }
 0x324   : > { %3148 = vmatprep.mubr.msk.f32.mxu1 %vm280_vm1, %v3889_v37  ;;  %vm4817_vm1 = vcmp.eq.s32.totalorder %v3985_v11, %v3995_v16 }
 0x325   : > { %v3493_v39 = vpop.f32.mrb[20].mxu0  ;;  %3662 = vmatprep.subr.bf16.mxu1 %v3661_v36 }
 0x326   : > { %v1938_v44 = vpop.f32.mrb[21].mxu0  ;;  %3664 = vmatpush3.bf16.msra.mxu1 %v3663_v20 }
 0x327   : > { %v3665_v38 = vpack.c.bf16 %v3493_v39, %v1938_v44 }
 0x329   : > { %v3496_v43 = vpop.f32.mrb[22].mxu0  ;;  %3666 = vmatprep.subr.bf16.mxu1 %v3665_v38 }
 0x32a   : > { %v1948_v2 = vpop.f32.mrb[23].mxu0  ;;  %3668 = vmatpush3.bf16.msra.mxu1 %v3667_v27 }
 0x32b   : > { %v3669_v3 = vpack.c.bf16 %v3496_v43, %v1948_v2 }
 0x32d   : > { %v3499_v4 = vpop.f32.mrb[24].mxu0  ;;  %3670 = vmatprep.subr.bf16.mxu1 %v3669_v3 }
 0x32e   : > { %v1958_v45 = vpop.f32.mrb[25].mxu0  ;;  %3672 = vmatpush3.bf16.msra.mxu1 %v3671_v34 }
 0x32f   : > { %v3673_v46 = vpack.c.bf16 %v3499_v4, %v1958_v45 }
 0x331   : > { %v3502_v47 = vpop.f32.mrb[26].mxu0  ;;  %3674 = vmatprep.subr.bf16.mxu1 %v3673_v46 }
 0x332   : > { %v1968_v9 = vpop.f32.mrb[27].mxu0  ;;  %3676 = vmatpush3.bf16.msra.mxu1 %v3675_v42 }
 0x333   : > { %v3677_v10 = vpack.c.bf16 %v3502_v47, %v1968_v9 }
 0x335   : > { %v3505_v20 = vpop.f32.mrb[28].mxu0  ;;  %3678 = vmatprep.subr.bf16.mxu1 %v3677_v10 }
 0x336   : > { %v1978_v25 = vpop.f32.mrb[29].mxu0  ;;  %3680 = vmatpush3.bf16.msra.mxu1 %v3679_v49 }
 0x337   : > { %v3681_v26 = vpack.c.bf16 %v3505_v20, %v1978_v25 }
 0x339   : > { %v3508_v27 = vpop.f32.mrb[30].mxu0  ;;  %3682 = vmatprep.subr.bf16.mxu1 %v3681_v26 }
 0x33a   : > { %v1988_v32 = vpop.f32.mrb[31].mxu0  ;;  %3684 = vmatpush3.bf16.msra.mxu1 %v3683_v56 }
 0x33b   : > { %v3685_v33 = vpack.c.bf16 %v3508_v27, %v1988_v32 }
 0x33d   : > { %v3511_v34 = vpop.f32.mrb[32].mxu0  ;;  %3686 = vmatprep.subr.bf16.mxu1 %v3685_v33 }
 0x33e   : > { %v1998_v40 = vpop.f32.mrb[33].mxu0  ;;  %3688 = vmatpush3.bf16.msra.mxu1 %v3687_v63 }
 0x33f   : > { %v3691_v41 = vpack.c.bf16 %v3511_v34, %v1998_v40 }
 0x341   : > { %v3514_v42 = vpop.f32.mrb[34].mxu0  ;;  %3149 = vmatmul.mubr.msk.f32.vlgmr.msra.gmra.mrb[38].mxu1 %vm279_vm0, %v3889_v37  ;;  %vm4816_vm0 = vcmp.eq.s32.totalorder %v3985_v11, %v3997_v17 }
 0x342   : > { %v2008_v0 = vpop.f32.mrb[35].mxu0  ;;  %3150 = vmatprep.mubr.msk.f32.mxu1 %vm288_vm9, %v3889_v37 }
 0x343   : > { %v3695_v48 = vpack.c.bf16 %v3514_v42, %v2008_v0 }
 0x345   : > { %v3517_v49 = vpop.f32.mrb[36].mxu0  ;;  %3151 = vmatmul.mubr.msk.f32.gmra.mrb[40].mxu1 %vm287_vm8, %v3889_v37  ;;  %vm2781_vm8 = vcmask 261120  }
 0x346   : > { %v2018_v50 = vpop.f32.mrb[37].mxu0  ;;  %3152 = vmatprep.mubr.msk.f32.mxu1 %vm282_vm3, %v3889_v37  ;;  %vm4819_vm3 = vcmp.eq.s32.totalorder %v3958_v1, %v3999_v18 }
 0x347   : > { %v3699_v51 = vpack.c.bf16 %v3517_v49, %v2018_v50 }
 0x349   : > { %v3520_v52 = vpop.f32.mrb[38].mxu0 }
 0x34a   : > { %v2028_v53 = vpop.f32.mrb[39].mxu0 }
 0x34b   : > { %v3703_v54 = vpack.c.bf16 %v3520_v52, %v2028_v53 }
 0x34d   : > { %v3523_v55 = vpop.f32.mrb[40].mxu0 }
 0x34e   : > { %v2038_v13 = vpop.f32.mrb[41].mxu0 }
 0x34f   : > { %v3707_v56 = vpack.c.bf16 %v3523_v55, %v2038_v13 }
 0x351   : > { %v3526_v57 = vpop.f32.mrb[42].mxu0 }
 0x352   : > { %v2048_v58 = vpop.f32.mrb[43].mxu0 }
 0x353   : > { %v3711_v59 = vpack.c.bf16 %v3526_v57, %v2048_v58 }
 0x355   : > { %v3529_v60 = vpop.f32.mrb[44].mxu0 }
 0x356   : > { %v2058_v61 = vpop.f32.mrb[45].mxu0 }
 0x357   : > { %v3715_v12 = vpack.c.bf16 %v3529_v60, %v2058_v61 }
 0x359   : > { %v3532_v62 = vpop.f32.mrb[46].mxu0 }
 0x35a   : > { %v2068_v63 = vpop.f32.mrb[47].mxu0 }
 0x35b   : > { %v3719_v5 = vpack.c.bf16 %v3532_v62, %v2068_v63 }
 0x35d   : > { %v3535_v6 = vpop.f32.mrb[48].mxu0 }
 0x35e   : > { %v2078_v7 = vpop.f32.mrb[49].mxu0 }
 0x35f   : > { %v3689_v8 = vpack.c.bf16 %v3535_v6, %v2078_v7 }
 0x361   : > { %v3538_v21 = vpop.f32.mrb[50].mxu0  ;;  %3690 = vmatprep.subr.bf16.mxu1 %v3689_v8 }
 0x362   : > { %v2088_v22 = vpop.f32.mrb[51].mxu0  ;;  %3692 = vmatpush3.bf16.msra.mxu1 %v3691_v41 }
 0x363   : > { %v3693_v23 = vpack.c.bf16 %v3538_v21, %v2088_v22 }
 0x365   : > { %v3541_v24 = vpop.f32.mrb[52].mxu0  ;;  %3694 = vmatprep.subr.bf16.mxu1 %v3693_v23 }
 0x366   : > { %v2098_v28 = vpop.f32.mrb[53].mxu0  ;;  %3696 = vmatpush3.bf16.msra.mxu1 %v3695_v48 }
 0x367   : > { %v3697_v29 = vpack.c.bf16 %v3541_v24, %v2098_v28 }
 0x369   : > { %v3544_v30 = vpop.f32.mrb[54].mxu0  ;;  %3698 = vmatprep.subr.bf16.mxu1 %v3697_v29 }
 0x36a   : > { %v2108_v31 = vpop.f32.mrb[55].mxu0  ;;  %3700 = vmatpush3.bf16.msra.mxu1 %v3699_v51 }
 0x36b   : > { %v3701_v35 = vpack.c.bf16 %v3544_v30, %v2108_v31 }
 0x36d   : > { %v3547_v36 = vpop.f32.mrb[56].mxu0  ;;  %3702 = vmatprep.subr.bf16.mxu1 %v3701_v35 }
 0x36e   : > { %v2118_v39 = vpop.f32.mrb[57].mxu0  ;;  %3704 = vmatpush3.bf16.msra.mxu1 %v3703_v54 }
 0x36f   : > { %v3705_v44 = vpack.c.bf16 %v3547_v36, %v2118_v39 }
 0x371   : > { %v3550_v38 = vpop.f32.mrb[58].mxu0  ;;  %3706 = vmatprep.subr.bf16.mxu1 %v3705_v44 }
 0x372   : > { %v2128_v43 = vpop.f32.mrb[59].mxu0  ;;  %3708 = vmatpush3.bf16.msra.mxu1 %v3707_v56 }
 0x373   : > { %v3709_v2 = vpack.c.bf16 %v3550_v38, %v2128_v43 }
 0x375   : > { %v3553_v3 = vpop.f32.mrb[60].mxu0  ;;  %3710 = vmatprep.subr.bf16.mxu1 %v3709_v2 }
 0x376   : > { %v2138_v4 = vpop.f32.mrb[61].mxu0  ;;  %3712 = vmatpush3.bf16.msra.mxu1 %v3711_v59 }
 0x377   : > { %v3713_v45 = vpack.c.bf16 %v3553_v3, %v2138_v4 }
 0x379   : > { %v3556_v46 = vpop.f32.mrb[62].mxu0  ;;  %3714 = vmatprep.subr.bf16.mxu1 %v3713_v45 }
 0x37a   : > { %v2148_v47 = vpop.f32.mrb[63].mxu0  ;;  %3716 = vmatpush3.bf16.msra.mxu1 %v3715_v12 }
 0x37b   : > { %v3717_v9 = vpack.c.bf16 %v3556_v46, %v2148_v47 }
 0x37d   : > { %v3559_v10 = vpop.f32.mrb[64].mxu0  ;;  %3718 = vmatprep.subr.bf16.mxu1 %v3717_v9 }
 0x37e   : > { %v2158_v20 = vpop.f32.mrb[65].mxu0  ;;  %3720 = vmatpush3.bf16.msra.mxu1 %v3719_v5 }
 0x37f   : > { %v3723_v25 = vpack.c.bf16 %v3559_v10, %v2158_v20 }
 0x381   : > { %v3562_v26 = vpop.f32.mrb[66].mxu0  ;;  %3153 = vmatmul.mubr.msk.f32.vlgmr.msra.gmra.mrb[42].mxu1 %vm281_vm2, %v3889_v37  ;;  %vm4818_vm2 = vcmp.eq.s32.totalorder %v3958_v1, %v4001_v19 }
 0x382   : > { %v2168_v27 = vpop.f32.mrb[67].mxu0  ;;  %3154 = vmatprep.mubr.msk.f32.mxu1 %vm290_vm11, %v3889_v37 }
 0x383   : > { %v3727_v32 = vpack.c.bf16 %v3562_v26, %v2168_v27 }
 0x385   : > { %v3565_v33 = vpop.f32.mrb[68].mxu0  ;;  %3155 = vmatmul.mubr.msk.f32.gmra.mrb[44].mxu1 %vm289_vm10, %v3889_v37 }
 0x386   : > { %v2178_v34 = vpop.f32.mrb[69].mxu0  ;;  %3156 = vmatprep.mubr.msk.f32.mxu1 %vm284_vm5, %v3889_v37  ;;  %vm4821_vm5 = vcmp.eq.s32.totalorder %v3985_v11, %v3999_v18 }
 0x387   : > { %v3731_v40 = vpack.c.bf16 %v3565_v33, %v2178_v34 }
 0x389   : > { %v3568_v41 = vpop.f32.mrb[70].mxu0 }
 0x38a   : > { %v2188_v42 = vpop.f32.mrb[71].mxu0 }
 0x38b   : > { %v3735_v0 = vpack.c.bf16 %v3568_v41, %v2188_v42 }
 0x38d   : > { %v3571_v48 = vpop.f32.mrb[72].mxu0 }
 0x38e   : > { %v2198_v15 = vpop.f32.mrb[73].mxu0 }
 0x38f   : > { %v3739_v49 = vpack.c.bf16 %v3571_v48, %v2198_v15 }
 0x391   : > { %v4727_v50 = vpop.f32.mrb[74].mxu0  ;;  %v3598_v51 = vpop.f32.mrb[0].mxu1 }
 0x392   : > { %v2208_v52 = vpop.f32.mrb[75].mxu0  ;;  %v2288_v53 = vpop.f32.mrb[1].mxu1 }
 0x393   : > { %v3743_v14 = vpack.c.bf16 %v4727_v50, %v2208_v52  ;;  %v3741_v54 = vpack.c.bf16 %v3598_v51, %v2288_v53 }
 0x399   : > { %v3577_v55 = vpop.f32.mrb[76].mxu0  ;;  %v3601_v13 = vpop.f32.mrb[2].mxu1 }
 0x39a   : > { %v2218_v56 = vpop.f32.mrb[77].mxu0  ;;  %v2298_v57 = vpop.f32.mrb[3].mxu1 }
 0x39b   : > { %v3747_v58 = vpack.c.bf16 %v3577_v55, %v2218_v56  ;;  %v3745_v59 = vpack.c.bf16 %v3601_v13, %v2298_v57 }
 0x3a1   : > { %v3580_v60 = vpop.f32.mrb[78].mxu0  ;;  %v3604_v61 = vpop.f32.mrb[4].mxu1 }
 0x3a2   : > { %v2228_v12 = vpop.f32.mrb[79].mxu0  ;;  %v2308_v62 = vpop.f32.mrb[5].mxu1 }
 0x3a3   : > { %v3751_v63 = vpack.c.bf16 %v3580_v60, %v2228_v12  ;;  %v3749_v5 = vpack.c.bf16 %v3604_v61, %v2308_v62 }
 0x3a9   : > { %v3583_v6 = vpop.f32.mrb[80].mxu0  ;;  %v3607_v7 = vpop.f32.mrb[6].mxu1 }
 0x3aa   : > { %v2238_v8 = vpop.f32.mrb[81].mxu0  ;;  %v2318_v21 = vpop.f32.mrb[7].mxu1 }
 0x3ab   : > { %v3721_v22 = vpack.c.bf16 %v3583_v6, %v2238_v8  ;;  %v3755_v23 = vpack.c.bf16 %v3607_v7, %v2318_v21 }
 0x3ad   : > { %3722 = vmatprep.subr.bf16.mxu1 %v3721_v22 }
 0x3ae   : > { %3724 = vmatpush3.bf16.msra.mxu1 %v3723_v25 }
 0x3b1   : > { %v3586_v24 = vpop.f32.mrb[82].mxu0  ;;  %v3610_v28 = vpop.f32.mrb[8].mxu1 }
 0x3b2   : > { %v2248_v29 = vpop.f32.mrb[83].mxu0  ;;  %v2328_v30 = vpop.f32.mrb[9].mxu1 }
 0x3b3   : > { %v3725_v31 = vpack.c.bf16 %v3586_v24, %v2248_v29  ;;  %v3759_v35 = vpack.c.bf16 %v3610_v28, %v2328_v30 }
 0x3b5   : > { %3726 = vmatprep.subr.bf16.mxu1 %v3725_v31 }
 0x3b6   : > { %3728 = vmatpush3.bf16.msra.mxu1 %v3727_v32 }
 0x3b9   : > { %v3589_v36 = vpop.f32.mrb[84].mxu0  ;;  %v3613_v39 = vpop.f32.mrb[10].mxu1 }
 0x3ba   : > { %v2258_v44 = vpop.f32.mrb[85].mxu0  ;;  %v2338_v38 = vpop.f32.mrb[11].mxu1 }
 0x3bb   : > { %v3729_v43 = vpack.c.bf16 %v3589_v36, %v2258_v44  ;;  %v3763_v2 = vpack.c.bf16 %v3613_v39, %v2338_v38 }
 0x3bd   : > { %3730 = vmatprep.subr.bf16.mxu1 %v3729_v43 }
 0x3be   : > { %3732 = vmatpush3.bf16.msra.mxu1 %v3731_v40 }
 0x3c1   : > { %v3592_v3 = vpop.f32.mrb[86].mxu0  ;;  %v3616_v4 = vpop.f32.mrb[12].mxu1 }
 0x3c2   : > { %v2268_v45 = vpop.f32.mrb[87].mxu0  ;;  %v2348_v46 = vpop.f32.mrb[13].mxu1 }
 0x3c3   : > { %v3733_v47 = vpack.c.bf16 %v3592_v3, %v2268_v45  ;;  %v3767_v9 = vpack.c.bf16 %v3616_v4, %v2348_v46 }
 0x3c5   : > { %3734 = vmatprep.subr.bf16.mxu1 %v3733_v47 }
 0x3c6   : > { %3736 = vmatpush3.bf16.msra.mxu1 %v3735_v0 }
 0x3c9   : > { %v3595_v10 = vpop.f32.mrb[88].mxu0  ;;  %v3619_v20 = vpop.f32.mrb[14].mxu1 }
 0x3ca   : > { %v2278_v25 = vpop.f32.mrb[89].mxu0  ;;  %v2358_v26 = vpop.f32.mrb[15].mxu1 }
 0x3cb   : > { %v3737_v27 = vpack.c.bf16 %v3595_v10, %v2278_v25  ;;  %v3771_v32 = vpack.c.bf16 %v3619_v20, %v2358_v26  ;;  %v2477_v10 = vld [vmem:[%s4808_s5] sm:$0xff] }
 0x3cd   : > { %3738 = vmatprep.subr.bf16.mxu1 %v3737_v27 }
 0x3ce   : > { %v3622_v33 = vpop.f32.mrb[16].mxu1  ;;  %3740 = vmatpush3.bf16.msra.mxu1 %v3739_v49 }
 0x3cf   : > { %v2368_v34 = vpop.f32.mrb[17].mxu1  ;;  %3742 = vmatprep.subr.bf16.mxu1 %v3741_v54 }
 0x3d0   : > { %v3775_v40 = vpack.c.bf16 %v3622_v33, %v2368_v34  ;;  %v2478_v33 = vld [vmem:[%s4808_s5 + $0x8] sm:$0xff] }
 0x3d2   : > { %v3625_v41 = vpop.f32.mrb[18].mxu1  ;;  %3744 = vmatpush3.bf16.msra.mxu1 %v3743_v14 }
 0x3d3   : > { %v2378_v42 = vpop.f32.mrb[19].mxu1  ;;  %3746 = vmatprep.subr.bf16.mxu1 %v3745_v59 }
 0x3d4   : > { %v3779_v48 = vpack.c.bf16 %v3625_v41, %v2378_v42 }
 0x3d6   : > { %v3628_v15 = vpop.f32.mrb[20].mxu1  ;;  %3748 = vmatpush3.bf16.msra.mxu1 %v3747_v58 }
 0x3d7   : > { %v2388_v0 = vpop.f32.mrb[21].mxu1  ;;  %3750 = vmatprep.subr.bf16.mxu1 %v3749_v5 }
 0x3d8   : > { %v3783_v50 = vpack.c.bf16 %v3628_v15, %v2388_v0 }
 0x3da   : > { %v3631_v51 = vpop.f32.mrb[22].mxu1  ;;  %3752 = vmatpush3.bf16.msra.mxu1 %v3751_v63 }
 0x3db   : > { %v2398_v52 = vpop.f32.mrb[23].mxu1 }
 0x3dc   : > { %v3753_v53 = vpack.c.bf16 %v3631_v51, %v2398_v52 }
 0x3dd   : > { %3157 = vmatmul.mubr.msk.f32.vlgmr.msra.gmra.mrb[46].mxu1 %vm283_vm4, %v3889_v37  ;;  %vm4820_vm4 = vcmp.eq.s32.totalorder %v3985_v11, %v4001_v19 }
 0x3de   : > { %v3634_v49 = vpop.f32.mrb[24].mxu1  ;;  %3754 = vmatprep.subr.bf16.mxu1 %v3753_v53  ;;  %3158 = vmatprep.mubr.msk.f32.mxu1 %vm4816_vm0, %v3889_v37 }
 0x3df   : > { %v2408_v14 = vpop.f32.mrb[25].mxu1  ;;  %3756 = vmatpush3.bf16.msra.mxu1 %v3755_v23 }
 0x3e0   : > { %v3757_v54 = vpack.c.bf16 %v3634_v49, %v2408_v14 }
 0x3e1   : > { %3159 = vmatmul.mubr.msk.f32.gmra.mrb[48].mxu1 %vm4817_vm1, %v3889_v37 }
 0x3e2   : > { %v3637_v55 = vpop.f32.mrb[26].mxu1  ;;  %3758 = vmatprep.subr.bf16.mxu1 %v3757_v54  ;;  %3160 = vmatprep.mubr.msk.f32.mxu1 %vm4818_vm2, %v3889_v37 }
 0x3e3   : > { %v2418_v13 = vpop.f32.mrb[27].mxu1  ;;  %3760 = vmatpush3.bf16.msra.mxu1 %v3759_v35 }
 0x3e4   : > { %v3761_v56 = vpack.c.bf16 %v3637_v55, %v2418_v13 }
 0x3e6   : > { %v3640_v17 = vpop.f32.mrb[28].mxu1  ;;  %3762 = vmatprep.subr.bf16.mxu1 %v3761_v56 }
 0x3e7   : > { %v2428_v57 = vpop.f32.mrb[29].mxu1  ;;  %3764 = vmatpush3.bf16.msra.mxu1 %v3763_v2 }
 0x3e8   : > { %v3765_v58 = vpack.c.bf16 %v3640_v17, %v2428_v57 }
 0x3ea   : > { %v3643_v59 = vpop.f32.mrb[30].mxu1  ;;  %3766 = vmatprep.subr.bf16.mxu1 %v3765_v58 }
 0x3eb   : > { %v2438_v60 = vpop.f32.mrb[31].mxu1  ;;  %3768 = vmatpush3.bf16.msra.mxu1 %v3767_v9 }
 0x3ec   : > { %v3769_v16 = vpack.c.bf16 %v3643_v59, %v2438_v60 }
 0x3ee   : > { %v3646_v61 = vpop.f32.mrb[32].mxu1  ;;  %3770 = vmatprep.subr.bf16.mxu1 %v3769_v16 }
 0x3ef   : > { %v2448_v12 = vpop.f32.mrb[33].mxu1  ;;  %3772 = vmatpush3.bf16.msra.mxu1 %v3771_v32 }
 0x3f0   : > { %v3773_v62 = vpack.c.bf16 %v3646_v61, %v2448_v12 }
 0x3f2   : > { %v3649_v63 = vpop.f32.mrb[34].mxu1  ;;  %3774 = vmatprep.subr.bf16.mxu1 %v3773_v62 }
 0x3f3   : > { %v2458_v5 = vpop.f32.mrb[35].mxu1  ;;  %3776 = vmatpush3.bf16.msra.mxu1 %v3775_v40 }
 0x3f4   : > { %v3777_v6 = vpack.c.bf16 %v3649_v63, %v2458_v5 }
 0x3f6   : > { %v3652_v7 = vpop.f32.mrb[36].mxu1  ;;  %3778 = vmatprep.subr.bf16.mxu1 %v3777_v6 }
 0x3f7   : > { %v2468_v8 = vpop.f32.mrb[37].mxu1  ;;  %3780 = vmatpush3.bf16.msra.mxu1 %v3779_v48 }
 0x3f8   : > { %v3781_v21 = vpack.c.bf16 %v3652_v7, %v2468_v8 }
 0x3fa   : > { %3782 = vmatprep.subr.bf16.mxu1 %v3781_v21 }
 0x3fb   : > { %3784 = vmatpush3.bf16.msra.mxu1 %v3783_v50 }
 0x3fe   : > { %3161 = vmatmul.mubr.msk.f32.vlgmr.msra.gmra.mrb[50].mxu1 %vm4819_vm3, %v3889_v37 }
 0x3ff   : > { %3162 = vmatprep.mubr.msk.f32.mxu1 %vm4820_vm4, %v3889_v37 }
 0x402   : > { %3163 = vmatmul.mubr.msk.f32.gmra.mrb[52].mxu1 %vm4821_vm5, %v3889_v37 }
 0x414   : > { %v3332_v22 = vpop.f32.mrb[38].mxu1 }
 0x415   : > { %v3333_v23 = vpop.f32.mrb[39].mxu1 }
 0x416   : > { %v3334_v24 = vadd.f32 %v3333_v23, %v3332_v22 }
 0x418   : > { %v3335_v28 = vpop.f32.mrb[40].mxu1 }
 0x419   : > { %v3336_v29 = vpop.f32.mrb[41].mxu1 }
 0x41a   : > { %v3337_v30 = vadd.f32 %v3336_v29, %v3335_v28 }
 0x454   : > { %v3370_v31 = vpop.f32.mrb[42].mxu1 }
 0x455   : > { %v3371_v35 = vpop.f32.mrb[43].mxu1 }
 0x456   : > { %v3372_v1 = vadd.f32 %v3371_v35, %v3370_v31 }
 0x458   : > { %v2621_v36 = vadd.f32 %v3372_v1, %v3334_v24  ;;  %v3373_v39 = vpop.f32.mrb[44].mxu1 }
 0x459   : > { %v3374_v44 = vpop.f32.mrb[45].mxu1 }
 0x45a   : > { %v3375_v38 = vadd.f32 %v3374_v44, %v3373_v39 }
 0x45c   : > { %v2626_v19 = vadd.f32 %v3375_v38, %v3337_v30 }
 0x4b0   : > { %v3408_v43 = vpop.f32.mrb[46].mxu1 }
 0x4b1   : > { %v3409_v2 = vpop.f32.mrb[47].mxu1 }
 0x4b2   : > { %v3410_v3 = vadd.f32 %v3409_v2, %v3408_v43 }
 0x4b4   : > { %v2696_v4 = vadd.f32 %v3410_v3, %v2621_v36  ;;  %v3411_v11 = vpop.f32.mrb[48].mxu1 }
 0x4b5   : > { %v3412_v18 = vpop.f32.mrb[49].mxu1 }
 0x4b6   : > { %v3413_v37 = vadd.f32 %v3412_v18, %v3411_v11 }
 0x4b8   : > { %v2701_v45 = vadd.f32 %v3413_v37, %v2626_v19 }
 0x4d1   : > { %v3446_v46 = vpop.f32.mrb[50].mxu1 }
 0x4d2   : > { %v3447_v47 = vpop.f32.mrb[51].mxu1 }
 0x4d3   : > { %v3448_v9 = vadd.f32 %v3447_v47, %v3446_v46 }
 0x4d5   : > { %v2771_v20 = vadd.f32 %v3448_v9, %v2696_v4  ;;  %v3449_v25 = vpop.f32.mrb[52].mxu1 }
 0x4d6   : > { %v3450_v26 = vpop.f32.mrb[53].mxu1 }
 0x4d7   : > { %v2779_v27 = vadd.f32 %v2771_v20, %v2477_v10  ;;  %v3451_v32 = vadd.f32 %v3450_v26, %v3449_v25 }
 0x4d9   : > { %2782 = vst.msk [vmem:[%s4808_s5] sm:$0xff] %vm2781_vm8, %v2779_v27  ;;  %v2776_v34 = vadd.f32 %v3451_v32, %v2701_v45 }
 0x4db   : > { %v2780_v40 = vadd.f32 %v2776_v34, %v2478_v33 }
 0x4dd   : > { %2783 = vst.msk [vmem:[%s4808_s5 + $0x8] sm:$0xff] %vm2781_vm8, %v2780_v40 }
 0x4de PF: > { %p2784_p0 = scmp.eq.s32.totalorder %s3865_s18, 1 }
 0x4e0   : > { %p2785_p1 = pnand %p2784_p0, %p364_p11 }
 0x4e1   : > { %v2789_v41 = vld [vmem:[#allocation3] sm:$0xff] (!%p2785_p1)  ;;  %v3890_v42 = vmov (!%p2785_p1), 0   ;;  %v2790_v48 = vld [vmem:[#allocation3 + $0x8] sm:$0xff] (!%p2785_p1)  ;;  %v2791_v15 = vld [vmem:[%s4808_s5] sm:$0xff] (!%p2785_p1)  ;;  %vm2814_vm9 = vcmask (!%p2785_p1), 261120  }
 0x4e2   : > { %2788 = sbr.rel (%p2785_p1) target bundleno = 1388 (0x56c), region = 60  ;;  %3842 = vset.pattern.permute.xlu0 (!%p2785_p1), %v3890_v42  ;;  %v3164_v0 = vld [vmem:[%s4807_s4] ss:$0 sm:$0xff] (!%p2785_p1) }
 0x4e3   : > { %2795 = vperm.xlu0 (!%p2785_p1), %3842, %v2789_v41  }
 0x4e4   : > { %v2792_v52 = vld [vmem:[%s4808_s5 + $0x8] sm:$0xff] (!%p2785_p1) }
 0x4e7   : > { %2800 = vperm.xlu0 (!%p2785_p1), %3842, %v2790_v48  }
 0x562   : > { %v2796_v50 = vpop.permute.xlu0 %2795 }
 0x563   : > { %v2803_v51 = vmul.f32 %v2796_v50, %v2791_v15 }
 0x565   : > { %v2812_v53 = vadd.f32 %v3164_v0, %v2803_v51 }
 0x566   : > { %v2801_v49 = vpop.permute.xlu0 %2800 }
 0x567   : > { %2815 = vst.msk [vmem:[%s4808_s5] sm:$0xff] %vm2814_vm9, %v2812_v53  ;;  %v2804_v14 = vmul.f32 %v2801_v49, %v2792_v52 }
 0x569   : > { %v2813_v54 = vadd.f32 %v3164_v0, %v2804_v14 }
 0x56b   : > { %2816 = vst.msk [vmem:[%s4808_s5 + $0x8] sm:$0xff] %vm2814_vm9, %v2813_v54 }
 0x56c PF: > { %s15_s22 = sadd.s32 1, %s3881_s22   ;;  %s4822_s18 = smov %s3873_s20 }
 0x56d   : > { %p12_p2 = scmp.ge.s32.totalorder %s15_s22, 6   ;;  %s4823_s19 = smov %s3877_s21 }
 0x56e   : > { %s4824_s20 = smov %s4827_s23  ;;  %s4825_s21 = smov %s4831_s24 }
 0x56f   :  { %14 = sbr.rel (!%p12_p2) target bundleno = 3 (0x3), region = 89 }

// kernel: gnn_autoencoder_forward.3
= control target key start
LH: loop header
LB: loop body
LE: loop exit
PB: predicated region body
PF: predicated region fallthrough
CT: control target
= control target key end

     0   :  { %s3789_s27 = smov 0   ;;  %s4740_s0 = inlined_call_operand.vmem [shape: s32[2048,1], index: 0, kind: input, shape index: {}]   ;;  %s4741_s1 = inlined_call_operand.vmem [shape: s32[1,2048], index: 1, kind: input, shape index: {}]   ;;  %s4742_s2 = inlined_call_operand.vmem [shape: f32[16,32], index: 2, kind: input, shape index: {}]   ;;  %s4743_s3 = inlined_call_operand.vmem [shape: f32[32,32], index: 3, kind: input, shape index: {}]   ;;  %s4744_s4 = inlined_call_operand.vmem [shape: f32[32,16], index: 4, kind: input, shape index: {}]   ;;  %s4745_s5 = inlined_call_operand.vmem [shape: f32[16,32], index: 5, kind: input, shape index: {}]   ;;  %s4746_s6 = inlined_call_operand.vmem [shape: f32[32,8], index: 6, kind: input, shape index: {}]   ;;  %s4747_s7 = inlined_call_operand.vmem [shape: f32[2048,16], index: 7, kind: output, shape index: {0}]   ;;  %s4748_s8 = inlined_call_operand.vmem [shape: f32[16,8], index: 8, kind: output, shape index: {1}]  }
   0x1 LB: > { %s3795_s28 = sadd.s32 4294967295, %s3738_s27   ;;  %p3005_p0 = scmp.ge.s32.totalorder %s3738_s27, 1  ;;  %s3738_s27 = sphi %s3789_s27, %s19_s27  }
   0x2   : > { %p271_p1 = scmp.lt.s32.totalorder %s3738_s27, 3 }
   0x4   : > { %p272_p2 = pnand %p3005_p0, %p271_p1 }
   0x5   : > { %s3006_s29 = sshll.u32 (!%p272_p2), %s3795_s28, 7  ;;  %s3008_s30 = sshll.u32 (!%p272_p2), %s3795_s28, 3 }
   0x6   : > { %275 = sbr.rel (%p272_p2) target bundleno = 1497 (0x5d9), region = 48  ;;  %p310_p3 = scmp.lt.s32.totalorder (!%p272_p2), %s3006_s29, 255 }
   0x7   : > { %p316_p4 = scmp.lt.s32.totalorder (!%p272_p2), %s3008_s30, 15  ;;  %p3011_p5 = scmp.ne.s32.totalorder (!%p272_p2), %s3795_s28, 0 }
   0xd   : > { %s4750_s29 = smov (!%p310_p3, %s3006_s29), 255  ;;  %s4752_s30 = smov (!%p316_p4, %s3008_s30), 15 }
   0xe   : > { %s3007_s9 = sshll.u32 %s4750_s29, 3  ;;  %s318_s15 = scalar_lea.vmem %s4741_s1, %s4752_s30  ;;  %v332_v0 = vld [vmem:[%s4743_s3] sm:$0xff] (!%p3011_p5)  ;;  %v333_v1 = vld [vmem:[%s4743_s3 + $0x8] sm:$0xff] (!%p3011_p5)  ;;  %v334_v2 = vld [vmem:[%s4743_s3 + $0x10] sm:$0xff] (!%p3011_p5)  ;;  %vm336_vm0 = vcmask (!%p3011_p5), 261120   ;;  %vm503_vm1 = vcmask (!%p3011_p5), 130048  }
   0xf   : > { %s3806_s12 = scalar_lea.vmem %s4740_s0, %s3007_s9  ;;  %s3815_s18 = scalar_lea.vmem %s4747_s7, %s3007_s9  ;;  %v3683_v3 = vpack.c.bf16 (!%p3011_p5), %v333_v1, %v332_v0  ;;  %v335_v4 = vld [vmem:[%s4743_s3 + $0x18] sm:$0xff] (!%p3011_p5)  ;;  %v330_v5 = vld [vmem:[%s4742_s2] sm:$0xff] (!%p3011_p5)  ;;  %v419_v8 = vld [vmem:[%s4744_s4 + $0x8] sm:$0xff] (!%p3011_p5)  ;;  %vm591_vm2 = vcmask (!%p3011_p5), 7168   ;;  %v3740_v21 = vmov (!%p3011_p5), 0.0  }
  0x10   : > { %329 = sbr.rel (%p3011_p5) target bundleno = 667 (0x29b), region = 52  ;;  %v3687_v6 = vpack.c.bf16 (!%p3011_p5), %v335_v4, %v334_v2  ;;  %3455 = vmatprep.mubr.msk.f32.mxu0 (!%p3011_p5), %vm336_vm0, %v330_v5  ;;  %v418_v7 = vld [vmem:[%s4744_s4] sm:$0xff] (!%p3011_p5)  ;;  %v420_v9 = vld [vmem:[%s4744_s4 + $0x10] sm:$0xff] (!%p3011_p5)  ;;  %v421_v11 = vld [vmem:[%s4744_s4 + $0x18] sm:$0xff] (!%p3011_p5)  ;;  %592 = vst.msk [vmem:[#allocation4] sm:$0xff] (!%p3011_p5), %vm591_vm2, %v3740_v21 }
  0x11   : > { %3684 = vmatprep.subr.bf16.mxu0 (!%p3011_p5), %v3683_v3  ;;  %v3691_v10 = vpack.c.bf16 (!%p3011_p5), %v419_v8, %v418_v7  ;;  %v3695_v12 = vpack.c.bf16 (!%p3011_p5), %v421_v11, %v420_v9  ;;  %v331_v13 = vld [vmem:[%s4742_s2 + $0x8] sm:$0xff] (!%p3011_p5)  ;;  %v506_v14 = vld [vmem:[%s4745_s5] sm:$0xff] (!%p3011_p5)  ;;  %593 = vst.msk [vmem:[#allocation4 + $0x8] sm:$0xff] (!%p3011_p5), %vm591_vm2, %v3740_v21 }
  0x12   : > { %3686 = vmatpush3.bf16.msra.mxu0 (!%p3011_p5), %v3683_v3  ;;  %v507_v15 = vld [vmem:[%s4745_s5 + $0x8] sm:$0xff] (!%p3011_p5) }
  0x13   : > { %3688 = vmatprep.subr.bf16.mxu0 (!%p3011_p5), %v3687_v6  ;;  %3692 = vmatprep.subr.bf16.mxu1 (!%p3011_p5), %v3691_v10  ;;  %v3699_v16 = vpack.c.bf16 (!%p3011_p5), %v507_v15, %v506_v14 }
  0x14   : > { %3694 = vmatpush3.bf16.msra.mxu1 (!%p3011_p5), %v3691_v10 }
  0x15   : > { %3696 = vmatprep.subr.bf16.mxu1 (!%p3011_p5), %v3695_v12 }
  0x16   : > { %3690 = vmatpush3.bf16.msra.mxu0 (!%p3011_p5), %v3687_v6 }
  0x17   : > { %3700 = vmatprep.subr.bf16.mxu0 %v3699_v16 }
  0x18   : > { %3698 = vmatpush3.bf16.msra.mxu1 %v3695_v12 }
  0x19   : > { %3456 = vmatmul.mubr.msk.f32.vlgmr.msra.gmra.mrb[0].mxu0 %vm336_vm0, %v331_v13 }
  0x1a   : > { %3702 = vmatpush3.bf16.msra.mxu0 %v3699_v16 }
  0xec   : > { %v3457_v17 = vpop.f32.mrb[0].mxu0 }
  0xed   : > { %v409_v18 = vpop.f32.mrb[1].mxu0 }
  0xee   : > { %3466 = vmatprep.mubr.msk.f32.mxu1 %vm336_vm0, %v409_v18 }
  0xef   : > { %3467 = vmatmul.mubr.msk.f32.vlgmr.msra.gmra.mrb[0].mxu1 %vm336_vm0, %v3457_v17 }
 0x1c2   : > { %v3468_v19 = vpop.f32.mrb[0].mxu1 }
 0x1c3   : > { %505 = vst.msk [vmem:[#allocation2 + $0x8] sm:$0xff] %vm503_vm1, %v3468_v19  ;;  %v494_v20 = vpop.f32.mrb[1].mxu1 }
 0x1c4   : > { %504 = vst.msk [vmem:[#allocation2] sm:$0xff] %vm503_vm1, %v494_v20  ;;  %3473 = vmatprep.mubr.msk.f32.mxu0 %vm503_vm1, %v494_v20 }
 0x1c5   : > { %3474 = vmatmul.mubr.msk.f32.vlgmr.msra.gmra.mrb[2].mxu0 %vm503_vm1, %v3468_v19 }
 0x298   : > { %v3475_v22 = vpop.f32.mrb[2].mxu0 }
 0x299   : > { %590 = vst.msk [vmem:[#allocation3 + $0x8] sm:$0xff] %vm336_vm0, %v3475_v22  ;;  %v580_v23 = vpop.f32.mrb[3].mxu0 }
 0x29a   : > { %589 = vst.msk [vmem:[#allocation3] sm:$0xff] %vm336_vm0, %v580_v23 }
 0x29b PF: > { %v596_v24 = vld [vmem:[%s3806_s12 + $0x10] sm:$0xff]  ;;  %v594_v25 = vld [vmem:[%s3806_s12] sm:$0xff]  ;;  %v3741_v26 = vmov 0   ;;  %v597_v27 = vld [vmem:[%s3806_s12 + $0x18] sm:$0xff]  ;;  %vm1494_vm3 = vcmask 130048   ;;  %p3290_p6 = scmp.ne.s32.totalorder %s3795_s28, 1 }
 0x29c   : > { %3730 = vset.pattern.permute.xlu1 %v3741_v26  ;;  %3729 = vset.pattern.permute.xlu0 %v3741_v26  ;;  %v595_v28 = vld [vmem:[%s3806_s12 + $0x8] sm:$0xff]  ;;  %v598_v30 = vld [vmem:[%s3806_s12 + $0x20] sm:$0xff]  ;;  %v601_v31 = vld [vmem:[%s3806_s12 + $0x38] sm:$0xff]  ;;  %v722_v26 = vlaneseq }
 0x29d   : > { %731 = vperm.xlu1 %3730, %v596_v24   ;;  %725 = vperm.xlu0 %3729, %v594_v25   ;;  %v599_v29 = vld [vmem:[%s3806_s12 + $0x28] sm:$0xff]  ;;  %v600_v32 = vld [vmem:[%s3806_s12 + $0x30] sm:$0xff]  ;;  %v602_v34 = vld [vmem:[%s3806_s12 + $0x40] sm:$0xff] }
 0x29e   : > { %v603_v33 = vld [vmem:[%s3806_s12 + $0x48] sm:$0xff]  ;;  %v605_v35 = vld [vmem:[%s3806_s12 + $0x58] sm:$0xff]  ;;  %v604_v36 = vld [vmem:[%s3806_s12 + $0x50] sm:$0xff] }
 0x29f   : > { %v1492_v37 = vld [vmem:[#allocation2] sm:$0xff]  ;;  %v1493_v38 = vld [vmem:[#allocation2 + $0x8] sm:$0xff]  ;;  %v609_v42 = vld [vmem:[%s3806_s12 + $0x78] sm:$0xff] }
 0x2a0   : > { %v607_v39 = vld [vmem:[%s3806_s12 + $0x68] sm:$0xff]  ;;  %v606_v40 = vld [vmem:[%s3806_s12 + $0x60] sm:$0xff]  ;;  %v3703_v41 = vpack.c.bf16 %v1493_v38, %v1492_v37  ;;  %v608_v43 = vld [vmem:[%s3806_s12 + $0x70] sm:$0xff] }
 0x2a1   : > { %734 = vperm.xlu1 %3730, %v597_v27   ;;  %728 = vperm.xlu0 %3729, %v595_v28   ;;  %v611_v44 = vld [vmem:[%s3806_s12 + $0x88] sm:$0xff]  ;;  %v610_v45 = vld [vmem:[%s3806_s12 + $0x80] sm:$0xff]  ;;  %v613_v46 = vld [vmem:[%s3806_s12 + $0x98] sm:$0xff] }
 0x2a2   : > { %3704 = vmatprep.subr.bf16.mxu0 %v3703_v41  ;;  %3715 = vmatprep.subr.bf16.mxu1 %v3703_v41  ;;  %v612_v47 = vld [vmem:[%s3806_s12 + $0x90] sm:$0xff]  ;;  %v615_v48 = vld [vmem:[%s3806_s12 + $0xa8] sm:$0xff]  ;;  %v614_v49 = vld [vmem:[%s3806_s12 + $0xa0] sm:$0xff] }
 0x2a3   : > { %3706 = vmatpush3.bf16.msra.mxu0 %v3703_v41  ;;  %3716 = vmatpush3.bf16.msra.mxu1 %v3703_v41  ;;  %v617_v50 = vld [vmem:[%s3806_s12 + $0xb8] sm:$0xff]  ;;  %v616_v51 = vld [vmem:[%s3806_s12 + $0xb0] sm:$0xff]  ;;  %v619_v52 = vld [vmem:[%s3806_s12 + $0xc8] sm:$0xff] }
 0x2a4   : > { %v618_v53 = vld [vmem:[%s3806_s12 + $0xc0] sm:$0xff]  ;;  %v621_v54 = vld [vmem:[%s3806_s12 + $0xd8] sm:$0xff]  ;;  %v620_v55 = vld [vmem:[%s3806_s12 + $0xd0] sm:$0xff] }
 0x2a5   : > { %740 = vperm.xlu1 %3730, %v599_v29   ;;  %737 = vperm.xlu0 %3729, %v598_v30   ;;  %v623_v56 = vld [vmem:[%s3806_s12 + $0xe8] sm:$0xff]  ;;  %v622_v57 = vld [vmem:[%s3806_s12 + $0xe0] sm:$0xff]  ;;  %v625_v58 = vld [vmem:[%s3806_s12 + $0xf8] sm:$0xff]  ;;  %v3925_v29 = vand.u32 127, %v722_v26 }
 0x2a6   : > { %v624_v59 = vld [vmem:[%s3806_s12 + $0xf0] sm:$0xff]  ;;  %v659_v60 = vld [vmem:[%s3806_s12 + $0x208] sm:$0xff]  ;;  %v658_v61 = vld [vmem:[%s3806_s12 + $0x200] sm:$0xff] }
 0x2a7   : > { %v661_v62 = vld [vmem:[%s3806_s12 + $0x218] sm:$0xff]  ;;  %v660_v63 = vld [vmem:[%s3806_s12 + $0x210] sm:$0xff]  ;;  %v663_v0 = vld [vmem:[%s3806_s12 + $0x228] sm:$0xff] }
 0x2a8   : > { %v662_v1 = vld [vmem:[%s3806_s12 + $0x220] sm:$0xff]  ;;  %v665_v2 = vld [vmem:[%s3806_s12 + $0x238] sm:$0xff]  ;;  %v664_v3 = vld [vmem:[%s3806_s12 + $0x230] sm:$0xff] }
 0x2a9   : > { %746 = vperm.xlu1 %3730, %v601_v31   ;;  %743 = vperm.xlu0 %3729, %v600_v32   ;;  %v667_v4 = vld [vmem:[%s3806_s12 + $0x248] sm:$0xff]  ;;  %v666_v5 = vld [vmem:[%s3806_s12 + $0x240] sm:$0xff]  ;;  %v669_v6 = vld [vmem:[%s3806_s12 + $0x258] sm:$0xff] }
 0x2aa   : > { %v668_v7 = vld [vmem:[%s3806_s12 + $0x250] sm:$0xff]  ;;  %v671_v8 = vld [vmem:[%s3806_s12 + $0x268] sm:$0xff]  ;;  %v670_v9 = vld [vmem:[%s3806_s12 + $0x260] sm:$0xff] }
 0x2ab   : > { %v673_v10 = vld [vmem:[%s3806_s12 + $0x278] sm:$0xff]  ;;  %v672_v11 = vld [vmem:[%s3806_s12 + $0x270] sm:$0xff]  ;;  %v675_v12 = vld [vmem:[%s3806_s12 + $0x288] sm:$0xff] }
 0x2ac   : > { %v674_v13 = vld [vmem:[%s3806_s12 + $0x280] sm:$0xff]  ;;  %v677_v14 = vld [vmem:[%s3806_s12 + $0x298] sm:$0xff]  ;;  %v676_v15 = vld [vmem:[%s3806_s12 + $0x290] sm:$0xff] }
 0x2ad   : > { %752 = vperm.xlu1 %3730, %v603_v33   ;;  %749 = vperm.xlu0 %3729, %v602_v34   ;;  %v679_v16 = vld [vmem:[%s3806_s12 + $0x2a8] sm:$0xff]  ;;  %v678_v17 = vld [vmem:[%s3806_s12 + $0x2a0] sm:$0xff]  ;;  %v681_v18 = vld [vmem:[%s3806_s12 + $0x2b8] sm:$0xff]  ;;  %v3742_v34 = vmov 0.0  }
 0x2ae   : > { %v680_v19 = vld [vmem:[%s3806_s12 + $0x2b0] sm:$0xff]  ;;  %v683_v20 = vld [vmem:[%s3806_s12 + $0x2c8] sm:$0xff]  ;;  %v682_v21 = vld [vmem:[%s3806_s12 + $0x2c0] sm:$0xff] }
 0x2af   : > { %v685_v22 = vld [vmem:[%s3806_s12 + $0x2d8] sm:$0xff]  ;;  %v684_v23 = vld [vmem:[%s3806_s12 + $0x2d0] sm:$0xff]  ;;  %v687_v24 = vld [vmem:[%s3806_s12 + $0x2e8] sm:$0xff] }
 0x2b0   : > { %v686_v25 = vld [vmem:[%s3806_s12 + $0x2e0] sm:$0xff]  ;;  %v689_v27 = vld [vmem:[%s3806_s12 + $0x2f8] sm:$0xff]  ;;  %v688_v28 = vld [vmem:[%s3806_s12 + $0x2f0] sm:$0xff] }
 0x2b1   : > { %758 = vperm.xlu1 %3730, %v605_v35   ;;  %755 = vperm.xlu0 %3729, %v604_v36   ;;  %v690_v30 = vld [vmem:[%s3806_s12 + $0x300] sm:$0xff]  ;;  %v691_v36 = vld [vmem:[%s3806_s12 + $0x308] sm:$0xff]  ;;  %v692_v41 = vld [vmem:[%s3806_s12 + $0x310] sm:$0xff] }
 0x2b2   : > { %v626_v31 = vld [vmem:[%s3806_s12 + $0x100] sm:$0xff]  ;;  %v627_v37 = vld [vmem:[%s3806_s12 + $0x108] sm:$0xff] }
 0x2b5   : > { %764 = vperm.xlu1 %3730, %v607_v39   ;;  %761 = vperm.xlu0 %3729, %v606_v40  }
 0x2b9   : > { %770 = vperm.xlu1 %3730, %v609_v42   ;;  %767 = vperm.xlu0 %3729, %v608_v43   ;;  %v628_v42 = vld [vmem:[%s3806_s12 + $0x110] sm:$0xff] }
 0x2bd   : > { %776 = vperm.xlu1 %3730, %v611_v44   ;;  %773 = vperm.xlu0 %3729, %v610_v45  }
 0x2c1   : > { %782 = vperm.xlu1 %3730, %v613_v46   ;;  %779 = vperm.xlu0 %3729, %v612_v47  }
 0x2c5   : > { %788 = vperm.xlu1 %3730, %v615_v48   ;;  %785 = vperm.xlu0 %3729, %v614_v49   ;;  %v693_v48 = vld [vmem:[%s3806_s12 + $0x318] sm:$0xff] }
 0x2c6   : > { %v629_v49 = vld [vmem:[%s3806_s12 + $0x118] sm:$0xff] }
 0x2c9   : > { %794 = vperm.xlu1 %3730, %v617_v50   ;;  %791 = vperm.xlu0 %3729, %v616_v51  }
 0x2cd   : > { %800 = vperm.xlu1 %3730, %v619_v52   ;;  %797 = vperm.xlu0 %3729, %v618_v53  }
 0x2d1   : > { %806 = vperm.xlu1 %3730, %v621_v54   ;;  %803 = vperm.xlu0 %3729, %v620_v55   ;;  %v694_v54 = vld [vmem:[%s3806_s12 + $0x320] sm:$0xff] }
 0x2d2   : > { %v630_v55 = vld [vmem:[%s3806_s12 + $0x120] sm:$0xff] }
 0x2d5   : > { %812 = vperm.xlu1 %3730, %v623_v56   ;;  %809 = vperm.xlu0 %3729, %v622_v57  }
 0x2d9   : > { %818 = vperm.xlu1 %3730, %v625_v58   ;;  %815 = vperm.xlu0 %3729, %v624_v59  }
 0x2dd   : > { %920 = vperm.xlu1 %3730, %v659_v60   ;;  %917 = vperm.xlu0 %3729, %v658_v61   ;;  %v695_v60 = vld [vmem:[%s3806_s12 + $0x328] sm:$0xff] }
 0x2de   : > { %v631_v61 = vld [vmem:[%s3806_s12 + $0x128] sm:$0xff] }
 0x2e1   : > { %926 = vperm.xlu1 %3730, %v661_v62   ;;  %923 = vperm.xlu0 %3729, %v660_v63  }
 0x2e5   : > { %932 = vperm.xlu1 %3730, %v663_v0   ;;  %929 = vperm.xlu0 %3729, %v662_v1  }
 0x2e9   : > { %938 = vperm.xlu1 %3730, %v665_v2   ;;  %935 = vperm.xlu0 %3729, %v664_v3   ;;  %v696_v2 = vld [vmem:[%s3806_s12 + $0x330] sm:$0xff] }
 0x2ea   : > { %v632_v3 = vld [vmem:[%s3806_s12 + $0x130] sm:$0xff] }
 0x2ed   : > { %944 = vperm.xlu1 %3730, %v667_v4   ;;  %941 = vperm.xlu0 %3729, %v666_v5  }
 0x2f1   : > { %950 = vperm.xlu1 %3730, %v669_v6   ;;  %947 = vperm.xlu0 %3729, %v668_v7  }
 0x2f5   : > { %956 = vperm.xlu1 %3730, %v671_v8   ;;  %953 = vperm.xlu0 %3729, %v670_v9   ;;  %v697_v8 = vld [vmem:[%s3806_s12 + $0x338] sm:$0xff] }
 0x2f6   : > { %v633_v9 = vld [vmem:[%s3806_s12 + $0x138] sm:$0xff] }
 0x2f9   : > { %962 = vperm.xlu1 %3730, %v673_v10   ;;  %959 = vperm.xlu0 %3729, %v672_v11  }
 0x2fd   : > { %968 = vperm.xlu1 %3730, %v675_v12   ;;  %965 = vperm.xlu0 %3729, %v674_v13  }
 0x301   : > { %974 = vperm.xlu1 %3730, %v677_v14   ;;  %971 = vperm.xlu0 %3729, %v676_v15   ;;  %v698_v14 = vld [vmem:[%s3806_s12 + $0x340] sm:$0xff] }
 0x302   : > { %v634_v15 = vld [vmem:[%s3806_s12 + $0x140] sm:$0xff] }
 0x305   : > { %980 = vperm.xlu1 %3730, %v679_v16   ;;  %977 = vperm.xlu0 %3729, %v678_v17  }
 0x309   : > { %986 = vperm.xlu1 %3730, %v681_v18   ;;  %983 = vperm.xlu0 %3729, %v680_v19  }
 0x30d   : > { %992 = vperm.xlu1 %3730, %v683_v20   ;;  %989 = vperm.xlu0 %3729, %v682_v21   ;;  %v699_v20 = vld [vmem:[%s3806_s12 + $0x348] sm:$0xff] }
 0x30e   : > { %v635_v21 = vld [vmem:[%s3806_s12 + $0x148] sm:$0xff] }
 0x311   : > { %998 = vperm.xlu1 %3730, %v685_v22   ;;  %995 = vperm.xlu0 %3729, %v684_v23  }
 0x315   : > { %1004 = vperm.xlu1 %3730, %v687_v24   ;;  %1001 = vperm.xlu0 %3729, %v686_v25  }
 0x319   : > { %1010 = vperm.xlu1 %3730, %v689_v27   ;;  %1007 = vperm.xlu0 %3729, %v688_v28   ;;  %v700_v27 = vld [vmem:[%s3806_s12 + $0x350] sm:$0xff] }
 0x31a   : > { %v636_v28 = vld [vmem:[%s3806_s12 + $0x150] sm:$0xff] }
 0x31c   : > { %v732_v32 = vpop.permute.xlu1 %731  ;;  %v726_v33 = vpop.permute.xlu0 %725 }
 0x31d   : > { %1013 = vperm.xlu1 %3730, %v690_v30   ;;  %821 = vperm.xlu0 %3729, %v626_v31   ;;  %vm1108_vm4 = vcmp.eq.s32.totalorder %v3925_v29, %v726_v33  ;;  %vm1110_vm5 = vcmp.eq.s32.totalorder %v3925_v29, %v732_v32 }
 0x31e   : > { %v3018_v35 = vsel %vm1108_vm4, 1.0, %v3742_v34  ;;  %v3020_v43 = vsel %vm1110_vm5, 1.0, %v3742_v34 }
 0x31f   : > { %3480 = vmatprep.mubr.msk.f32.mxu0 %vm1494_vm3, %v3018_v35  ;;  %v701_v35 = vld [vmem:[%s3806_s12 + $0x358] sm:$0xff] }
 0x320   : > { %v735_v38 = vpop.permute.xlu1 %734  ;;  %v729_v39 = vpop.permute.xlu0 %728 }
 0x321   : > { %vm1109_vm6 = vcmp.eq.s32.totalorder %v3925_v29, %v729_v39  ;;  %1016 = vperm.xlu1 %3730, %v691_v36   ;;  %824 = vperm.xlu0 %3729, %v627_v37   ;;  %vm1111_vm7 = vcmp.eq.s32.totalorder %v3925_v29, %v735_v38  ;;  %v637_v36 = vld [vmem:[%s3806_s12 + $0x158] sm:$0xff] }
 0x322   : > { %v3019_v40 = vsel %vm1109_vm6, 1.0, %v3742_v34  ;;  %v3021_v46 = vsel %vm1111_vm7, 1.0, %v3742_v34 }
 0x323   : > { %3481 = vmatmul.mubr.msk.f32.vlgmr.msra.gmra.mrb[0].mxu0 %vm1494_vm3, %v3019_v40 }
 0x324   : > { %v741_v44 = vpop.permute.xlu1 %740  ;;  %3483 = vmatprep.mubr.msk.f32.mxu0 %vm1494_vm3, %v3020_v43  ;;  %v738_v45 = vpop.permute.xlu0 %737 }
 0x325   : > { %vm1112_vm8 = vcmp.eq.s32.totalorder %v3925_v29, %v738_v45  ;;  %1019 = vperm.xlu1 %3730, %v692_v41   ;;  %827 = vperm.xlu0 %3729, %v628_v42   ;;  %vm1113_vm9 = vcmp.eq.s32.totalorder %v3925_v29, %v741_v44  ;;  %v702_v41 = vld [vmem:[%s3806_s12 + $0x360] sm:$0xff] }
 0x326   : > { %v3022_v47 = vsel %vm1112_vm8, 1.0, %v3742_v34  ;;  %v3023_v52 = vsel %vm1113_vm9, 1.0, %v3742_v34  ;;  %v638_v42 = vld [vmem:[%s3806_s12 + $0x160] sm:$0xff] }
 0x327   : > { %3484 = vmatmul.mubr.msk.f32.gmra.mrb[2].mxu0 %vm1494_vm3, %v3021_v46 }
 0x328   : > { %v747_v50 = vpop.permute.xlu1 %746  ;;  %3486 = vmatprep.mubr.msk.f32.mxu0 %vm1494_vm3, %v3022_v47  ;;  %v744_v51 = vpop.permute.xlu0 %743  ;;  %v703_v47 = vld [vmem:[%s3806_s12 + $0x368] sm:$0xff] }
 0x329   : > { %vm1114_vm10 = vcmp.eq.s32.totalorder %v3925_v29, %v744_v51  ;;  %1022 = vperm.xlu1 %3730, %v693_v48   ;;  %830 = vperm.xlu0 %3729, %v629_v49   ;;  %vm1115_vm11 = vcmp.eq.s32.totalorder %v3925_v29, %v747_v50  ;;  %v639_v48 = vld [vmem:[%s3806_s12 + $0x168] sm:$0xff] }
 0x32a   : > { %v3024_v53 = vsel %vm1114_vm10, 1.0, %v3742_v34  ;;  %v3025_v58 = vsel %vm1115_vm11, 1.0, %v3742_v34 }
 0x32b   : > { %3487 = vmatmul.mubr.msk.f32.gmra.mrb[4].mxu0 %vm1494_vm3, %v3023_v52 }
 0x32c   : > { %v753_v56 = vpop.permute.xlu1 %752  ;;  %3489 = vmatprep.mubr.msk.f32.mxu0 %vm1494_vm3, %v3024_v53  ;;  %v750_v57 = vpop.permute.xlu0 %749  ;;  %v704_v53 = vld [vmem:[%s3806_s12 + $0x370] sm:$0xff] }
 0x32d   : > { %vm1116_vm12 = vcmp.eq.s32.totalorder %v3925_v29, %v750_v57  ;;  %1025 = vperm.xlu1 %3730, %v694_v54   ;;  %833 = vperm.xlu0 %3729, %v630_v55   ;;  %vm1117_vm13 = vcmp.eq.s32.totalorder %v3925_v29, %v753_v56  ;;  %v640_v54 = vld [vmem:[%s3806_s12 + $0x170] sm:$0xff] }
 0x32e   : > { %v3026_v59 = vsel %vm1116_vm12, 1.0, %v3742_v34  ;;  %v3027_v0 = vsel %vm1117_vm13, 1.0, %v3742_v34 }
 0x32f   : > { %3490 = vmatmul.mubr.msk.f32.gmra.mrb[6].mxu0 %vm1494_vm3, %v3025_v58 }
 0x330   : > { %v759_v62 = vpop.permute.xlu1 %758  ;;  %3492 = vmatprep.mubr.msk.f32.mxu0 %vm1494_vm3, %v3026_v59  ;;  %v756_v63 = vpop.permute.xlu0 %755  ;;  %v705_v59 = vld [vmem:[%s3806_s12 + $0x378] sm:$0xff] }
 0x331   : > { %vm1118_vm14 = vcmp.eq.s32.totalorder %v3925_v29, %v756_v63  ;;  %1028 = vperm.xlu1 %3730, %v695_v60   ;;  %836 = vperm.xlu0 %3729, %v631_v61   ;;  %vm1119_vm15 = vcmp.eq.s32.totalorder %v3925_v29, %v759_v62  ;;  %v641_v60 = vld [vmem:[%s3806_s12 + $0x178] sm:$0xff] }
 0x332   : > { %v3028_v1 = vsel %vm1118_vm14, 1.0, %v3742_v34  ;;  %v3029_v6 = vsel %vm1119_vm15, 1.0, %v3742_v34 }
 0x333   : > { %3493 = vmatmul.mubr.msk.f32.gmra.mrb[8].mxu0 %vm1494_vm3, %v3027_v0 }
 0x334   : > { %v765_v4 = vpop.permute.xlu1 %764  ;;  %3495 = vmatprep.mubr.msk.f32.mxu0 %vm1494_vm3, %v3028_v1  ;;  %v762_v5 = vpop.permute.xlu0 %761  ;;  %v706_v1 = vld [vmem:[%s3806_s12 + $0x380] sm:$0xff] }
 0x335   : > { %vm1120_vm0 = vcmp.eq.s32.totalorder %v3925_v29, %v762_v5  ;;  %1031 = vperm.xlu1 %3730, %v696_v2   ;;  %839 = vperm.xlu0 %3729, %v632_v3   ;;  %vm1121_vm1 = vcmp.eq.s32.totalorder %v3925_v29, %v765_v4  ;;  %v642_v2 = vld [vmem:[%s3806_s12 + $0x180] sm:$0xff] }
 0x336   : > { %v3030_v7 = vsel %vm1120_vm0, 1.0, %v3742_v34  ;;  %v3031_v12 = vsel %vm1121_vm1, 1.0, %v3742_v34 }
 0x337   : > { %3496 = vmatmul.mubr.msk.f32.gmra.mrb[10].mxu0 %vm1494_vm3, %v3029_v6 }
 0x338   : > { %v771_v10 = vpop.permute.xlu1 %770  ;;  %3498 = vmatprep.mubr.msk.f32.mxu0 %vm1494_vm3, %v3030_v7  ;;  %v768_v11 = vpop.permute.xlu0 %767 }
 0x339   : > { %vm1122_vm2 = vcmp.eq.s32.totalorder %v3925_v29, %v768_v11  ;;  %1034 = vperm.xlu1 %3730, %v697_v8   ;;  %842 = vperm.xlu0 %3729, %v633_v9   ;;  %vm1123_vm4 = vcmp.eq.s32.totalorder %v3925_v29, %v771_v10  ;;  %v707_v8 = vld [vmem:[%s3806_s12 + $0x388] sm:$0xff] }
 0x33a   : > { %v3032_v13 = vsel %vm1122_vm2, 1.0, %v3742_v34  ;;  %v3033_v18 = vsel %vm1123_vm4, 1.0, %v3742_v34  ;;  %v643_v9 = vld [vmem:[%s3806_s12 + $0x188] sm:$0xff] }
 0x33b   : > { %3499 = vmatmul.mubr.msk.f32.gmra.mrb[12].mxu0 %vm1494_vm3, %v3031_v12 }
 0x33c   : > { %v777_v16 = vpop.permute.xlu1 %776  ;;  %3501 = vmatprep.mubr.msk.f32.mxu0 %vm1494_vm3, %v3032_v13  ;;  %v774_v17 = vpop.permute.xlu0 %773 }
 0x33d   : > { %vm1124_vm5 = vcmp.eq.s32.totalorder %v3925_v29, %v774_v17  ;;  %1037 = vperm.xlu1 %3730, %v698_v14   ;;  %845 = vperm.xlu0 %3729, %v634_v15   ;;  %vm1125_vm6 = vcmp.eq.s32.totalorder %v3925_v29, %v777_v16  ;;  %v708_v14 = vld [vmem:[%s3806_s12 + $0x390] sm:$0xff] }
 0x33e   : > { %v3034_v19 = vsel %vm1124_vm5, 1.0, %v3742_v34  ;;  %v3035_v24 = vsel %vm1125_vm6, 1.0, %v3742_v34  ;;  %v644_v15 = vld [vmem:[%s3806_s12 + $0x190] sm:$0xff] }
 0x33f   : > { %3502 = vmatmul.mubr.msk.f32.gmra.mrb[14].mxu0 %vm1494_vm3, %v3033_v18 }
 0x340   : > { %v783_v22 = vpop.permute.xlu1 %782  ;;  %3504 = vmatprep.mubr.msk.f32.mxu0 %vm1494_vm3, %v3034_v19  ;;  %v780_v23 = vpop.permute.xlu0 %779 }
 0x341   : > { %vm1126_vm7 = vcmp.eq.s32.totalorder %v3925_v29, %v780_v23  ;;  %1040 = vperm.xlu1 %3730, %v699_v20   ;;  %848 = vperm.xlu0 %3729, %v635_v21   ;;  %vm1127_vm8 = vcmp.eq.s32.totalorder %v3925_v29, %v783_v22  ;;  %v709_v20 = vld [vmem:[%s3806_s12 + $0x398] sm:$0xff] }
 0x342   : > { %v3036_v25 = vsel %vm1126_vm7, 1.0, %v3742_v34  ;;  %v3037_v32 = vsel %vm1127_vm8, 1.0, %v3742_v34  ;;  %v645_v21 = vld [vmem:[%s3806_s12 + $0x198] sm:$0xff] }
 0x343   : > { %3505 = vmatmul.mubr.msk.f32.gmra.mrb[16].mxu0 %vm1494_vm3, %v3035_v24 }
 0x344   : > { %v789_v30 = vpop.permute.xlu1 %788  ;;  %3507 = vmatprep.mubr.msk.f32.mxu0 %vm1494_vm3, %v3036_v25  ;;  %v786_v31 = vpop.permute.xlu0 %785 }
 0x345   : > { %vm1128_vm9 = vcmp.eq.s32.totalorder %v3925_v29, %v786_v31  ;;  %1043 = vperm.xlu1 %3730, %v700_v27   ;;  %851 = vperm.xlu0 %3729, %v636_v28   ;;  %vm1129_vm10 = vcmp.eq.s32.totalorder %v3925_v29, %v789_v30  ;;  %v710_v27 = vld [vmem:[%s3806_s12 + $0x3a0] sm:$0xff] }
 0x346   : > { %v3038_v33 = vsel %vm1128_vm9, 1.0, %v3742_v34  ;;  %v3039_v39 = vsel %vm1129_vm10, 1.0, %v3742_v34  ;;  %v646_v28 = vld [vmem:[%s3806_s12 + $0x1a0] sm:$0xff] }
 0x347   : > { %3508 = vmatmul.mubr.msk.f32.gmra.mrb[18].mxu0 %vm1494_vm3, %v3037_v32 }
 0x348   : > { %v795_v37 = vpop.permute.xlu1 %794  ;;  %3510 = vmatprep.mubr.msk.f32.mxu0 %vm1494_vm3, %v3038_v33  ;;  %v792_v38 = vpop.permute.xlu0 %791 }
 0x349   : > { %vm1130_vm11 = vcmp.eq.s32.totalorder %v3925_v29, %v792_v38  ;;  %1046 = vperm.xlu1 %3730, %v701_v35   ;;  %854 = vperm.xlu0 %3729, %v637_v36   ;;  %vm1131_vm12 = vcmp.eq.s32.totalorder %v3925_v29, %v795_v37  ;;  %v711_v35 = vld [vmem:[%s3806_s12 + $0x3a8] sm:$0xff] }
 0x34a   : > { %v3040_v40 = vsel %vm1130_vm11, 1.0, %v3742_v34  ;;  %v3041_v45 = vsel %vm1131_vm12, 1.0, %v3742_v34  ;;  %v647_v36 = vld [vmem:[%s3806_s12 + $0x1a8] sm:$0xff] }
 0x34b   : > { %3511 = vmatmul.mubr.msk.f32.gmra.mrb[20].mxu0 %vm1494_vm3, %v3039_v39 }
 0x34c   : > { %v801_v43 = vpop.permute.xlu1 %800  ;;  %3513 = vmatprep.mubr.msk.f32.mxu0 %vm1494_vm3, %v3040_v40  ;;  %v798_v44 = vpop.permute.xlu0 %797 }
 0x34d   : > { %vm1132_vm13 = vcmp.eq.s32.totalorder %v3925_v29, %v798_v44  ;;  %1049 = vperm.xlu1 %3730, %v702_v41   ;;  %857 = vperm.xlu0 %3729, %v638_v42   ;;  %vm1133_vm14 = vcmp.eq.s32.totalorder %v3925_v29, %v801_v43  ;;  %v712_v41 = vld [vmem:[%s3806_s12 + $0x3b0] sm:$0xff] }
 0x34e   : > { %v3042_v46 = vsel %vm1132_vm13, 1.0, %v3742_v34  ;;  %v3043_v51 = vsel %vm1133_vm14, 1.0, %v3742_v34  ;;  %v648_v42 = vld [vmem:[%s3806_s12 + $0x1b0] sm:$0xff] }
 0x34f   : > { %3514 = vmatmul.mubr.msk.f32.gmra.mrb[22].mxu0 %vm1494_vm3, %v3041_v45 }
 0x350   : > { %v807_v49 = vpop.permute.xlu1 %806  ;;  %3516 = vmatprep.mubr.msk.f32.mxu0 %vm1494_vm3, %v3042_v46  ;;  %v804_v50 = vpop.permute.xlu0 %803 }
 0x351   : > { %vm1134_vm15 = vcmp.eq.s32.totalorder %v3925_v29, %v804_v50  ;;  %1052 = vperm.xlu1 %3730, %v703_v47   ;;  %860 = vperm.xlu0 %3729, %v639_v48   ;;  %vm1135_vm0 = vcmp.eq.s32.totalorder %v3925_v29, %v807_v49  ;;  %v713_v47 = vld [vmem:[%s3806_s12 + $0x3b8] sm:$0xff] }
 0x352   : > { %v3044_v52 = vsel %vm1134_vm15, 1.0, %v3742_v34  ;;  %v3045_v57 = vsel %vm1135_vm0, 1.0, %v3742_v34  ;;  %v649_v48 = vld [vmem:[%s3806_s12 + $0x1b8] sm:$0xff] }
 0x353   : > { %3517 = vmatmul.mubr.msk.f32.gmra.mrb[24].mxu0 %vm1494_vm3, %v3043_v51 }
 0x354   : > { %v813_v55 = vpop.permute.xlu1 %812  ;;  %3519 = vmatprep.mubr.msk.f32.mxu0 %vm1494_vm3, %v3044_v52  ;;  %v810_v56 = vpop.permute.xlu0 %809 }
 0x355   : > { %vm1136_vm1 = vcmp.eq.s32.totalorder %v3925_v29, %v810_v56  ;;  %1055 = vperm.xlu1 %3730, %v704_v53   ;;  %863 = vperm.xlu0 %3729, %v640_v54   ;;  %vm1137_vm2 = vcmp.eq.s32.totalorder %v3925_v29, %v813_v55  ;;  %v714_v53 = vld [vmem:[%s3806_s12 + $0x3c0] sm:$0xff] }
 0x356   : > { %v3046_v58 = vsel %vm1136_vm1, 1.0, %v3742_v34  ;;  %v3047_v63 = vsel %vm1137_vm2, 1.0, %v3742_v34  ;;  %v650_v54 = vld [vmem:[%s3806_s12 + $0x1c0] sm:$0xff] }
 0x357   : > { %3520 = vmatmul.mubr.msk.f32.gmra.mrb[26].mxu0 %vm1494_vm3, %v3045_v57 }
 0x358   : > { %v819_v61 = vpop.permute.xlu1 %818  ;;  %3522 = vmatprep.mubr.msk.f32.mxu0 %vm1494_vm3, %v3046_v58  ;;  %v816_v62 = vpop.permute.xlu0 %815 }
 0x359   : > { %vm1138_vm4 = vcmp.eq.s32.totalorder %v3925_v29, %v816_v62  ;;  %1058 = vperm.xlu1 %3730, %v705_v59   ;;  %866 = vperm.xlu0 %3729, %v641_v60   ;;  %vm1139_vm5 = vcmp.eq.s32.totalorder %v3925_v29, %v819_v61  ;;  %v715_v59 = vld [vmem:[%s3806_s12 + $0x3c8] sm:$0xff] }
 0x35a   : > { %v3048_v0 = vsel %vm1138_vm4, 1.0, %v3742_v34  ;;  %v3049_v5 = vsel %vm1139_vm5, 1.0, %v3742_v34  ;;  %v651_v60 = vld [vmem:[%s3806_s12 + $0x1c8] sm:$0xff] }
 0x35b   : > { %3523 = vmatmul.mubr.msk.f32.gmra.mrb[28].mxu0 %vm1494_vm3, %v3047_v63 }
 0x35c   : > { %v921_v3 = vpop.permute.xlu1 %920  ;;  %3525 = vmatprep.mubr.msk.f32.mxu0 %vm1494_vm3, %v3048_v0  ;;  %v918_v4 = vpop.permute.xlu0 %917 }
 0x35d   : > { %vm1173_vm6 = vcmp.eq.s32.totalorder %v3925_v29, %v921_v3  ;;  %vm1172_vm7 = vcmp.eq.s32.totalorder %v3925_v29, %v918_v4  ;;  %1061 = vperm.xlu1 %3730, %v706_v1   ;;  %869 = vperm.xlu0 %3729, %v642_v2   ;;  %v716_v1 = vld [vmem:[%s3806_s12 + $0x3d0] sm:$0xff] }
 0x35e   : > { %v3083_v6 = vsel %vm1173_vm6, 1.0, %v3742_v34  ;;  %v3082_v7 = vsel %vm1172_vm7, 1.0, %v3742_v34  ;;  %v652_v2 = vld [vmem:[%s3806_s12 + $0x1d0] sm:$0xff] }
 0x35f   : > { %3526 = vmatmul.mubr.msk.f32.gmra.mrb[30].mxu0 %vm1494_vm3, %v3049_v5  ;;  %3576 = vmatprep.mubr.msk.f32.mxu1 %vm1494_vm3, %v3082_v7  ;;  %v717_v7 = vld [vmem:[%s3806_s12 + $0x3d8] sm:$0xff] }
 0x360   : > { %v927_v10 = vpop.permute.xlu1 %926  ;;  %3577 = vmatmul.mubr.msk.f32.vlgmr.msra.gmra.mrb[0].mxu1 %vm1494_vm3, %v3083_v6  ;;  %v924_v11 = vpop.permute.xlu0 %923 }
 0x361   : > { %vm1175_vm8 = vcmp.eq.s32.totalorder %v3925_v29, %v927_v10  ;;  %vm1174_vm9 = vcmp.eq.s32.totalorder %v3925_v29, %v924_v11  ;;  %1064 = vperm.xlu1 %3730, %v707_v8   ;;  %872 = vperm.xlu0 %3729, %v643_v9   ;;  %v653_v8 = vld [vmem:[%s3806_s12 + $0x1d8] sm:$0xff] }
 0x362   : > { %v3085_v12 = vsel %vm1175_vm8, 1.0, %v3742_v34  ;;  %v3084_v13 = vsel %vm1174_vm9, 1.0, %v3742_v34 }
 0x363   : > { %3579 = vmatprep.mubr.msk.f32.mxu1 %vm1494_vm3, %v3084_v13  ;;  %v718_v13 = vld [vmem:[%s3806_s12 + $0x3e0] sm:$0xff] }
 0x364   : > { %v933_v16 = vpop.permute.xlu1 %932  ;;  %3580 = vmatmul.mubr.msk.f32.gmra.mrb[2].mxu1 %vm1494_vm3, %v3085_v12  ;;  %v930_v17 = vpop.permute.xlu0 %929 }
 0x365   : > { %vm1177_vm10 = vcmp.eq.s32.totalorder %v3925_v29, %v933_v16  ;;  %vm1176_vm11 = vcmp.eq.s32.totalorder %v3925_v29, %v930_v17  ;;  %1067 = vperm.xlu1 %3730, %v708_v14   ;;  %875 = vperm.xlu0 %3729, %v644_v15   ;;  %v654_v14 = vld [vmem:[%s3806_s12 + $0x1e0] sm:$0xff] }
 0x366   : > { %v3087_v18 = vsel %vm1177_vm10, 1.0, %v3742_v34  ;;  %v3086_v19 = vsel %vm1176_vm11, 1.0, %v3742_v34 }
 0x367   : > { %3582 = vmatprep.mubr.msk.f32.mxu1 %vm1494_vm3, %v3086_v19  ;;  %v719_v19 = vld [vmem:[%s3806_s12 + $0x3e8] sm:$0xff] }
 0x368   : > { %v939_v22 = vpop.permute.xlu1 %938  ;;  %3583 = vmatmul.mubr.msk.f32.gmra.mrb[4].mxu1 %vm1494_vm3, %v3087_v18  ;;  %v936_v23 = vpop.permute.xlu0 %935 }
 0x369   : > { %vm1179_vm12 = vcmp.eq.s32.totalorder %v3925_v29, %v939_v22  ;;  %vm1178_vm13 = vcmp.eq.s32.totalorder %v3925_v29, %v936_v23  ;;  %1070 = vperm.xlu1 %3730, %v709_v20   ;;  %878 = vperm.xlu0 %3729, %v645_v21   ;;  %v655_v20 = vld [vmem:[%s3806_s12 + $0x1e8] sm:$0xff] }
 0x36a   : > { %v3089_v24 = vsel %vm1179_vm12, 1.0, %v3742_v34  ;;  %v3088_v25 = vsel %vm1178_vm13, 1.0, %v3742_v34 }
 0x36b   : > { %3585 = vmatprep.mubr.msk.f32.mxu1 %vm1494_vm3, %v3088_v25  ;;  %v720_v25 = vld [vmem:[%s3806_s12 + $0x3f0] sm:$0xff] }
 0x36c   : > { %v945_v30 = vpop.permute.xlu1 %944  ;;  %3586 = vmatmul.mubr.msk.f32.gmra.mrb[6].mxu1 %vm1494_vm3, %v3089_v24  ;;  %v942_v31 = vpop.permute.xlu0 %941 }
 0x36d   : > { %vm1181_vm14 = vcmp.eq.s32.totalorder %v3925_v29, %v945_v30  ;;  %vm1180_vm15 = vcmp.eq.s32.totalorder %v3925_v29, %v942_v31  ;;  %1073 = vperm.xlu1 %3730, %v710_v27   ;;  %881 = vperm.xlu0 %3729, %v646_v28   ;;  %v656_v27 = vld [vmem:[%s3806_s12 + $0x1f0] sm:$0xff] }
 0x36e   : > { %v3091_v32 = vsel %vm1181_vm14, 1.0, %v3742_v34  ;;  %v3090_v33 = vsel %vm1180_vm15, 1.0, %v3742_v34 }
 0x36f   : > { %3588 = vmatprep.mubr.msk.f32.mxu1 %vm1494_vm3, %v3090_v33  ;;  %v721_v33 = vld [vmem:[%s3806_s12 + $0x3f8] sm:$0xff] }
 0x370   : > { %v951_v37 = vpop.permute.xlu1 %950  ;;  %3589 = vmatmul.mubr.msk.f32.gmra.mrb[8].mxu1 %vm1494_vm3, %v3091_v32  ;;  %v948_v38 = vpop.permute.xlu0 %947 }
 0x371   : > { %vm1183_vm0 = vcmp.eq.s32.totalorder %v3925_v29, %v951_v37  ;;  %vm1182_vm1 = vcmp.eq.s32.totalorder %v3925_v29, %v948_v38  ;;  %1076 = vperm.xlu1 %3730, %v711_v35   ;;  %884 = vperm.xlu0 %3729, %v647_v36   ;;  %v657_v35 = vld [vmem:[%s3806_s12 + $0x1f8] sm:$0xff] }
 0x372   : > { %v3093_v39 = vsel %vm1183_vm0, 1.0, %v3742_v34  ;;  %v3092_v40 = vsel %vm1182_vm1, 1.0, %v3742_v34 }
 0x373   : > { %3591 = vmatprep.mubr.msk.f32.mxu1 %vm1494_vm3, %v3092_v40 }
 0x374   : > { %v957_v43 = vpop.permute.xlu1 %956  ;;  %3592 = vmatmul.mubr.msk.f32.gmra.mrb[10].mxu1 %vm1494_vm3, %v3093_v39  ;;  %v954_v44 = vpop.permute.xlu0 %953 }
 0x375   : > { %vm1185_vm2 = vcmp.eq.s32.totalorder %v3925_v29, %v957_v43  ;;  %vm1184_vm4 = vcmp.eq.s32.totalorder %v3925_v29, %v954_v44  ;;  %1079 = vperm.xlu1 %3730, %v712_v41   ;;  %887 = vperm.xlu0 %3729, %v648_v42  }
 0x376   : > { %v3095_v45 = vsel %vm1185_vm2, 1.0, %v3742_v34  ;;  %v3094_v46 = vsel %vm1184_vm4, 1.0, %v3742_v34 }
 0x377   : > { %3594 = vmatprep.mubr.msk.f32.mxu1 %vm1494_vm3, %v3094_v46 }
 0x378   : > { %v963_v49 = vpop.permute.xlu1 %962  ;;  %3595 = vmatmul.mubr.msk.f32.gmra.mrb[12].mxu1 %vm1494_vm3, %v3095_v45  ;;  %v960_v50 = vpop.permute.xlu0 %959 }
 0x379   : > { %vm1187_vm5 = vcmp.eq.s32.totalorder %v3925_v29, %v963_v49  ;;  %vm1186_vm6 = vcmp.eq.s32.totalorder %v3925_v29, %v960_v50  ;;  %1082 = vperm.xlu1 %3730, %v713_v47   ;;  %890 = vperm.xlu0 %3729, %v649_v48  }
 0x37a   : > { %v3097_v51 = vsel %vm1187_vm5, 1.0, %v3742_v34  ;;  %v3096_v52 = vsel %vm1186_vm6, 1.0, %v3742_v34 }
 0x37b   : > { %3597 = vmatprep.mubr.msk.f32.mxu1 %vm1494_vm3, %v3096_v52 }
 0x37c   : > { %v969_v55 = vpop.permute.xlu1 %968  ;;  %3598 = vmatmul.mubr.msk.f32.gmra.mrb[14].mxu1 %vm1494_vm3, %v3097_v51  ;;  %v966_v56 = vpop.permute.xlu0 %965 }
 0x37d   : > { %vm1189_vm7 = vcmp.eq.s32.totalorder %v3925_v29, %v969_v55  ;;  %vm1188_vm8 = vcmp.eq.s32.totalorder %v3925_v29, %v966_v56  ;;  %1085 = vperm.xlu1 %3730, %v714_v53   ;;  %893 = vperm.xlu0 %3729, %v650_v54  }
 0x37e   : > { %v3099_v57 = vsel %vm1189_vm7, 1.0, %v3742_v34  ;;  %v3098_v58 = vsel %vm1188_vm8, 1.0, %v3742_v34 }
 0x37f   : > { %3600 = vmatprep.mubr.msk.f32.mxu1 %vm1494_vm3, %v3098_v58 }
 0x380   : > { %v975_v61 = vpop.permute.xlu1 %974  ;;  %3601 = vmatmul.mubr.msk.f32.gmra.mrb[16].mxu1 %vm1494_vm3, %v3099_v57  ;;  %v972_v62 = vpop.permute.xlu0 %971 }
 0x381   : > { %vm1191_vm9 = vcmp.eq.s32.totalorder %v3925_v29, %v975_v61  ;;  %vm1190_vm10 = vcmp.eq.s32.totalorder %v3925_v29, %v972_v62  ;;  %1088 = vperm.xlu1 %3730, %v715_v59   ;;  %896 = vperm.xlu0 %3729, %v651_v60  }
 0x382   : > { %v3101_v63 = vsel %vm1191_vm9, 1.0, %v3742_v34  ;;  %v3100_v0 = vsel %vm1190_vm10, 1.0, %v3742_v34 }
 0x383   : > { %3603 = vmatprep.mubr.msk.f32.mxu1 %vm1494_vm3, %v3100_v0 }
 0x384   : > { %v981_v3 = vpop.permute.xlu1 %980  ;;  %3604 = vmatmul.mubr.msk.f32.gmra.mrb[18].mxu1 %vm1494_vm3, %v3101_v63  ;;  %v978_v4 = vpop.permute.xlu0 %977 }
 0x385   : > { %vm1193_vm11 = vcmp.eq.s32.totalorder %v3925_v29, %v981_v3  ;;  %vm1192_vm12 = vcmp.eq.s32.totalorder %v3925_v29, %v978_v4  ;;  %1091 = vperm.xlu1 %3730, %v716_v1   ;;  %899 = vperm.xlu0 %3729, %v652_v2  }
 0x386   : > { %v3103_v5 = vsel %vm1193_vm11, 1.0, %v3742_v34  ;;  %v3102_v6 = vsel %vm1192_vm12, 1.0, %v3742_v34 }
 0x387   : > { %3606 = vmatprep.mubr.msk.f32.mxu1 %vm1494_vm3, %v3102_v6 }
 0x388   : > { %v987_v9 = vpop.permute.xlu1 %986  ;;  %3607 = vmatmul.mubr.msk.f32.gmra.mrb[20].mxu1 %vm1494_vm3, %v3103_v5  ;;  %v984_v10 = vpop.permute.xlu0 %983 }
 0x389   : > { %vm1195_vm13 = vcmp.eq.s32.totalorder %v3925_v29, %v987_v9  ;;  %vm1194_vm14 = vcmp.eq.s32.totalorder %v3925_v29, %v984_v10  ;;  %1094 = vperm.xlu1 %3730, %v717_v7   ;;  %902 = vperm.xlu0 %3729, %v653_v8  }
 0x38a   : > { %v3105_v11 = vsel %vm1195_vm13, 1.0, %v3742_v34  ;;  %v3104_v12 = vsel %vm1194_vm14, 1.0, %v3742_v34 }
 0x38b   : > { %3609 = vmatprep.mubr.msk.f32.mxu1 %vm1494_vm3, %v3104_v12 }
 0x38c   : > { %v993_v15 = vpop.permute.xlu1 %992  ;;  %3610 = vmatmul.mubr.msk.f32.gmra.mrb[22].mxu1 %vm1494_vm3, %v3105_v11  ;;  %v990_v16 = vpop.permute.xlu0 %989 }
 0x38d   : > { %vm1197_vm15 = vcmp.eq.s32.totalorder %v3925_v29, %v993_v15  ;;  %vm1196_vm0 = vcmp.eq.s32.totalorder %v3925_v29, %v990_v16  ;;  %1097 = vperm.xlu1 %3730, %v718_v13   ;;  %905 = vperm.xlu0 %3729, %v654_v14  }
 0x38e   : > { %v3107_v17 = vsel %vm1197_vm15, 1.0, %v3742_v34  ;;  %v3106_v18 = vsel %vm1196_vm0, 1.0, %v3742_v34 }
 0x38f   : > { %3612 = vmatprep.mubr.msk.f32.mxu1 %vm1494_vm3, %v3106_v18 }
 0x390   : > { %v999_v21 = vpop.permute.xlu1 %998  ;;  %3613 = vmatmul.mubr.msk.f32.gmra.mrb[24].mxu1 %vm1494_vm3, %v3107_v17  ;;  %v996_v22 = vpop.permute.xlu0 %995 }
 0x391   : > { %vm1199_vm1 = vcmp.eq.s32.totalorder %v3925_v29, %v999_v21  ;;  %vm1198_vm2 = vcmp.eq.s32.totalorder %v3925_v29, %v996_v22  ;;  %1100 = vperm.xlu1 %3730, %v719_v19   ;;  %908 = vperm.xlu0 %3729, %v655_v20  }
 0x392   : > { %v3109_v23 = vsel %vm1199_vm1, 1.0, %v3742_v34  ;;  %v3108_v24 = vsel %vm1198_vm2, 1.0, %v3742_v34 }
 0x393   : > { %3615 = vmatprep.mubr.msk.f32.mxu1 %vm1494_vm3, %v3108_v24  ;;  %v4254_v24 = vshrl.u32 %v722_v26, 7  ;;  %v2712_v26 = vld [vmem:[%s318_s15] sm:$0xff] }
 0x394   : > { %v1005_v28 = vpop.permute.xlu1 %1004  ;;  %3616 = vmatmul.mubr.msk.f32.gmra.mrb[26].mxu1 %vm1494_vm3, %v3109_v23  ;;  %v1002_v30 = vpop.permute.xlu0 %1001 }
 0x395   : > { %vm1201_vm4 = vcmp.eq.s32.totalorder %v3925_v29, %v1005_v28  ;;  %vm1200_vm5 = vcmp.eq.s32.totalorder %v3925_v29, %v1002_v30  ;;  %1103 = vperm.xlu1 %3730, %v720_v25   ;;  %911 = vperm.xlu0 %3729, %v656_v27   ;;  %v2718_v28 = vsub.s32 0, %v4254_v24  ;;  %v2722_v30 = vsub.s32 1, %v4254_v24 }
 0x396   : > { %v3111_v31 = vsel %vm1201_vm4, 1.0, %v3742_v34  ;;  %v3110_v32 = vsel %vm1200_vm5, 1.0, %v3742_v34 }
 0x397   : > { %3618 = vmatprep.mubr.msk.f32.mxu1 %vm1494_vm3, %v3110_v32 }
 0x398   : > { %v1011_v36 = vpop.permute.xlu1 %1010  ;;  %3619 = vmatmul.mubr.msk.f32.gmra.mrb[28].mxu1 %vm1494_vm3, %v3111_v31  ;;  %v1008_v37 = vpop.permute.xlu0 %1007 }
 0x399   : > { %vm1203_vm6 = vcmp.eq.s32.totalorder %v3925_v29, %v1011_v36  ;;  %vm1202_vm7 = vcmp.eq.s32.totalorder %v3925_v29, %v1008_v37  ;;  %1106 = vperm.xlu1 %3730, %v721_v33   ;;  %914 = vperm.xlu0 %3729, %v657_v35   ;;  %v4270_v33 = vadd.s32 8, %v4254_v24  ;;  %v4272_v35 = vrot.slane %v2712_v26, %v2718_v28 }
 0x39a   : > { %v3113_v38 = vsel %vm1203_vm6, 1.0, %v3742_v34  ;;  %v3112_v39 = vsel %vm1202_vm7, 1.0, %v3742_v34  ;;  %v4276_v36 = vrot.slane %v2712_v26, %v2722_v30  ;;  %v2726_v37 = vsub.s32 2, %v4254_v24 }
 0x39b   : > { %3621 = vmatprep.mubr.msk.f32.mxu1 %vm1494_vm3, %v3112_v39 }
 0x39c   : > { %v1014_v40 = vpop.permute.xlu1 %1013  ;;  %3622 = vmatmul.mubr.msk.f32.gmra.mrb[30].mxu1 %vm1494_vm3, %v3113_v38  ;;  %v822_v41 = vpop.permute.xlu0 %821 }
 0x39d   : > { %vm1204_vm8 = vcmp.eq.s32.totalorder %v3925_v29, %v1014_v40  ;;  %vm1140_vm9 = vcmp.eq.s32.totalorder %v3925_v29, %v822_v41  ;;  %v2730_v40 = vsub.s32 3, %v4254_v24  ;;  %v4284_v41 = vrot.slane %v2712_v26, %v2726_v37 }
 0x39e   : > { %v3114_v42 = vsel %vm1204_vm8, 1.0, %v3742_v34  ;;  %v3050_v43 = vsel %vm1140_vm9, 1.0, %v3742_v34 }
 0x39f   : > { %3528 = vmatprep.mubr.msk.f32.mxu0 %vm1494_vm3, %v3050_v43  ;;  %3624 = vmatprep.mubr.msk.f32.mxu1 %vm1494_vm3, %v3114_v42 }
 0x3a0   : > { %v1017_v44 = vpop.permute.xlu1 %1016  ;;  %v825_v45 = vpop.permute.xlu0 %824 }
 0x3a1   : > { %vm1205_vm10 = vcmp.eq.s32.totalorder %v3925_v29, %v1017_v44  ;;  %vm1141_vm11 = vcmp.eq.s32.totalorder %v3925_v29, %v825_v45  ;;  %v4290_v44 = vrot.slane %v2712_v26, %v2730_v40  ;;  %v2734_v45 = vsub.s32 4, %v4254_v24 }
 0x3a2   : > { %v3115_v46 = vsel %vm1205_vm10, 1.0, %v3742_v34  ;;  %v3051_v47 = vsel %vm1141_vm11, 1.0, %v3742_v34 }
 0x3a3   : > { %3529 = vmatmul.mubr.msk.f32.gmra.mrb[32].mxu0 %vm1494_vm3, %v3051_v47  ;;  %3625 = vmatmul.mubr.msk.f32.gmra.mrb[32].mxu1 %vm1494_vm3, %v3115_v46 }
 0x3a4   : > { %v1020_v48 = vpop.permute.xlu1 %1019  ;;  %v828_v49 = vpop.permute.xlu0 %827 }
 0x3a5   : > { %vm1206_vm12 = vcmp.eq.s32.totalorder %v3925_v29, %v1020_v48  ;;  %vm1142_vm13 = vcmp.eq.s32.totalorder %v3925_v29, %v828_v49 }
 0x3a6   : > { %v3116_v50 = vsel %vm1206_vm12, 1.0, %v3742_v34  ;;  %v3052_v51 = vsel %vm1142_vm13, 1.0, %v3742_v34 }
 0x3a7   : > { %3531 = vmatprep.mubr.msk.f32.mxu0 %vm1494_vm3, %v3052_v51  ;;  %3627 = vmatprep.mubr.msk.f32.mxu1 %vm1494_vm3, %v3116_v50  ;;  %v4299_v50 = vrot.slane %v2712_v26, %v2734_v45  ;;  %v2738_v51 = vsub.s32 5, %v4254_v24 }
 0x3a8   : > { %v1023_v52 = vpop.permute.xlu1 %1022  ;;  %v831_v53 = vpop.permute.xlu0 %830 }
 0x3a9   : > { %vm1207_vm14 = vcmp.eq.s32.totalorder %v3925_v29, %v1023_v52  ;;  %vm1143_vm15 = vcmp.eq.s32.totalorder %v3925_v29, %v831_v53 }
 0x3aa   : > { %v3117_v54 = vsel %vm1207_vm14, 1.0, %v3742_v34  ;;  %v3053_v55 = vsel %vm1143_vm15, 1.0, %v3742_v34 }
 0x3ab   : > { %3532 = vmatmul.mubr.msk.f32.gmra.mrb[34].mxu0 %vm1494_vm3, %v3053_v55  ;;  %3628 = vmatmul.mubr.msk.f32.gmra.mrb[34].mxu1 %vm1494_vm3, %v3117_v54 }
 0x3ac   : > { %v1026_v56 = vpop.permute.xlu1 %1025  ;;  %v834_v57 = vpop.permute.xlu0 %833 }
 0x3ad   : > { %vm1208_vm0 = vcmp.eq.s32.totalorder %v3925_v29, %v1026_v56  ;;  %vm1144_vm1 = vcmp.eq.s32.totalorder %v3925_v29, %v834_v57  ;;  %v4310_v57 = vrot.slane %v2712_v26, %v2738_v51 }
 0x3ae   : > { %v3118_v58 = vsel %vm1208_vm0, 1.0, %v3742_v34  ;;  %v3054_v59 = vsel %vm1144_vm1, 1.0, %v3742_v34 }
 0x3af   : > { %3534 = vmatprep.mubr.msk.f32.mxu0 %vm1494_vm3, %v3054_v59  ;;  %3630 = vmatprep.mubr.msk.f32.mxu1 %vm1494_vm3, %v3118_v58  ;;  %v2742_v58 = vsub.s32 6, %v4254_v24 }
 0x3b0   : > { %v1029_v60 = vpop.permute.xlu1 %1028  ;;  %v837_v61 = vpop.permute.xlu0 %836 }
 0x3b1   : > { %vm1209_vm2 = vcmp.eq.s32.totalorder %v3925_v29, %v1029_v60  ;;  %vm1145_vm4 = vcmp.eq.s32.totalorder %v3925_v29, %v837_v61 }
 0x3b2   : > { %v3119_v62 = vsel %vm1209_vm2, 1.0, %v3742_v34  ;;  %v3055_v63 = vsel %vm1145_vm4, 1.0, %v3742_v34  ;;  %vm2756_vm4 = vcmp.eq.s32.totalorder %v4270_v33, %v4272_v35 }
 0x3b3   : > { %3535 = vmatmul.mubr.msk.f32.gmra.mrb[36].mxu0 %vm1494_vm3, %v3055_v63  ;;  %3631 = vmatmul.mubr.msk.f32.gmra.mrb[36].mxu1 %vm1494_vm3, %v3119_v62  ;;  %v3282_v46 = vsel %vm2756_vm4, 1.0, %v3742_v34  ;;  %v4319_v62 = vrot.slane %v2712_v26, %v2742_v58  ;;  %v2746_v63 = vsub.s32 7, %v4254_v24 }
 0x3b4   : > { %v1032_v0 = vpop.permute.xlu1 %1031  ;;  %v840_v1 = vpop.permute.xlu0 %839 }
 0x3b5   : > { %vm1210_vm5 = vcmp.eq.s32.totalorder %v3925_v29, %v1032_v0  ;;  %vm1146_vm6 = vcmp.eq.s32.totalorder %v3925_v29, %v840_v1 }
 0x3b6   : > { %v3120_v2 = vsel %vm1210_vm5, 1.0, %v3742_v34  ;;  %v3056_v3 = vsel %vm1146_vm6, 1.0, %v3742_v34 }
 0x3b7   : > { %3537 = vmatprep.mubr.msk.f32.mxu0 %vm1494_vm3, %v3056_v3  ;;  %3633 = vmatprep.mubr.msk.f32.mxu1 %vm1494_vm3, %v3120_v2 }
 0x3b8   : > { %v1035_v4 = vpop.permute.xlu1 %1034  ;;  %v843_v5 = vpop.permute.xlu0 %842 }
 0x3b9   : > { %vm1211_vm7 = vcmp.eq.s32.totalorder %v3925_v29, %v1035_v4  ;;  %vm1147_vm8 = vcmp.eq.s32.totalorder %v3925_v29, %v843_v5  ;;  %v2747_v5 = vrot.slane %v2712_v26, %v2746_v63 }
 0x3ba   : > { %v3121_v6 = vsel %vm1211_vm7, 1.0, %v3742_v34  ;;  %v3057_v7 = vsel %vm1147_vm8, 1.0, %v3742_v34  ;;  %vm2757_vm7 = vcmp.eq.s32.totalorder %v4270_v33, %v4276_v36  ;;  %vm2758_vm8 = vcmp.eq.s32.totalorder %v4270_v33, %v4284_v41 }
 0x3bb   : > { %3538 = vmatmul.mubr.msk.f32.gmra.mrb[38].mxu0 %vm1494_vm3, %v3057_v7  ;;  %3634 = vmatmul.mubr.msk.f32.gmra.mrb[38].mxu1 %vm1494_vm3, %v3121_v6  ;;  %v3283_v47 = vsel %vm2757_vm7, 1.0, %v3742_v34  ;;  %v3284_v52 = vsel %vm2758_vm8, 1.0, %v3742_v34  ;;  %vm2763_vm4 = vcmp.eq.s32.totalorder %v4270_v33, %v2747_v5  ;;  %vm2751_vm8 = vcmp.eq.s32.totalorder %v4254_v24, %v4290_v44 }
 0x3bc   : > { %v1038_v8 = vpop.permute.xlu1 %1037  ;;  %v846_v9 = vpop.permute.xlu0 %845  ;;  %v2807_v54 = vadd.f32 %v3283_v47, %v3282_v46 }
 0x3bd   : > { %vm1212_vm9 = vcmp.eq.s32.totalorder %v3925_v29, %v1038_v8  ;;  %vm1148_vm10 = vcmp.eq.s32.totalorder %v3925_v29, %v846_v9 }
 0x3be   : > { %v3122_v10 = vsel %vm1212_vm9, 1.0, %v3742_v34  ;;  %v3058_v11 = vsel %vm1148_vm10, 1.0, %v3742_v34  ;;  %vm2759_vm9 = vcmp.eq.s32.totalorder %v4270_v33, %v4290_v44  ;;  %v2808_v59 = vadd.f32 %v3284_v52, %v2807_v54 }
 0x3bf   : > { %3540 = vmatprep.mubr.msk.f32.mxu0 %vm1494_vm3, %v3058_v11  ;;  %3636 = vmatprep.mubr.msk.f32.mxu1 %vm1494_vm3, %v3122_v10  ;;  %v3285_v53 = vsel %vm2759_vm9, 1.0, %v3742_v34  ;;  %vm2752_vm9 = vcmp.eq.s32.totalorder %v4254_v24, %v4299_v50 }
 0x3c0   : > { %v1041_v12 = vpop.permute.xlu1 %1040  ;;  %v849_v13 = vpop.permute.xlu0 %848  ;;  %v2809_v2 = vadd.f32 %v3285_v53, %v2808_v59  ;;  %v3278_v28 = vsel %vm2752_vm9, 1.0, %v3742_v34 }
 0x3c1   : > { %vm1213_vm11 = vcmp.eq.s32.totalorder %v3925_v29, %v1041_v12  ;;  %vm1149_vm12 = vcmp.eq.s32.totalorder %v3925_v29, %v849_v13 }
 0x3c2   : > { %v3123_v14 = vsel %vm1213_vm11, 1.0, %v3742_v34  ;;  %v3059_v15 = vsel %vm1149_vm12, 1.0, %v3742_v34  ;;  %vm2760_vm12 = vcmp.eq.s32.totalorder %v4270_v33, %v4299_v50 }
 0x3c3   : > { %3541 = vmatmul.mubr.msk.f32.gmra.mrb[40].mxu0 %vm1494_vm3, %v3059_v15  ;;  %3637 = vmatmul.mubr.msk.f32.gmra.mrb[40].mxu1 %vm1494_vm3, %v3123_v14  ;;  %v3286_v0 = vsel %vm2760_vm12, 1.0, %v3742_v34  ;;  %v3289_v14 = vsel %vm2763_vm4, 1.0, %v3742_v34  ;;  %vm2753_vm12 = vcmp.eq.s32.totalorder %v4254_v24, %v4310_v57 }
 0x3c4   : > { %v1044_v16 = vpop.permute.xlu1 %1043  ;;  %v852_v17 = vpop.permute.xlu0 %851  ;;  %v2810_v6 = vadd.f32 %v3286_v0, %v2809_v2 }
 0x3c5   : > { %vm1214_vm13 = vcmp.eq.s32.totalorder %v3925_v29, %v1044_v16  ;;  %vm1150_vm14 = vcmp.eq.s32.totalorder %v3925_v29, %v852_v17 }
 0x3c6   : > { %v3124_v18 = vsel %vm1214_vm13, 1.0, %v3742_v34  ;;  %v3060_v19 = vsel %vm1150_vm14, 1.0, %v3742_v34  ;;  %vm2748_vm13 = vcmp.eq.s32.totalorder %v4254_v24, %v4272_v35  ;;  %vm2761_vm14 = vcmp.eq.s32.totalorder %v4270_v33, %v4310_v57 }
 0x3c7   : > { %3543 = vmatprep.mubr.msk.f32.mxu0 %vm1494_vm3, %v3060_v19  ;;  %3639 = vmatprep.mubr.msk.f32.mxu1 %vm1494_vm3, %v3124_v18  ;;  %v3287_v1 = vsel %vm2761_vm14, 1.0, %v3742_v34  ;;  %v3274_v10 = vsel %vm2748_vm13, 1.0, %v3742_v34  ;;  %vm2754_vm13 = vcmp.eq.s32.totalorder %v4254_v24, %v4319_v62 }
 0x3c8   : > { %v1047_v20 = vpop.permute.xlu1 %1046  ;;  %v855_v21 = vpop.permute.xlu0 %854  ;;  %v2811_v11 = vadd.f32 %v3287_v1, %v2810_v6  ;;  %v3280_v37 = vsel %vm2754_vm13, 1.0, %v3742_v34 }
 0x3c9   : > { %vm1215_vm15 = vcmp.eq.s32.totalorder %v3925_v29, %v1047_v20  ;;  %vm1151_vm0 = vcmp.eq.s32.totalorder %v3925_v29, %v855_v21 }
 0x3ca   : > { %v3125_v22 = vsel %vm1215_vm15, 1.0, %v3742_v34  ;;  %v3061_v23 = vsel %vm1151_vm0, 1.0, %v3742_v34 }
 0x3cb   : > { %3544 = vmatmul.mubr.msk.f32.gmra.mrb[42].mxu0 %vm1494_vm3, %v3061_v23  ;;  %3640 = vmatmul.mubr.msk.f32.gmra.mrb[42].mxu1 %vm1494_vm3, %v3125_v22  ;;  %v3277_v22 = vsel %vm2751_vm8, 1.0, %v3742_v34 }
 0x3cc   : > { %v1050_v25 = vpop.permute.xlu1 %1049  ;;  %v858_v27 = vpop.permute.xlu0 %857 }
 0x3cd   : > { %vm1216_vm1 = vcmp.eq.s32.totalorder %v3925_v29, %v1050_v25  ;;  %vm1152_vm2 = vcmp.eq.s32.totalorder %v3925_v29, %v858_v27 }
 0x3ce   : > { %v3126_v31 = vsel %vm1216_vm1, 1.0, %v3742_v34  ;;  %v3062_v32 = vsel %vm1152_vm2, 1.0, %v3742_v34  ;;  %vm2762_vm1 = vcmp.eq.s32.totalorder %v4270_v33, %v4319_v62  ;;  %vm2749_vm2 = vcmp.eq.s32.totalorder %v4254_v24, %v4276_v36 }
 0x3cf   : > { %3546 = vmatprep.mubr.msk.f32.mxu0 %vm1494_vm3, %v3062_v32  ;;  %3642 = vmatprep.mubr.msk.f32.mxu1 %vm1494_vm3, %v3126_v31  ;;  %v3288_v9 = vsel %vm2762_vm1, 1.0, %v3742_v34  ;;  %v3275_v15 = vsel %vm2749_vm2, 1.0, %v3742_v34  ;;  %v3279_v32 = vsel %vm2753_vm12, 1.0, %v3742_v34 }
 0x3d0   : > { %v1053_v38 = vpop.permute.xlu1 %1052  ;;  %v861_v39 = vpop.permute.xlu0 %860  ;;  %v2812_v16 = vadd.f32 %v3288_v9, %v2811_v11  ;;  %v2798_v20 = vadd.f32 %v3275_v15, %v3274_v10 }
 0x3d1   : > { %vm1217_vm5 = vcmp.eq.s32.totalorder %v3925_v29, %v1053_v38  ;;  %vm1153_vm6 = vcmp.eq.s32.totalorder %v3925_v29, %v861_v39 }
 0x3d2   : > { %v3127_v42 = vsel %vm1217_vm5, 1.0, %v3742_v34  ;;  %v3063_v43 = vsel %vm1153_vm6, 1.0, %v3742_v34  ;;  %vm2750_vm5 = vcmp.eq.s32.totalorder %v4254_v24, %v4284_v41  ;;  %v2813_v21 = vadd.f32 %v3289_v14, %v2812_v16 }
 0x3d3   : > { %3547 = vmatmul.mubr.msk.f32.gmra.mrb[44].mxu0 %vm1494_vm3, %v3063_v43  ;;  %3643 = vmatmul.mubr.msk.f32.gmra.mrb[44].mxu1 %vm1494_vm3, %v3127_v42  ;;  %v3276_v17 = vsel %vm2750_vm5, 1.0, %v3742_v34 }
 0x3d4   : > { %v1056_v48 = vpop.permute.xlu1 %1055  ;;  %v864_v49 = vpop.permute.xlu0 %863  ;;  %v2799_v27 = vadd.f32 %v3276_v17, %v2798_v20  ;;  %2814 = vadd.xlane.f32.xlu1 %v2813_v21 }
 0x3d5   : > { %vm1218_vm10 = vcmp.eq.s32.totalorder %v3925_v29, %v1056_v48  ;;  %vm1154_vm11 = vcmp.eq.s32.totalorder %v3925_v29, %v864_v49 }
 0x3d6   : > { %v3128_v55 = vsel %vm1218_vm10, 1.0, %v3742_v34  ;;  %v3064_v56 = vsel %vm1154_vm11, 1.0, %v3742_v34  ;;  %v2800_v31 = vadd.f32 %v3277_v22, %v2799_v27 }
 0x3d7   : > { %3549 = vmatprep.mubr.msk.f32.mxu0 %vm1494_vm3, %v3064_v56  ;;  %3645 = vmatprep.mubr.msk.f32.mxu1 %vm1494_vm3, %v3128_v55 }
 0x3d8   : > { %v1059_v60 = vpop.permute.xlu1 %1058  ;;  %v867_v61 = vpop.permute.xlu0 %866  ;;  %v2801_v36 = vadd.f32 %v3278_v28, %v2800_v31 }
 0x3d9   : > { %vm1219_vm15 = vcmp.eq.s32.totalorder %v3925_v29, %v1059_v60  ;;  %vm1155_vm0 = vcmp.eq.s32.totalorder %v3925_v29, %v867_v61 }
 0x3da   : > { %v3129_v3 = vsel %vm1219_vm15, 1.0, %v3742_v34  ;;  %v3065_v4 = vsel %vm1155_vm0, 1.0, %v3742_v34  ;;  %vm2755_vm0 = vcmp.eq.s32.totalorder %v4254_v24, %v2747_v5  ;;  %v2802_v40 = vadd.f32 %v3279_v32, %v2801_v36 }
 0x3db   : > { %3550 = vmatmul.mubr.msk.f32.gmra.mrb[46].mxu0 %vm1494_vm3, %v3065_v4  ;;  %3646 = vmatmul.mubr.msk.f32.gmra.mrb[46].mxu1 %vm1494_vm3, %v3129_v3  ;;  %v3281_v41 = vsel %vm2755_vm0, 1.0, %v3742_v34 }
 0x3dc   : > { %v1062_v7 = vpop.permute.xlu1 %1061  ;;  %v870_v8 = vpop.permute.xlu0 %869  ;;  %v2803_v43 = vadd.f32 %v3280_v37, %v2802_v40 }
 0x3dd   : > { %vm1220_vm6 = vcmp.eq.s32.totalorder %v3925_v29, %v1062_v7  ;;  %vm1156_vm7 = vcmp.eq.s32.totalorder %v3925_v29, %v870_v8 }
 0x3de   : > { %v3130_v12 = vsel %vm1220_vm6, 1.0, %v3742_v34  ;;  %v3066_v13 = vsel %vm1156_vm7, 1.0, %v3742_v34  ;;  %v2804_v46 = vadd.f32 %v3281_v41, %v2803_v43 }
 0x3df   : > { %3552 = vmatprep.mubr.msk.f32.mxu0 %vm1494_vm3, %v3066_v13  ;;  %3648 = vmatprep.mubr.msk.f32.mxu1 %vm1494_vm3, %v3130_v12 }
 0x3e0   : > { %v1065_v18 = vpop.permute.xlu1 %1064  ;;  %v873_v19 = vpop.permute.xlu0 %872  ;;  %2805 = vadd.xlane.f32.xlu0 %v2804_v46 }
 0x3e1   : > { %vm1221_vm10 = vcmp.eq.s32.totalorder %v3925_v29, %v1065_v18  ;;  %vm1157_vm11 = vcmp.eq.s32.totalorder %v3925_v29, %v873_v19 }
 0x3e2   : > { %v3131_v23 = vsel %vm1221_vm10, 1.0, %v3742_v34  ;;  %v3067_v25 = vsel %vm1157_vm11, 1.0, %v3742_v34 }
 0x3e3   : > { %3553 = vmatmul.mubr.msk.f32.gmra.mrb[48].mxu0 %vm1494_vm3, %v3067_v25  ;;  %3649 = vmatmul.mubr.msk.f32.gmra.mrb[48].mxu1 %vm1494_vm3, %v3131_v23 }
 0x3e4   : > { %v1068_v30 = vpop.permute.xlu1 %1067  ;;  %v876_v26 = vpop.permute.xlu0 %875 }
 0x3e5   : > { %vm1222_vm14 = vcmp.eq.s32.totalorder %v3925_v29, %v1068_v30  ;;  %vm1158_vm15 = vcmp.eq.s32.totalorder %v3925_v29, %v876_v26 }
 0x3e6   : > { %v3132_v33 = vsel %vm1222_vm14, 1.0, %v3742_v34  ;;  %v3068_v35 = vsel %vm1158_vm15, 1.0, %v3742_v34 }
 0x3e7   : > { %3555 = vmatprep.mubr.msk.f32.mxu0 %vm1494_vm3, %v3068_v35  ;;  %3651 = vmatprep.mubr.msk.f32.mxu1 %vm1494_vm3, %v3132_v33 }
 0x3e8   : > { %v1071_v38 = vpop.permute.xlu1 %1070  ;;  %v879_v39 = vpop.permute.xlu0 %878 }
 0x3e9   : > { %vm1223_vm1 = vcmp.eq.s32.totalorder %v3925_v29, %v1071_v38  ;;  %vm1159_vm2 = vcmp.eq.s32.totalorder %v3925_v29, %v879_v39 }
 0x3ea   : > { %v3133_v42 = vsel %vm1223_vm1, 1.0, %v3742_v34  ;;  %v3069_v24 = vsel %vm1159_vm2, 1.0, %v3742_v34 }
 0x3eb   : > { %3556 = vmatmul.mubr.msk.f32.gmra.mrb[50].mxu0 %vm1494_vm3, %v3069_v24  ;;  %3652 = vmatmul.mubr.msk.f32.gmra.mrb[50].mxu1 %vm1494_vm3, %v3133_v42 }
 0x3ec   : > { %v1074_v44 = vpop.permute.xlu1 %1073  ;;  %v882_v45 = vpop.permute.xlu0 %881 }
 0x3ed   : > { %vm1224_vm4 = vcmp.eq.s32.totalorder %v3925_v29, %v1074_v44  ;;  %vm1160_vm5 = vcmp.eq.s32.totalorder %v3925_v29, %v882_v45 }
 0x3ee   : > { %v3134_v47 = vsel %vm1224_vm4, 1.0, %v3742_v34  ;;  %v3070_v48 = vsel %vm1160_vm5, 1.0, %v3742_v34 }
 0x3ef   : > { %3558 = vmatprep.mubr.msk.f32.mxu0 %vm1494_vm3, %v3070_v48  ;;  %3654 = vmatprep.mubr.msk.f32.mxu1 %vm1494_vm3, %v3134_v47 }
 0x3f0   : > { %v1077_v49 = vpop.permute.xlu1 %1076  ;;  %v885_v50 = vpop.permute.xlu0 %884 }
 0x3f1   : > { %vm1225_vm6 = vcmp.eq.s32.totalorder %v3925_v29, %v1077_v49  ;;  %vm1161_vm7 = vcmp.eq.s32.totalorder %v3925_v29, %v885_v50 }
 0x3f2   : > { %v3135_v51 = vsel %vm1225_vm6, 1.0, %v3742_v34  ;;  %v3071_v52 = vsel %vm1161_vm7, 1.0, %v3742_v34 }
 0x3f3   : > { %3559 = vmatmul.mubr.msk.f32.gmra.mrb[52].mxu0 %vm1494_vm3, %v3071_v52  ;;  %3655 = vmatmul.mubr.msk.f32.gmra.mrb[52].mxu1 %vm1494_vm3, %v3135_v51 }
 0x3f4   : > { %v1080_v53 = vpop.permute.xlu1 %1079  ;;  %v888_v54 = vpop.permute.xlu0 %887 }
 0x3f5   : > { %vm1226_vm8 = vcmp.eq.s32.totalorder %v3925_v29, %v1080_v53  ;;  %vm1162_vm9 = vcmp.eq.s32.totalorder %v3925_v29, %v888_v54 }
 0x3f6   : > { %v3136_v55 = vsel %vm1226_vm8, 1.0, %v3742_v34  ;;  %v3072_v56 = vsel %vm1162_vm9, 1.0, %v3742_v34  ;;  %v3482_v57 = vpop.f32.mrb[0].mxu0 }
 0x3f7   : > { %2585 = vst.msk [vmem:[%s3815_s18 + $0x8] sm:$0xff] %vm1494_vm3, %v3482_v57  ;;  %v1945_v58 = vpop.f32.mrb[1].mxu0  ;;  %3561 = vmatprep.mubr.msk.f32.mxu0 %vm1494_vm3, %v3072_v56  ;;  %3657 = vmatprep.mubr.msk.f32.mxu1 %vm1494_vm3, %v3136_v55 }
 0x3f8   : > { %2584 = vst.msk [vmem:[%s3815_s18] sm:$0xff] %vm1494_vm3, %v1945_v58  ;;  %v1083_v59 = vpop.permute.xlu1 %1082  ;;  %v891_v60 = vpop.permute.xlu0 %890 }
 0x3f9   : > { %vm1227_vm10 = vcmp.eq.s32.totalorder %v3925_v29, %v1083_v59  ;;  %vm1163_vm11 = vcmp.eq.s32.totalorder %v3925_v29, %v891_v60 }
 0x3fa   : > { %v3137_v61 = vsel %vm1227_vm10, 1.0, %v3742_v34  ;;  %v3073_v62 = vsel %vm1163_vm11, 1.0, %v3742_v34  ;;  %v3485_v63 = vpop.f32.mrb[2].mxu0 }
 0x3fb   : > { %2587 = vst.msk [vmem:[%s3815_s18 + $0x18] sm:$0xff] %vm1494_vm3, %v3485_v63  ;;  %v1955_v0 = vpop.f32.mrb[3].mxu0  ;;  %3562 = vmatmul.mubr.msk.f32.gmra.mrb[54].mxu0 %vm1494_vm3, %v3073_v62  ;;  %3658 = vmatmul.mubr.msk.f32.gmra.mrb[54].mxu1 %vm1494_vm3, %v3137_v61 }
 0x3fc   : > { %2586 = vst.msk [vmem:[%s3815_s18 + $0x10] sm:$0xff] %vm1494_vm3, %v1955_v0  ;;  %v1086_v1 = vpop.permute.xlu1 %1085  ;;  %v894_v2 = vpop.permute.xlu0 %893 }
 0x3fd   : > { %vm1228_vm12 = vcmp.eq.s32.totalorder %v3925_v29, %v1086_v1  ;;  %vm1164_vm13 = vcmp.eq.s32.totalorder %v3925_v29, %v894_v2 }
 0x3fe   : > { %v3138_v3 = vsel %vm1228_vm12, 1.0, %v3742_v34  ;;  %v3074_v4 = vsel %vm1164_vm13, 1.0, %v3742_v34  ;;  %v3488_v5 = vpop.f32.mrb[4].mxu0  ;;  %vm2818_vm13 = vcmask 7168  }
 0x3ff   : > { %2589 = vst.msk [vmem:[%s3815_s18 + $0x28] sm:$0xff] %vm1494_vm3, %v3488_v5  ;;  %v1965_v6 = vpop.f32.mrb[5].mxu0  ;;  %3564 = vmatprep.mubr.msk.f32.mxu0 %vm1494_vm3, %v3074_v4  ;;  %3660 = vmatprep.mubr.msk.f32.mxu1 %vm1494_vm3, %v3138_v3 }
 0x400   : > { %2588 = vst.msk [vmem:[%s3815_s18 + $0x20] sm:$0xff] %vm1494_vm3, %v1965_v6  ;;  %v1089_v7 = vpop.permute.xlu1 %1088  ;;  %v897_v8 = vpop.permute.xlu0 %896 }
 0x401   : > { %vm1229_vm14 = vcmp.eq.s32.totalorder %v3925_v29, %v1089_v7  ;;  %vm1165_vm15 = vcmp.eq.s32.totalorder %v3925_v29, %v897_v8 }
 0x402   : > { %v3139_v9 = vsel %vm1229_vm14, 1.0, %v3742_v34  ;;  %v3075_v10 = vsel %vm1165_vm15, 1.0, %v3742_v34  ;;  %v3491_v11 = vpop.f32.mrb[6].mxu0  ;;  %vm2927_vm14 = vcmask (!%p3290_p6), 64512  }
 0x403   : > { %2591 = vst.msk [vmem:[%s3815_s18 + $0x38] sm:$0xff] %vm1494_vm3, %v3491_v11  ;;  %v1975_v12 = vpop.f32.mrb[7].mxu0  ;;  %3565 = vmatmul.mubr.msk.f32.gmra.mrb[56].mxu0 %vm1494_vm3, %v3075_v10  ;;  %3661 = vmatmul.mubr.msk.f32.gmra.mrb[56].mxu1 %vm1494_vm3, %v3139_v9 }
 0x404   : > { %2590 = vst.msk [vmem:[%s3815_s18 + $0x30] sm:$0xff] %vm1494_vm3, %v1975_v12  ;;  %v1092_v13 = vpop.permute.xlu1 %1091  ;;  %v900_v14 = vpop.permute.xlu0 %899 }
 0x405   : > { %vm1230_vm0 = vcmp.eq.s32.totalorder %v3925_v29, %v1092_v13  ;;  %vm1166_vm1 = vcmp.eq.s32.totalorder %v3925_v29, %v900_v14 }
 0x406   : > { %v3140_v15 = vsel %vm1230_vm0, 1.0, %v3742_v34  ;;  %v3076_v16 = vsel %vm1166_vm1, 1.0, %v3742_v34  ;;  %v3494_v17 = vpop.f32.mrb[8].mxu0 }
 0x407   : > { %2593 = vst.msk [vmem:[%s3815_s18 + $0x48] sm:$0xff] %vm1494_vm3, %v3494_v17  ;;  %v1985_v18 = vpop.f32.mrb[9].mxu0  ;;  %3567 = vmatprep.mubr.msk.f32.mxu0 %vm1494_vm3, %v3076_v16  ;;  %3663 = vmatprep.mubr.msk.f32.mxu1 %vm1494_vm3, %v3140_v15 }
 0x408   : > { %2592 = vst.msk [vmem:[%s3815_s18 + $0x40] sm:$0xff] %vm1494_vm3, %v1985_v18  ;;  %v1095_v19 = vpop.permute.xlu1 %1094  ;;  %v903_v20 = vpop.permute.xlu0 %902 }
 0x409   : > { %vm1231_vm2 = vcmp.eq.s32.totalorder %v3925_v29, %v1095_v19  ;;  %vm1167_vm4 = vcmp.eq.s32.totalorder %v3925_v29, %v903_v20 }
 0x40a   : > { %v3141_v21 = vsel %vm1231_vm2, 1.0, %v3742_v34  ;;  %v3077_v22 = vsel %vm1167_vm4, 1.0, %v3742_v34  ;;  %v3497_v23 = vpop.f32.mrb[10].mxu0 }
 0x40b   : > { %2595 = vst.msk [vmem:[%s3815_s18 + $0x58] sm:$0xff] %vm1494_vm3, %v3497_v23  ;;  %v1995_v25 = vpop.f32.mrb[11].mxu0  ;;  %3568 = vmatmul.mubr.msk.f32.gmra.mrb[58].mxu0 %vm1494_vm3, %v3077_v22  ;;  %3664 = vmatmul.mubr.msk.f32.gmra.mrb[58].mxu1 %vm1494_vm3, %v3141_v21 }
 0x40c   : > { %2594 = vst.msk [vmem:[%s3815_s18 + $0x50] sm:$0xff] %vm1494_vm3, %v1995_v25  ;;  %v1098_v27 = vpop.permute.xlu1 %1097  ;;  %v906_v28 = vpop.permute.xlu0 %905 }
 0x40d   : > { %vm1232_vm5 = vcmp.eq.s32.totalorder %v3925_v29, %v1098_v27  ;;  %vm1168_vm6 = vcmp.eq.s32.totalorder %v3925_v29, %v906_v28 }
 0x40e   : > { %v3142_v30 = vsel %vm1232_vm5, 1.0, %v3742_v34  ;;  %v3078_v26 = vsel %vm1168_vm6, 1.0, %v3742_v34  ;;  %v3500_v31 = vpop.f32.mrb[12].mxu0 }
 0x40f   : > { %2597 = vst.msk [vmem:[%s3815_s18 + $0x68] sm:$0xff] %vm1494_vm3, %v3500_v31  ;;  %v2005_v32 = vpop.f32.mrb[13].mxu0  ;;  %3570 = vmatprep.mubr.msk.f32.mxu0 %vm1494_vm3, %v3078_v26  ;;  %3666 = vmatprep.mubr.msk.f32.mxu1 %vm1494_vm3, %v3142_v30  ;;  %v2797_v26 = vld [vmem:[#allocation4 + $0x8] sm:$0xff] }
 0x410   : > { %2596 = vst.msk [vmem:[%s3815_s18 + $0x60] sm:$0xff] %vm1494_vm3, %v2005_v32  ;;  %v1101_v33 = vpop.permute.xlu1 %1100  ;;  %v909_v35 = vpop.permute.xlu0 %908 }
 0x411   : > { %vm1233_vm7 = vcmp.eq.s32.totalorder %v3925_v29, %v1101_v33  ;;  %vm1169_vm8 = vcmp.eq.s32.totalorder %v3925_v29, %v909_v35 }
 0x412   : > { %v3143_v36 = vsel %vm1233_vm7, 1.0, %v3742_v34  ;;  %v3079_v37 = vsel %vm1169_vm8, 1.0, %v3742_v34  ;;  %v3503_v38 = vpop.f32.mrb[14].mxu0 }
 0x413   : > { %2599 = vst.msk [vmem:[%s3815_s18 + $0x78] sm:$0xff] %vm1494_vm3, %v3503_v38  ;;  %v2015_v39 = vpop.f32.mrb[15].mxu0  ;;  %3571 = vmatmul.mubr.msk.f32.gmra.mrb[60].mxu0 %vm1494_vm3, %v3079_v37  ;;  %3667 = vmatmul.mubr.msk.f32.gmra.mrb[60].mxu1 %vm1494_vm3, %v3143_v36 }
 0x414   : > { %2598 = vst.msk [vmem:[%s3815_s18 + $0x70] sm:$0xff] %vm1494_vm3, %v2015_v39  ;;  %v1104_v40 = vpop.permute.xlu1 %1103  ;;  %v912_v41 = vpop.permute.xlu0 %911  ;;  %v2796_v39 = vld [vmem:[#allocation4] sm:$0xff] }
 0x415   : > { %vm1234_vm9 = vcmp.eq.s32.totalorder %v3925_v29, %v1104_v40  ;;  %vm1170_vm10 = vcmp.eq.s32.totalorder %v3925_v29, %v912_v41 }
 0x416   : > { %v3144_v42 = vsel %vm1234_vm9, 1.0, %v3742_v34  ;;  %v3080_v24 = vsel %vm1170_vm10, 1.0, %v3742_v34  ;;  %v3506_v43 = vpop.f32.mrb[16].mxu0 }
 0x417   : > { %2601 = vst.msk [vmem:[%s3815_s18 + $0x88] sm:$0xff] %vm1494_vm3, %v3506_v43  ;;  %v2025_v44 = vpop.f32.mrb[17].mxu0  ;;  %3573 = vmatprep.mubr.msk.f32.mxu0 %vm1494_vm3, %v3080_v24  ;;  %3669 = vmatprep.mubr.msk.f32.mxu1 %vm1494_vm3, %v3144_v42 }
 0x418   : > { %2600 = vst.msk [vmem:[%s3815_s18 + $0x80] sm:$0xff] %vm1494_vm3, %v2025_v44  ;;  %v1107_v45 = vpop.permute.xlu1 %1106  ;;  %v915_v46 = vpop.permute.xlu0 %914 }
 0x419   : > { %vm1235_vm11 = vcmp.eq.s32.totalorder %v3925_v29, %v1107_v45  ;;  %vm1171_vm12 = vcmp.eq.s32.totalorder %v3925_v29, %v915_v46 }
 0x41a   : > { %v3145_v47 = vsel %vm1235_vm11, 1.0, %v3742_v34  ;;  %v3081_v48 = vsel %vm1171_vm12, 1.0, %v3742_v34  ;;  %v3509_v49 = vpop.f32.mrb[18].mxu0 }
 0x41b   : > { %2603 = vst.msk [vmem:[%s3815_s18 + $0x98] sm:$0xff] %vm1494_vm3, %v3509_v49  ;;  %v2035_v50 = vpop.f32.mrb[19].mxu0  ;;  %3574 = vmatmul.mubr.msk.f32.gmra.mrb[62].mxu0 %vm1494_vm3, %v3081_v48  ;;  %3670 = vmatmul.mubr.msk.f32.gmra.mrb[62].mxu1 %vm1494_vm3, %v3145_v47 }
 0x41c   : > { %2602 = vst.msk [vmem:[%s3815_s18 + $0x90] sm:$0xff] %vm1494_vm3, %v2035_v50 }
 0x41e   : > { %v3512_v29 = vpop.f32.mrb[20].mxu0 }
 0x41f   : > { %2605 = vst.msk [vmem:[%s3815_s18 + $0xa8] sm:$0xff] %vm1494_vm3, %v3512_v29  ;;  %v2045_v51 = vpop.f32.mrb[21].mxu0 }
 0x420   : > { %2604 = vst.msk [vmem:[%s3815_s18 + $0xa0] sm:$0xff] %vm1494_vm3, %v2045_v51 }
 0x422   : > { %v3515_v34 = vpop.f32.mrb[22].mxu0 }
 0x423   : > { %2607 = vst.msk [vmem:[%s3815_s18 + $0xb8] sm:$0xff] %vm1494_vm3, %v3515_v34  ;;  %v2055_v52 = vpop.f32.mrb[23].mxu0 }
 0x424   : > { %2606 = vst.msk [vmem:[%s3815_s18 + $0xb0] sm:$0xff] %vm1494_vm3, %v2055_v52 }
 0x426   : > { %v3518_v53 = vpop.f32.mrb[24].mxu0 }
 0x427   : > { %2609 = vst.msk [vmem:[%s3815_s18 + $0xc8] sm:$0xff] %vm1494_vm3, %v3518_v53  ;;  %v2065_v54 = vpop.f32.mrb[25].mxu0 }
 0x428   : > { %2608 = vst.msk [vmem:[%s3815_s18 + $0xc0] sm:$0xff] %vm1494_vm3, %v2065_v54 }
 0x42a   : > { %v3521_v55 = vpop.f32.mrb[26].mxu0 }
 0x42b   : > { %2611 = vst.msk [vmem:[%s3815_s18 + $0xd8] sm:$0xff] %vm1494_vm3, %v3521_v55  ;;  %v2075_v56 = vpop.f32.mrb[27].mxu0 }
 0x42c   : > { %2610 = vst.msk [vmem:[%s3815_s18 + $0xd0] sm:$0xff] %vm1494_vm3, %v2075_v56 }
 0x42e   : > { %v3524_v57 = vpop.f32.mrb[28].mxu0 }
 0x42f   : > { %2613 = vst.msk [vmem:[%s3815_s18 + $0xe8] sm:$0xff] %vm1494_vm3, %v3524_v57  ;;  %v2085_v58 = vpop.f32.mrb[29].mxu0 }
 0x430   : > { %2612 = vst.msk [vmem:[%s3815_s18 + $0xe0] sm:$0xff] %vm1494_vm3, %v2085_v58 }
 0x432   : > { %v3527_v59 = vpop.f32.mrb[30].mxu0 }
 0x433   : > { %2615 = vst.msk [vmem:[%s3815_s18 + $0xf8] sm:$0xff] %vm1494_vm3, %v3527_v59  ;;  %v2095_v60 = vpop.f32.mrb[31].mxu0  ;;  %v3578_v61 = vpop.f32.mrb[0].mxu1 }
 0x434   : > { %2614 = vst.msk [vmem:[%s3815_s18 + $0xf0] sm:$0xff] %vm1494_vm3, %v2095_v60  ;;  %2649 = vst.msk [vmem:[%s3815_s18 + $0x208] sm:$0xff] %vm1494_vm3, %v3578_v61  ;;  %v2265_v62 = vpop.f32.mrb[1].mxu1 }
 0x435   : > { %2648 = vst.msk [vmem:[%s3815_s18 + $0x200] sm:$0xff] %vm1494_vm3, %v2265_v62 }
 0x437   : > { %v3581_v63 = vpop.f32.mrb[2].mxu1 }
 0x438   : > { %2651 = vst.msk [vmem:[%s3815_s18 + $0x218] sm:$0xff] %vm1494_vm3, %v3581_v63  ;;  %v2275_v0 = vpop.f32.mrb[3].mxu1 }
 0x439   : > { %2650 = vst.msk [vmem:[%s3815_s18 + $0x210] sm:$0xff] %vm1494_vm3, %v2275_v0 }
 0x43b   : > { %v3584_v1 = vpop.f32.mrb[4].mxu1 }
 0x43c   : > { %2653 = vst.msk [vmem:[%s3815_s18 + $0x228] sm:$0xff] %vm1494_vm3, %v3584_v1  ;;  %v2285_v2 = vpop.f32.mrb[5].mxu1 }
 0x43d   : > { %2652 = vst.msk [vmem:[%s3815_s18 + $0x220] sm:$0xff] %vm1494_vm3, %v2285_v2 }
 0x43f   : > { %v3587_v3 = vpop.f32.mrb[6].mxu1 }
 0x440   : > { %2655 = vst.msk [vmem:[%s3815_s18 + $0x238] sm:$0xff] %vm1494_vm3, %v3587_v3  ;;  %v2295_v4 = vpop.f32.mrb[7].mxu1 }
 0x441   : > { %2654 = vst.msk [vmem:[%s3815_s18 + $0x230] sm:$0xff] %vm1494_vm3, %v2295_v4 }
 0x443   : > { %v3590_v5 = vpop.f32.mrb[8].mxu1 }
 0x444   : > { %2657 = vst.msk [vmem:[%s3815_s18 + $0x248] sm:$0xff] %vm1494_vm3, %v3590_v5  ;;  %v2305_v6 = vpop.f32.mrb[9].mxu1 }
 0x445   : > { %2656 = vst.msk [vmem:[%s3815_s18 + $0x240] sm:$0xff] %vm1494_vm3, %v2305_v6 }
 0x447   : > { %v3593_v7 = vpop.f32.mrb[10].mxu1 }
 0x448   : > { %2659 = vst.msk [vmem:[%s3815_s18 + $0x258] sm:$0xff] %vm1494_vm3, %v3593_v7  ;;  %v2315_v8 = vpop.f32.mrb[11].mxu1 }
 0x449   : > { %2658 = vst.msk [vmem:[%s3815_s18 + $0x250] sm:$0xff] %vm1494_vm3, %v2315_v8 }
 0x44b   : > { %v3596_v9 = vpop.f32.mrb[12].mxu1 }
 0x44c   : > { %2661 = vst.msk [vmem:[%s3815_s18 + $0x268] sm:$0xff] %vm1494_vm3, %v3596_v9  ;;  %v2325_v10 = vpop.f32.mrb[13].mxu1 }
 0x44d   : > { %2660 = vst.msk [vmem:[%s3815_s18 + $0x260] sm:$0xff] %vm1494_vm3, %v2325_v10 }
 0x44f   : > { %v3599_v11 = vpop.f32.mrb[14].mxu1 }
 0x450   : > { %2663 = vst.msk [vmem:[%s3815_s18 + $0x278] sm:$0xff] %vm1494_vm3, %v3599_v11  ;;  %v2335_v12 = vpop.f32.mrb[15].mxu1 }
 0x451   : > { %2662 = vst.msk [vmem:[%s3815_s18 + $0x270] sm:$0xff] %vm1494_vm3, %v2335_v12 }
 0x453   : > { %v3602_v13 = vpop.f32.mrb[16].mxu1 }
 0x454   : > { %2665 = vst.msk [vmem:[%s3815_s18 + $0x288] sm:$0xff] %vm1494_vm3, %v3602_v13  ;;  %v2345_v14 = vpop.f32.mrb[17].mxu1 }
 0x455   : > { %2664 = vst.msk [vmem:[%s3815_s18 + $0x280] sm:$0xff] %vm1494_vm3, %v2345_v14 }
 0x457   : > { %v3605_v15 = vpop.f32.mrb[18].mxu1 }
 0x458   : > { %2667 = vst.msk [vmem:[%s3815_s18 + $0x298] sm:$0xff] %vm1494_vm3, %v3605_v15  ;;  %v2355_v16 = vpop.f32.mrb[19].mxu1 }
 0x459   : > { %2666 = vst.msk [vmem:[%s3815_s18 + $0x290] sm:$0xff] %vm1494_vm3, %v2355_v16 }
 0x45b   : > { %v3608_v17 = vpop.f32.mrb[20].mxu1 }
 0x45c   : > { %2669 = vst.msk [vmem:[%s3815_s18 + $0x2a8] sm:$0xff] %vm1494_vm3, %v3608_v17  ;;  %v2365_v18 = vpop.f32.mrb[21].mxu1 }
 0x45d   : > { %2668 = vst.msk [vmem:[%s3815_s18 + $0x2a0] sm:$0xff] %vm1494_vm3, %v2365_v18 }
 0x45f   : > { %v3611_v19 = vpop.f32.mrb[22].mxu1 }
 0x460   : > { %2671 = vst.msk [vmem:[%s3815_s18 + $0x2b8] sm:$0xff] %vm1494_vm3, %v3611_v19  ;;  %v2375_v20 = vpop.f32.mrb[23].mxu1 }
 0x461   : > { %2670 = vst.msk [vmem:[%s3815_s18 + $0x2b0] sm:$0xff] %vm1494_vm3, %v2375_v20  ;;  %v2815_v32 = vpop.xlane.xlu1 %2814 }
 0x462   : > { %v2817_v33 = vadd.f32 %v2815_v32, %v2797_v26 }
 0x463   : > { %v3614_v21 = vpop.f32.mrb[24].mxu1 }
 0x464   : > { %2673 = vst.msk [vmem:[%s3815_s18 + $0x2c8] sm:$0xff] %vm1494_vm3, %v3614_v21  ;;  %v2385_v22 = vpop.f32.mrb[25].mxu1 }
 0x465   : > { %2672 = vst.msk [vmem:[%s3815_s18 + $0x2c0] sm:$0xff] %vm1494_vm3, %v2385_v22 }
 0x466   : > { %2820 = vst.msk [vmem:[#allocation4 + $0x8] sm:$0xff] %vm2818_vm13, %v2817_v33 }
 0x467   : > { %v3617_v23 = vpop.f32.mrb[26].mxu1 }
 0x468   : > { %2675 = vst.msk [vmem:[%s3815_s18 + $0x2d8] sm:$0xff] %vm1494_vm3, %v3617_v23  ;;  %v2395_v25 = vpop.f32.mrb[27].mxu1 }
 0x469   : > { %2674 = vst.msk [vmem:[%s3815_s18 + $0x2d0] sm:$0xff] %vm1494_vm3, %v2395_v25 }
 0x46b   : > { %v3620_v27 = vpop.f32.mrb[28].mxu1 }
 0x46c   : > { %2677 = vst.msk [vmem:[%s3815_s18 + $0x2e8] sm:$0xff] %vm1494_vm3, %v3620_v27  ;;  %v2405_v28 = vpop.f32.mrb[29].mxu1 }
 0x46d   : > { %2676 = vst.msk [vmem:[%s3815_s18 + $0x2e0] sm:$0xff] %vm1494_vm3, %v2405_v28  ;;  %v2806_v40 = vpop.xlane.xlu0 %2805 }
 0x46e   : > { %v2816_v41 = vadd.f32 %v2806_v40, %v2796_v39  ;;  %v2841_v39 = vld [vmem:[%s4746_s6] sm:$0xff] (!%p3290_p6)  ;;  %v3743_v40 = vmov (!%p3290_p6), 0  }
 0x46f   : > { %v3623_v30 = vpop.f32.mrb[30].mxu1  ;;  %3731 = vset.pattern.permute.xlu0 (!%p3290_p6), %v3743_v40 }
 0x470   : > { %2679 = vst.msk [vmem:[%s3815_s18 + $0x2f8] sm:$0xff] %vm1494_vm3, %v3623_v30  ;;  %v2415_v31 = vpop.f32.mrb[31].mxu1 }
 0x471   : > { %2678 = vst.msk [vmem:[%s3815_s18 + $0x2f0] sm:$0xff] %vm1494_vm3, %v2415_v31 }
 0x472   : > { %2819 = vst.msk [vmem:[#allocation4] sm:$0xff] %vm2818_vm13, %v2816_v41  ;;  %v2842_v41 = vld [vmem:[%s4746_s6 + $0x8] sm:$0xff] (!%p3290_p6) }
 0x476   : > { %v3530_v35 = vpop.f32.mrb[32].mxu0  ;;  %v3626_v36 = vpop.f32.mrb[32].mxu1 }
 0x477   : > { %2617 = vst.msk [vmem:[%s3815_s18 + $0x108] sm:$0xff] %vm1494_vm3, %v3530_v35  ;;  %2681 = vst.msk [vmem:[%s3815_s18 + $0x308] sm:$0xff] %vm1494_vm3, %v3626_v36  ;;  %v2105_v37 = vpop.f32.mrb[33].mxu0  ;;  %v2425_v38 = vpop.f32.mrb[33].mxu1 }
 0x478   : > { %2616 = vst.msk [vmem:[%s3815_s18 + $0x100] sm:$0xff] %vm1494_vm3, %v2105_v37  ;;  %2680 = vst.msk [vmem:[%s3815_s18 + $0x300] sm:$0xff] %vm1494_vm3, %v2425_v38 }
 0x479   : > { %v2825_v38 = vld [vmem:[#allocation4] sm:$0xff] (!%p3290_p6) }
 0x47a   : > { %2831 = vperm.xlu0 (!%p3290_p6), %3731, %v2825_v38  }
 0x47e   : > { %v3533_v42 = vpop.f32.mrb[34].mxu0  ;;  %v3629_v24 = vpop.f32.mrb[34].mxu1 }
 0x47f   : > { %2619 = vst.msk [vmem:[%s3815_s18 + $0x118] sm:$0xff] %vm1494_vm3, %v3533_v42  ;;  %2683 = vst.msk [vmem:[%s3815_s18 + $0x318] sm:$0xff] %vm1494_vm3, %v3629_v24  ;;  %v2115_v43 = vpop.f32.mrb[35].mxu0  ;;  %v2435_v44 = vpop.f32.mrb[35].mxu1  ;;  %v2843_v42 = vld [vmem:[%s4746_s6 + $0x10] sm:$0xff] (!%p3290_p6)  ;;  %v3707_v24 = vpack.c.bf16 (!%p3290_p6), %v2842_v41, %v2841_v39 }
 0x480   : > { %2618 = vst.msk [vmem:[%s3815_s18 + $0x110] sm:$0xff] %vm1494_vm3, %v2115_v43  ;;  %2682 = vst.msk [vmem:[%s3815_s18 + $0x310] sm:$0xff] %vm1494_vm3, %v2435_v44  ;;  %v2844_v43 = vld [vmem:[%s4746_s6 + $0x18] sm:$0xff] (!%p3290_p6)  ;;  %v2826_v44 = vld [vmem:[#allocation4 + $0x8] sm:$0xff] (!%p3290_p6) }
 0x481   : > { %3708 = vmatprep.subr.bf16.mxu0 (!%p3290_p6), %v3707_v24  ;;  %2836 = vperm.xlu0 (!%p3290_p6), %3731, %v2826_v44  }
 0x482   : > { %3710 = vmatpush3.bf16.msra.mxu0 (!%p3290_p6), %v3707_v24 }
 0x486   : > { %v3536_v45 = vpop.f32.mrb[36].mxu0  ;;  %v3632_v46 = vpop.f32.mrb[36].mxu1 }
 0x487   : > { %2621 = vst.msk [vmem:[%s3815_s18 + $0x128] sm:$0xff] %vm1494_vm3, %v3536_v45  ;;  %2685 = vst.msk [vmem:[%s3815_s18 + $0x328] sm:$0xff] %vm1494_vm3, %v3632_v46  ;;  %v2125_v47 = vpop.f32.mrb[37].mxu0  ;;  %v2445_v48 = vpop.f32.mrb[37].mxu1  ;;  %v3711_v45 = vpack.c.bf16 (!%p3290_p6), %v2844_v43, %v2843_v42  ;;  %v2827_v46 = vld [vmem:[#allocation3] sm:$0xff] (!%p3290_p6) }
 0x488   : > { %2620 = vst.msk [vmem:[%s3815_s18 + $0x120] sm:$0xff] %vm1494_vm3, %v2125_v47  ;;  %2684 = vst.msk [vmem:[%s3815_s18 + $0x320] sm:$0xff] %vm1494_vm3, %v2445_v48 }
 0x489   : > { %3712 = vmatprep.subr.bf16.mxu0 (!%p3290_p6), %v3711_v45 }
 0x48a   : > { %3714 = vmatpush3.bf16.msra.mxu0 (!%p3290_p6), %v3711_v45 }
 0x48e   : > { %v3539_v49 = vpop.f32.mrb[38].mxu0  ;;  %v3635_v50 = vpop.f32.mrb[38].mxu1 }
 0x48f   : > { %2623 = vst.msk [vmem:[%s3815_s18 + $0x138] sm:$0xff] %vm1494_vm3, %v3539_v49  ;;  %2687 = vst.msk [vmem:[%s3815_s18 + $0x338] sm:$0xff] %vm1494_vm3, %v3635_v50  ;;  %v2135_v29 = vpop.f32.mrb[39].mxu0  ;;  %v2455_v51 = vpop.f32.mrb[39].mxu1  ;;  %v2828_v49 = vld [vmem:[#allocation3 + $0x8] sm:$0xff] (!%p3290_p6) }
 0x490   : > { %2622 = vst.msk [vmem:[%s3815_s18 + $0x130] sm:$0xff] %vm1494_vm3, %v2135_v29  ;;  %2686 = vst.msk [vmem:[%s3815_s18 + $0x330] sm:$0xff] %vm1494_vm3, %v2455_v51 }
 0x496   : > { %v3542_v34 = vpop.f32.mrb[40].mxu0  ;;  %v3638_v52 = vpop.f32.mrb[40].mxu1 }
 0x497   : > { %2625 = vst.msk [vmem:[%s3815_s18 + $0x148] sm:$0xff] %vm1494_vm3, %v3542_v34  ;;  %2689 = vst.msk [vmem:[%s3815_s18 + $0x348] sm:$0xff] %vm1494_vm3, %v3638_v52  ;;  %v2145_v53 = vpop.f32.mrb[41].mxu0  ;;  %v2465_v54 = vpop.f32.mrb[41].mxu1 }
 0x498   : > { %2624 = vst.msk [vmem:[%s3815_s18 + $0x140] sm:$0xff] %vm1494_vm3, %v2145_v53  ;;  %2688 = vst.msk [vmem:[%s3815_s18 + $0x340] sm:$0xff] %vm1494_vm3, %v2465_v54 }
 0x49e   : > { %v3545_v55 = vpop.f32.mrb[42].mxu0  ;;  %v3641_v56 = vpop.f32.mrb[42].mxu1 }
 0x49f   : > { %2627 = vst.msk [vmem:[%s3815_s18 + $0x158] sm:$0xff] %vm1494_vm3, %v3545_v55  ;;  %2691 = vst.msk [vmem:[%s3815_s18 + $0x358] sm:$0xff] %vm1494_vm3, %v3641_v56  ;;  %v2155_v57 = vpop.f32.mrb[43].mxu0  ;;  %v2475_v58 = vpop.f32.mrb[43].mxu1 }
 0x4a0   : > { %2626 = vst.msk [vmem:[%s3815_s18 + $0x150] sm:$0xff] %vm1494_vm3, %v2155_v57  ;;  %2690 = vst.msk [vmem:[%s3815_s18 + $0x350] sm:$0xff] %vm1494_vm3, %v2475_v58 }
 0x4a6   : > { %v3548_v59 = vpop.f32.mrb[44].mxu0  ;;  %v3644_v60 = vpop.f32.mrb[44].mxu1 }
 0x4a7   : > { %2629 = vst.msk [vmem:[%s3815_s18 + $0x168] sm:$0xff] %vm1494_vm3, %v3548_v59  ;;  %2693 = vst.msk [vmem:[%s3815_s18 + $0x368] sm:$0xff] %vm1494_vm3, %v3644_v60  ;;  %v2165_v61 = vpop.f32.mrb[45].mxu0  ;;  %v2485_v62 = vpop.f32.mrb[45].mxu1 }
 0x4a8   : > { %2628 = vst.msk [vmem:[%s3815_s18 + $0x160] sm:$0xff] %vm1494_vm3, %v2165_v61  ;;  %2692 = vst.msk [vmem:[%s3815_s18 + $0x360] sm:$0xff] %vm1494_vm3, %v2485_v62 }
 0x4ae   : > { %v3551_v63 = vpop.f32.mrb[46].mxu0  ;;  %v3647_v0 = vpop.f32.mrb[46].mxu1 }
 0x4af   : > { %2631 = vst.msk [vmem:[%s3815_s18 + $0x178] sm:$0xff] %vm1494_vm3, %v3551_v63  ;;  %2695 = vst.msk [vmem:[%s3815_s18 + $0x378] sm:$0xff] %vm1494_vm3, %v3647_v0  ;;  %v2175_v1 = vpop.f32.mrb[47].mxu0  ;;  %v2495_v2 = vpop.f32.mrb[47].mxu1 }
 0x4b0   : > { %2630 = vst.msk [vmem:[%s3815_s18 + $0x170] sm:$0xff] %vm1494_vm3, %v2175_v1  ;;  %2694 = vst.msk [vmem:[%s3815_s18 + $0x370] sm:$0xff] %vm1494_vm3, %v2495_v2 }
 0x4b6   : > { %v3554_v3 = vpop.f32.mrb[48].mxu0  ;;  %v3650_v4 = vpop.f32.mrb[48].mxu1 }
 0x4b7   : > { %2633 = vst.msk [vmem:[%s3815_s18 + $0x188] sm:$0xff] %vm1494_vm3, %v3554_v3  ;;  %2697 = vst.msk [vmem:[%s3815_s18 + $0x388] sm:$0xff] %vm1494_vm3, %v3650_v4  ;;  %v2185_v5 = vpop.f32.mrb[49].mxu0  ;;  %v2505_v6 = vpop.f32.mrb[49].mxu1 }
 0x4b8   : > { %2632 = vst.msk [vmem:[%s3815_s18 + $0x180] sm:$0xff] %vm1494_vm3, %v2185_v5  ;;  %2696 = vst.msk [vmem:[%s3815_s18 + $0x380] sm:$0xff] %vm1494_vm3, %v2505_v6 }
 0x4be   : > { %v3557_v7 = vpop.f32.mrb[50].mxu0  ;;  %v3653_v8 = vpop.f32.mrb[50].mxu1 }
 0x4bf   : > { %2635 = vst.msk [vmem:[%s3815_s18 + $0x198] sm:$0xff] %vm1494_vm3, %v3557_v7  ;;  %2699 = vst.msk [vmem:[%s3815_s18 + $0x398] sm:$0xff] %vm1494_vm3, %v3653_v8  ;;  %v2195_v9 = vpop.f32.mrb[51].mxu0  ;;  %v2515_v10 = vpop.f32.mrb[51].mxu1 }
 0x4c0   : > { %2634 = vst.msk [vmem:[%s3815_s18 + $0x190] sm:$0xff] %vm1494_vm3, %v2195_v9  ;;  %2698 = vst.msk [vmem:[%s3815_s18 + $0x390] sm:$0xff] %vm1494_vm3, %v2515_v10 }
 0x4c6   : > { %v3560_v11 = vpop.f32.mrb[52].mxu0  ;;  %v3656_v12 = vpop.f32.mrb[52].mxu1 }
 0x4c7   : > { %2637 = vst.msk [vmem:[%s3815_s18 + $0x1a8] sm:$0xff] %vm1494_vm3, %v3560_v11  ;;  %2701 = vst.msk [vmem:[%s3815_s18 + $0x3a8] sm:$0xff] %vm1494_vm3, %v3656_v12  ;;  %v2205_v13 = vpop.f32.mrb[53].mxu0  ;;  %v2525_v14 = vpop.f32.mrb[53].mxu1 }
 0x4c8   : > { %2636 = vst.msk [vmem:[%s3815_s18 + $0x1a0] sm:$0xff] %vm1494_vm3, %v2205_v13  ;;  %2700 = vst.msk [vmem:[%s3815_s18 + $0x3a0] sm:$0xff] %vm1494_vm3, %v2525_v14 }
 0x4ce   : > { %v3563_v15 = vpop.f32.mrb[54].mxu0  ;;  %v3659_v16 = vpop.f32.mrb[54].mxu1 }
 0x4cf   : > { %2639 = vst.msk [vmem:[%s3815_s18 + $0x1b8] sm:$0xff] %vm1494_vm3, %v3563_v15  ;;  %2703 = vst.msk [vmem:[%s3815_s18 + $0x3b8] sm:$0xff] %vm1494_vm3, %v3659_v16  ;;  %v2215_v17 = vpop.f32.mrb[55].mxu0  ;;  %v2535_v18 = vpop.f32.mrb[55].mxu1 }
 0x4d0   : > { %2638 = vst.msk [vmem:[%s3815_s18 + $0x1b0] sm:$0xff] %vm1494_vm3, %v2215_v17  ;;  %2702 = vst.msk [vmem:[%s3815_s18 + $0x3b0] sm:$0xff] %vm1494_vm3, %v2535_v18 }
 0x4d6   : > { %v3566_v19 = vpop.f32.mrb[56].mxu0  ;;  %v3662_v20 = vpop.f32.mrb[56].mxu1 }
 0x4d7   : > { %2641 = vst.msk [vmem:[%s3815_s18 + $0x1c8] sm:$0xff] %vm1494_vm3, %v3566_v19  ;;  %2705 = vst.msk [vmem:[%s3815_s18 + $0x3c8] sm:$0xff] %vm1494_vm3, %v3662_v20  ;;  %v2225_v21 = vpop.f32.mrb[57].mxu0  ;;  %v2545_v22 = vpop.f32.mrb[57].mxu1 }
 0x4d8   : > { %2640 = vst.msk [vmem:[%s3815_s18 + $0x1c0] sm:$0xff] %vm1494_vm3, %v2225_v21  ;;  %2704 = vst.msk [vmem:[%s3815_s18 + $0x3c0] sm:$0xff] %vm1494_vm3, %v2545_v22 }
 0x4de   : > { %v3569_v23 = vpop.f32.mrb[58].mxu0  ;;  %v3665_v25 = vpop.f32.mrb[58].mxu1 }
 0x4df   : > { %2643 = vst.msk [vmem:[%s3815_s18 + $0x1d8] sm:$0xff] %vm1494_vm3, %v3569_v23  ;;  %2707 = vst.msk [vmem:[%s3815_s18 + $0x3d8] sm:$0xff] %vm1494_vm3, %v3665_v25  ;;  %v2235_v27 = vpop.f32.mrb[59].mxu0  ;;  %v2555_v28 = vpop.f32.mrb[59].mxu1 }
 0x4e0   : > { %2642 = vst.msk [vmem:[%s3815_s18 + $0x1d0] sm:$0xff] %vm1494_vm3, %v2235_v27  ;;  %2706 = vst.msk [vmem:[%s3815_s18 + $0x3d0] sm:$0xff] %vm1494_vm3, %v2555_v28 }
 0x4e6   : > { %v3572_v30 = vpop.f32.mrb[60].mxu0  ;;  %v3668_v26 = vpop.f32.mrb[60].mxu1 }
 0x4e7   : > { %2645 = vst.msk [vmem:[%s3815_s18 + $0x1e8] sm:$0xff] %vm1494_vm3, %v3572_v30  ;;  %2709 = vst.msk [vmem:[%s3815_s18 + $0x3e8] sm:$0xff] %vm1494_vm3, %v3668_v26  ;;  %v2245_v31 = vpop.f32.mrb[61].mxu0  ;;  %v2565_v32 = vpop.f32.mrb[61].mxu1 }
 0x4e8   : > { %2644 = vst.msk [vmem:[%s3815_s18 + $0x1e0] sm:$0xff] %vm1494_vm3, %v2245_v31  ;;  %2708 = vst.msk [vmem:[%s3815_s18 + $0x3e0] sm:$0xff] %vm1494_vm3, %v2565_v32 }
 0x4ea   : > { %2824 = sbr.rel (%p3290_p6) target bundleno = 1497 (0x5d9), region = 56 }
 0x4ee   : > { %v3575_v33 = vpop.f32.mrb[62].mxu0  ;;  %v3671_v35 = vpop.f32.mrb[62].mxu1 }
 0x4ef   : > { %2647 = vst.msk [vmem:[%s3815_s18 + $0x1f8] sm:$0xff] %vm1494_vm3, %v3575_v33  ;;  %2711 = vst.msk [vmem:[%s3815_s18 + $0x3f8] sm:$0xff] %vm1494_vm3, %v3671_v35  ;;  %v2255_v36 = vpop.f32.mrb[63].mxu0  ;;  %v2575_v37 = vpop.f32.mrb[63].mxu1 }
 0x4f0   : > { %2646 = vst.msk [vmem:[%s3815_s18 + $0x1f0] sm:$0xff] %vm1494_vm3, %v2255_v36  ;;  %2710 = vst.msk [vmem:[%s3815_s18 + $0x3f0] sm:$0xff] %vm1494_vm3, %v2575_v37  ;;  %vm2845_vm3 = vcmask (!%p3290_p6), 261120  }
 0x4f9   : > { %v2832_v47 = vpop.permute.xlu0 %2831 }
 0x4fa   : > { %v2839_v48 = vmul.f32 %v2832_v47, %v2827_v46 }
 0x4fc   : > { %3680 = vmatprep.mubr.msk.f32.mxu0 %vm2845_vm3, %v2839_v48 }
 0x500   : > { %v2837_v50 = vpop.permute.xlu0 %2836 }
 0x501   : > { %v2840_v29 = vmul.f32 %v2837_v50, %v2828_v49 }
 0x503   : > { %3681 = vmatmul.mubr.msk.f32.vlgmr.msra.gmra.mrb[0].mxu0 %vm2845_vm3, %v2840_v29 }
 0x5d6   : > { %v3682_v51 = vpop.f32.mrb[0].mxu0 }
 0x5d7   : > { %2929 = vst.msk [vmem:[%s4748_s8 + $0x8] sm:$0xff] %vm2927_vm14, %v3682_v51  ;;  %v2918_v34 = vpop.f32.mrb[1].mxu0 }
 0x5d8   : > { %2928 = vst.msk [vmem:[%s4748_s8] sm:$0xff] %vm2927_vm14, %v2918_v34 }
 0x5d9 PF: > { %s19_s27 = sadd.s32 1, %s3738_s27  }
 0x5da   : > { %p16_p7 = scmp.ge.s32.totalorder %s19_s27, 4  }
 0x5dc   :  { %18 = sbr.rel (!%p16_p7) target bundleno = 1 (0x1), region = 97 }

</bundles_post_ra>
